<compile_context>
chip_gen: v7x
topology: tpu7x:2x2x1
jax: 0.10.0
libtpu: 0.0.40
codegen_flags: <defaults>
</compile_context>

<pallas_src>
import functools
import math
from dataclasses import dataclass
from typing import Union

import jax
import jax.numpy as jnp
from jax import lax
from jax.experimental import pallas as pl
from jax.experimental.pallas import tpu as pltpu


@dataclass
class MambaConfig:
    d_model: int
    lookback_w: int
    num_series: int
    forecast_h: int
    n_layers: int
    dt_rank: Union[int, str] = "auto"
    d_state: int = 16
    d_conv: int = 1
    dt_min: float = 0.001
    dt_max: float = 0.1
    dt_init: str = "constant"
    dt_scale: float = 1.0
    dt_init_floor: float = 0.0001
    bias: bool = True
    conv_bias: bool = True
    dropout: float = 0.0
    pscan: bool = True

    def __post_init__(self):
        self.d_inner = 1 * self.d_model
        if self.dt_rank == "auto":
            self.dt_rank = math.ceil(self.d_model / 16)


# ---------------------------------------------------------------------------
# Small math helpers (lower cleanly on the VPU/EUP)
# ---------------------------------------------------------------------------

def _erf(v):
    # Abramowitz & Stegun 7.1.26 (|err| < 1.5e-7) -> matches F.gelu's exact
    # erf-based formulation well within the test tolerance.
    a1, a2, a3, a4, a5 = (0.254829592, -0.284496736, 1.421413741,
                          -1.453152027, 1.061405429)
    p = 0.3275911
    s = jnp.where(v >= 0.0, 1.0, -1.0)
    av = jnp.abs(v)
    t = 1.0 / (1.0 + p * av)
    poly = ((((a5 * t + a4) * t + a3) * t + a2) * t + a1) * t
    return s * (1.0 - poly * jnp.exp(-av * av))


def _gelu(v):
    return 0.5 * v * (1.0 + _erf(v * 0.7071067811865476))


# ---------------------------------------------------------------------------
# Pallas kernel (one (batch, L-chunk) tile per grid step)
# ---------------------------------------------------------------------------

def _mamba_block_kernel(x_ref, cw_ref, cb_ref, wxp_ref, bxp_ref, wdt_ref,
                        bdt_ref, at_ref, d_ref, o_ref,
                        h_s, dA_s, bx_s, cm_s, sk_s, gz_s, xext_s,
                        *, g_size, ec):
    li = pl.program_id(1)               # sequence-chunk index (arbitrary axis)
    TL, E = x_ref.shape                 # chunk length, channels (static)
    K = cw_ref.shape[0]                 # d_conv
    N = at_ref.shape[0]                 # d_state
    R = wdt_ref.shape[0]                # dt_rank
    G = g_size                          # scan unroll-group size (8 if possible)
    EC = ec                             # E-block width for the scan
    n_eb = E // EC
    n_grp = TL // G
    f32 = jnp.float32

    x = x_ref[...]                      # (TL, E)

    # ---- causal depthwise conv1d (left zero padding of K-1 rows) -----------
    if K == 1:
        xc = cw_ref[0:1, :] * x + cb_ref[...]
    else:
        Kh = K - 1
        # xext_s rows [0, Kh) hold the previous chunk's tail (zeros at the
        # start of each batch element == the conv's zero padding).
        @pl.when(li == 0)
        def _():
            xext_s[0:Kh, :] = jnp.zeros((Kh, E), f32)
        xext_s[Kh:, :] = x                                   # current chunk
        xc = cw_ref[K - 1:K, :] * x + cb_ref[...]            # tap K-1 + bias
        for k in range(K - 1):                               # remaining taps
            xc = xc + cw_ref[k:k + 1, :] * xext_s[k:k + TL, :]
        xext_s[0:Kh, :] = xext_s[TL:TL + Kh, :]              # halo for next chunk

    xg = _gelu(xc)                      # conv branch after GELU (feeds SSM)
    gz_s[...] = _gelu(x)                # gate branch z = GELU(x)
    sk_s[...] = d_ref[...] * xg         # D-skip term (folded into scan store)

    # ---- fused x_proj (single wide MXU matmul) -> split delta / B / C ------
    dbc = jnp.dot(xg, wxp_ref[...], preferred_element_type=f32,
                  precision=lax.Precision.HIGHEST) + bxp_ref[...]   # (TL,R+2N)
    dlt = dbc[:, :R]
    Bm = dbc[:, R:R + N]
    cm_s[...] = dbc[:, R + N:R + 2 * N]                      # C, natural (TL,N)

    dt = jnp.dot(dlt, wdt_ref[...], preferred_element_type=f32,
                 precision=lax.Precision.HIGHEST) + bdt_ref[...]    # (TL, E)
    delta = jnp.maximum(dt, 0.0) + jnp.log(1.0 + jnp.exp(-jnp.abs(dt)))

    # ---- discretization, lane-dense layout (N on sublanes, E on lanes) -----
    # at_ref = (-exp(A_log)).T, precomputed in the wrapper: (N, E)
    dA_s[...] = jnp.exp(delta[:, None, :] * at_ref[...][None, :, :])   # (TL,N,E)
    bx_s[...] = Bm[:, :, None] * (delta * xg)[:, None, :]              # (TL,N,E)

    # ---- selective scan; h carried across L-chunks in persistent scratch ---
    @pl.when(li == 0)
    def _():
        h_s[...] = jnp.zeros_like(h_s)

    row_ids = lax.broadcasted_iota(jnp.int32, (G, EC), 0)   # hoisted constant

    for eb in range(n_eb):                                   # E-blocked scan
        e0 = eb * EC

        def group_body(g, h):
            # One unroll group of G timesteps; y rows accumulated in registers
            # and stored with a single aligned (G, EC) write.
            t0 = pl.multiple_of(g * G, G)
            c_grp = cm_s[pl.ds(t0, G), :][:, :, None]        # (G, N, 1)
            y_blk = jnp.zeros((G, EC), f32)
            for i in range(G):
                t = t0 + i
                h = dA_s[t, :, e0:e0 + EC] * h + bx_s[t, :, e0:e0 + EC]
                # C projection folded into the scan: y_t[e] = sum_n h[n,e]*C[t,n]
                y_i = jnp.sum(h * c_grp[i], axis=0, keepdims=True)   # (1, EC)
                y_blk = jnp.where(row_ids == i, y_i, y_blk)
            # Fused epilogue: (y + D*xg) * GELU(z); output written exactly once.
            y_blk = (y_blk + sk_s[pl.ds(t0, G), e0:e0 + EC]) \
                * gz_s[pl.ds(t0, G), e0:e0 + EC]
            o_ref[pl.ds(t0, G), e0:e0 + EC] = y_blk.astype(o_ref.dtype)
            return h

        h_s[:, e0:e0 + EC] = lax.fori_loop(0, n_grp, group_body,
                                           h_s[:, e0:e0 + EC])

    # NOTE: the module applies nn.Dropout(0.2) to y but discards the result
    # (`x = self.dropout(y)` is never used), so it has no effect on the output.


# ---------------------------------------------------------------------------
# Generation-aware tiling / VMEM budgeting
# ---------------------------------------------------------------------------

def _vmem_limit_bytes():
    cap = None
    try:
        cap = getattr(pltpu.get_tpu_info(), "vmem_capacity_bytes", None)
    except Exception:
        cap = None
    if not cap:
        cap = 64 * 1024 * 1024          # conservative default (v7x per-core)
    # ~75% of physical, capped at 96 MiB (v5e/v6e: 128 -> 96, v7x: 64 -> 48).
    return int(min(cap * 3 // 4, 96 * 1024 * 1024))


def _choose_tl(L, E, N, R, K, vmem_limit, max_tl=None):
    # Per-sequence-row bytes of the chunk-resident buffers:
    #   dA + bx (2*N*E), D*xg + gelu(z) (2*E), conv staging (E if K>1),
    #   C row (N), double-buffered x/out pipeline blocks (4*E).
    per_row = 4 * (2 * N * E + 2 * E + (E if K > 1 else 0) + N + 4 * E)
    # Parameters (assume 2x buffered) + carried h + compiler slack.
    fixed = 8 * (K * E + E + E * (R + 2 * N) + (R + 2 * N) + R * E + E
                 + N * E + E)
    fixed += 4 * N * E + (2 << 20)
    avail = max(vmem_limit - fixed, 8 * per_row)
    cap = min(avail // per_row, 512)
    if max_tl is not None:
        cap = min(cap, max_tl)
    cap = max(8, cap - cap % 8)
    if L <= cap:
        return L
    for tl in range(cap, 7, -8):
        if L % tl == 0:
            return tl
    # TODO(synk): no multiple-of-8 divisor of L fits the VMEM budget; fall
    # back to a single whole-sequence chunk (no masked tail-chunk path yet).
    return L


def _choose_ec(E, max_ec=None):
    # E-block width for the scan: keeps the carried h (N, EC), the current
    # dA/bx rows and the group's y block comfortably inside the 64-vreg file.
    target = 256 if max_ec is None else max_ec
    if E <= target or E % 128 != 0:
        return E
    ec = min(target, E)
    ec -= ec % 128
    while ec >= 128:
        if E % ec == 0:
            return ec
        ec -= 128
    return E


def _rep_spec(shape):
    # Parameter block: same (only) block every grid step -> no re-DMA.
    return pl.BlockSpec(shape, lambda b, l: (0, 0))


# ---------------------------------------------------------------------------
# Wrapper
# ---------------------------------------------------------------------------

def mamba_block_forward(x, params, *, max_tl=None, max_ec=None):
    f32 = jnp.float32
    B, L, E = x.shape
    R = params["dt_proj_w"].shape[1]
    N = params["A_log"].shape[1]
    K = params["conv_w"].shape[1]

    vmem_limit = _vmem_limit_bytes()
    TL = _choose_tl(L, E, N, R, K, vmem_limit, max_tl=max_tl)
    assert L % TL == 0, "sequence length must be divisible by the chosen tile"
    if K > 1:
        assert TL >= K - 1, "sequence tile must cover the conv halo"
    EC = _choose_ec(E, max_ec=max_ec)
    G = 8 if TL % 8 == 0 else (4 if TL % 4 == 0 else (2 if TL % 2 == 0 else 1))

    # Parameter plumbing (plain-JAX glue).
    cw = params["conv_w"].T.astype(f32)                 # (K, E)
    cb = params["conv_b"][None, :].astype(f32)          # (1, E)
    wxp = params["x_proj_w"].T.astype(f32)              # (E, R+2N) fused proj
    bxp = params["x_proj_b"][None, :].astype(f32)       # (1, R+2N)
    wdt = params["dt_proj_w"].T.astype(f32)             # (R, E)
    bdt = params["dt_proj_b"][None, :].astype(f32)      # (1, E)
    a_t = (-jnp.exp(params["A_log"].astype(f32))).T     # (N, E), precomputed A
    Dv = params["D"][None, :].astype(f32)               # (1, E)

    in_specs = [
        pl.BlockSpec((None, TL, E), lambda b, l: (b, l, 0)),   # x chunk
        _rep_spec((K, E)), _rep_spec((1, E)),                  # conv w / b
        _rep_spec((E, R + 2 * N)), _rep_spec((1, R + 2 * N)),  # fused x_proj
        _rep_spec((R, E)), _rep_spec((1, E)),                  # dt_proj
        _rep_spec((N, E)), _rep_spec((1, E)),                  # A^T, D
    ]
    out_spec = pl.BlockSpec((None, TL, E), lambda b, l: (b, l, 0))

    ext_rows = TL + K - 1 if K > 1 else 8
    scratch_shapes = [
        pltpu.VMEM((N, E), f32),        # h      (carried across L-chunks)
        pltpu.VMEM((TL, N, E), f32),    # deltaA for current chunk
        pltpu.VMEM((TL, N, E), f32),    # BX     for current chunk
        pltpu.VMEM((TL, N), f32),       # C rows for current chunk (2-D, dense)
        pltpu.VMEM((TL, E), f32),       # D * xg (skip term)
        pltpu.VMEM((TL, E), f32),       # GELU(z) gate
        pltpu.VMEM((ext_rows, E), f32), # conv staging + carried halo (K>1)
    ]

    kernel = functools.partial(_mamba_block_kernel, g_size=G, ec=EC)

    return pl.pallas_call(
        kernel,
        out_shape=jax.ShapeDtypeStruct((B, L, E), f32),
        grid=(B, L // TL),
        in_specs=in_specs,
        out_specs=out_spec,
        scratch_shapes=scratch_shapes,
        compiler_params=pltpu.CompilerParams(
            # batch axis "parallel" -> megacore sharding on v7x (use B >= 2).
            dimension_semantics=("parallel", "arbitrary"),
            vmem_limit_bytes=vmem_limit),
    )(x.astype(f32), cw, cb, wxp, bxp, wdt, bdt, a_t, Dv)


# ---------------------------------------------------------------------------
# Deterministic parameter init (mirrors MambaBlock.__init__ shapes / logic)
# ---------------------------------------------------------------------------

def init_params(cfg: MambaConfig, key):
    E, R, N, K = cfg.d_inner, cfg.dt_rank, cfg.d_state, cfg.d_conv
    k1, k2, k3, k4, k5 = jax.random.split(key, 5)

    cbound = 1.0 / math.sqrt(K)                         # depthwise conv fan_in = K
    conv_w = jax.random.uniform(k1, (E, K), jnp.float32, -cbound, cbound)
    conv_b = jax.random.uniform(k2, (E,), jnp.float32, -cbound, cbound)

    xbound = 1.0 / math.sqrt(E)
    x_proj_w = jax.random.uniform(k3, (R + 2 * N, E), jnp.float32, -xbound, xbound)
    x_proj_b = jax.random.uniform(k4, (R + 2 * N,), jnp.float32, -xbound, xbound)

    dt_init_std = R ** (-0.5) * cfg.dt_scale            # dt_init == 'constant'
    dt_proj_w = jnp.full((E, R), dt_init_std, jnp.float32)
    dt = jnp.exp(jax.random.uniform(k5, (E,), jnp.float32)
                 * (math.log(cfg.dt_max) - math.log(cfg.dt_min))
                 + math.log(cfg.dt_min))
    dt = jnp.maximum(dt, cfg.dt_init_floor)
    dt_proj_b = (dt + jnp.log(-jnp.expm1(-dt))).astype(jnp.float32)

    A = jnp.tile(jnp.arange(1, N + 1, dtype=jnp.float32)[None, :], (E, 1))
    A_log = jnp.log(A)
    D = jnp.ones((E,), jnp.float32)

    return dict(conv_w=conv_w, conv_b=conv_b, x_proj_w=x_proj_w,
                x_proj_b=x_proj_b, dt_proj_w=dt_proj_w, dt_proj_b=dt_proj_b,
                A_log=A_log, D=D)


# ---------------------------------------------------------------------------
# Pure-JAX reference (mirrors the PyTorch forward exactly)
# ---------------------------------------------------------------------------

def ref_forward(x, params, R, N):
    P = lax.Precision.HIGHEST
    cw, cb = params["conv_w"], params["conv_b"]
    K = cw.shape[1]
    B, L, E = x.shape
    xpad = jnp.pad(x, ((0, 0), (K - 1, 0), (0, 0)))
    xc = cb[None, None, :] + sum(cw[:, k][None, None, :] * xpad[:, k:k + L, :]
                                 for k in range(K))
    gelu = lambda v: 0.5 * v * (1.0 + jax.scipy.special.erf(v / jnp.sqrt(2.0)))
    xg, zg = gelu(xc), gelu(x)

    dbc = jnp.einsum("ble,oe->blo", xg, params["x_proj_w"],
                     precision=P) + params["x_proj_b"]
    dlt, Bm, Cm = dbc[..., :R], dbc[..., R:R + N], dbc[..., R + N:]
    dt = jnp.einsum("blr,er->ble", dlt, params["dt_proj_w"],
                    precision=P) + params["dt_proj_b"]
    delta = jax.nn.softplus(dt)

    A = -jnp.exp(params["A_log"])
    dA = jnp.exp(delta[..., None] * A)                       # (B, L, E, N)
    bx = (delta * xg)[..., None] * Bm[:, :, None, :]         # (B, L, E, N)

    def step(h, inp):
        da_t, bx_t = inp
        h = da_t * h + bx_t
        return h, h

    h0 = jnp.zeros((B, E, N), jnp.float32)
    _, hs = jax.lax.scan(step, h0, (dA.transpose(1, 0, 2, 3),
                                    bx.transpose(1, 0, 2, 3)))
    hs = hs.transpose(1, 0, 2, 3)                            # (B, L, E, N)
    y = jnp.einsum("blen,bln->ble", hs, Cm, precision=P)
    y = y + params["D"] * xg
    return y * zg


if __name__ == "__main__":
    key = jax.random.PRNGKey(0)
    k0, k1, k2, k3 = jax.random.split(key, 4)

    def check(name, cfg, B, L, kp, kx, **kw):
        params = init_params(cfg, kp)
        x = jax.random.normal(kx, (B, L, cfg.d_inner), jnp.float32)
        out = jax.block_until_ready(mamba_block_forward(x, params, **kw))
        ref = ref_forward(x, params, cfg.dt_rank, cfg.d_state)
        assert out.shape == ref.shape == (B, L, cfg.d_inner)
        if not jnp.allclose(out, ref, atol=2e-4, rtol=2e-4):
            err = float(jnp.max(jnp.abs(out - ref)))
            raise AssertionError(f"{name}: mismatch vs reference, "
                                 f"max abs err = {err}")

    # (a) base config: single L-chunk, single E-block, full TL for the MXU.
    cfg_a = MambaConfig(d_model=32, lookback_w=64, num_series=4, forecast_h=4,
                        n_layers=1)
    check("base", cfg_a, 2, 64, k0, k1)

    # (b) forced sequence chunking -> exercises the carried scan state h.
    check("chunked", cfg_a, 2, 64, k0, k1, max_tl=16)

    # (c) d_conv=3 (carried conv halo) + the scan split into two 128-lane
    #     E-blocks -> exercises the E-blocked scan path.
    cfg_c = MambaConfig(d_model=256, lookback_w=64, num_series=4, forecast_h=4,
                        n_layers=1, d_conv=3)
    check("halo_eblock", cfg_c, 2, 64, k2, k3, max_tl=32, max_ec=128)

    print("KERNEL_OK")
</pallas_src>

<mosaic_0001>
module attributes {stable_mosaic.version = 11 : i64} {
  func.func @_mamba_block_kernel(%arg0: i32, %arg1: i32, %arg2: memref<1x64x32xf32, #tpu.memory_space<vmem>>, %arg3: memref<1x32xf32, #tpu.memory_space<vmem>>, %arg4: memref<1x32xf32, #tpu.memory_space<vmem>>, %arg5: memref<32x34xf32, #tpu.memory_space<vmem>>, %arg6: memref<1x34xf32, #tpu.memory_space<vmem>>, %arg7: memref<2x32xf32, #tpu.memory_space<vmem>>, %arg8: memref<1x32xf32, #tpu.memory_space<vmem>>, %arg9: memref<16x32xf32, #tpu.memory_space<vmem>>, %arg10: memref<1x32xf32, #tpu.memory_space<vmem>>, %arg11: memref<1x64x32xf32, #tpu.memory_space<vmem>>, %arg12: memref<16x32xf32, #tpu.memory_space<vmem>>, %arg13: memref<64x16x32xf32, #tpu.memory_space<vmem>>, %arg14: memref<64x16x32xf32, #tpu.memory_space<vmem>>, %arg15: memref<64x16xf32, #tpu.memory_space<vmem>>, %arg16: memref<64x32xf32, #tpu.memory_space<vmem>>, %arg17: memref<64x32xf32, #tpu.memory_space<vmem>>, %arg18: memref<8x32xf32, #tpu.memory_space<vmem>>) attributes {dimension_semantics = [#tpu.dimension_semantics<parallel>, #tpu.dimension_semantics<arbitrary>], iteration_bounds = array<i64: 2, 1>, scalar_prefetch = 0 : i64, scratch_operands = 7 : i64, tpu.core_type = #tpu.core_type<tc>, window_params = [{transform_indices = @transform_0, window_bounds = array<i64: 1, 64, 32>}, {pipeline_mode = #tpu.pipeline_mode<synchronous>, transform_indices = @transform_1, window_bounds = array<i64: 1, 32>}, {pipeline_mode = #tpu.pipeline_mode<synchronous>, transform_indices = @transform_2, window_bounds = array<i64: 1, 32>}, {pipeline_mode = #tpu.pipeline_mode<synchronous>, transform_indices = @transform_3, window_bounds = array<i64: 32, 34>}, {pipeline_mode = #tpu.pipeline_mode<synchronous>, transform_indices = @transform_4, window_bounds = array<i64: 1, 34>}, {pipeline_mode = #tpu.pipeline_mode<synchronous>, transform_indices = @transform_5, window_bounds = array<i64: 2, 32>}, {pipeline_mode = #tpu.pipeline_mode<synchronous>, transform_indices = @transform_6, window_bounds = array<i64: 1, 32>}, {pipeline_mode = #tpu.pipeline_mode<synchronous>, transform_indices = @transform_7, window_bounds = array<i64: 16, 32>}, {pipeline_mode = #tpu.pipeline_mode<synchronous>, transform_indices = @transform_8, window_bounds = array<i64: 1, 32>}, {transform_indices = @transform_9, window_bounds = array<i64: 1, 64, 32>}]} {
    %c0 = arith.constant 0 : index
    %c0_0 = arith.constant 0 : index
    %c0_1 = arith.constant 0 : index
    %0 = vector.load %arg2[%c0, %c0_0, %c0_1] : memref<1x64x32xf32, #tpu.memory_space<vmem>>, vector<1x64x32xf32>
    %1 = vector.shape_cast %0 : vector<1x64x32xf32> to vector<64x32xf32>
    %c0_2 = arith.constant 0 : index
    %c0_3 = arith.constant 0 : index
    %2 = vector.load %arg3[%c0_2, %c0_3] : memref<1x32xf32, #tpu.memory_space<vmem>>, vector<1x32xf32>
    %3 = vector.broadcast %2 : vector<1x32xf32> to vector<64x32xf32>
    %4 = arith.mulf %3, %1 : vector<64x32xf32>
    %c0_4 = arith.constant 0 : index
    %c0_5 = arith.constant 0 : index
    %5 = vector.load %arg4[%c0_4, %c0_5] : memref<1x32xf32, #tpu.memory_space<vmem>>, vector<1x32xf32>
    %6 = vector.broadcast %5 : vector<1x32xf32> to vector<64x32xf32>
    %7 = arith.addf %4, %6 : vector<64x32xf32>
    %cst = arith.constant 5.000000e-01 : f32
    %8 = vector.broadcast %cst : f32 to vector<64x32xf32>
    %9 = arith.mulf %8, %7 : vector<64x32xf32>
    %cst_6 = arith.constant 0.707106769 : f32
    %10 = vector.broadcast %cst_6 : f32 to vector<64x32xf32>
    %11 = arith.mulf %7, %10 : vector<64x32xf32>
    %cst_7 = arith.constant 0.000000e+00 : f32
    %12 = vector.broadcast %cst_7 : f32 to vector<64x32xf32>
    %13 = arith.cmpf oge, %11, %12 : vector<64x32xf32>
    %cst_8 = arith.constant 1.000000e+00 : f32
    %cst_9 = arith.constant -1.000000e+00 : f32
    %14 = vector.broadcast %cst_8 : f32 to vector<64x32xf32>
    %15 = vector.broadcast %cst_9 : f32 to vector<64x32xf32>
    %16 = arith.select %13, %14, %15 : vector<64x32xi1>, vector<64x32xf32>
    %17 = math.absf %11 : vector<64x32xf32>
    %cst_10 = arith.constant 0.327591091 : f32
    %18 = vector.broadcast %cst_10 : f32 to vector<64x32xf32>
    %19 = arith.mulf %18, %17 : vector<64x32xf32>
    %cst_11 = arith.constant 1.000000e+00 : f32
    %20 = vector.broadcast %cst_11 : f32 to vector<64x32xf32>
    %21 = arith.addf %20, %19 : vector<64x32xf32>
    %cst_12 = arith.constant 1.000000e+00 : f32
    %22 = vector.broadcast %cst_12 : f32 to vector<64x32xf32>
    %23 = arith.divf %22, %21 : vector<64x32xf32>
    %cst_13 = arith.constant 1.06140542 : f32
    %24 = vector.broadcast %cst_13 : f32 to vector<64x32xf32>
    %25 = arith.mulf %24, %23 : vector<64x32xf32>
    %cst_14 = arith.constant -1.45315206 : f32
    %26 = vector.broadcast %cst_14 : f32 to vector<64x32xf32>
    %27 = arith.addf %25, %26 : vector<64x32xf32>
    %28 = arith.mulf %27, %23 : vector<64x32xf32>
    %cst_15 = arith.constant 1.42141378 : f32
    %29 = vector.broadcast %cst_15 : f32 to vector<64x32xf32>
    %30 = arith.addf %28, %29 : vector<64x32xf32>
    %31 = arith.mulf %30, %23 : vector<64x32xf32>
    %cst_16 = arith.constant -0.284496725 : f32
    %32 = vector.broadcast %cst_16 : f32 to vector<64x32xf32>
    %33 = arith.addf %31, %32 : vector<64x32xf32>
    %34 = arith.mulf %33, %23 : vector<64x32xf32>
    %cst_17 = arith.constant 0.254829586 : f32
    %35 = vector.broadcast %cst_17 : f32 to vector<64x32xf32>
    %36 = arith.addf %34, %35 : vector<64x32xf32>
    %37 = arith.mulf %36, %23 : vector<64x32xf32>
    %cst_18 = arith.constant 0.000000e+00 : f32
    %38 = vector.broadcast %cst_18 : f32 to vector<64x32xf32>
    %39 = arith.subf %38, %17 : vector<64x32xf32>
    %40 = arith.mulf %39, %17 : vector<64x32xf32>
    %41 = math.exp %40 : vector<64x32xf32>
    %42 = arith.mulf %37, %41 : vector<64x32xf32>
    %cst_19 = arith.constant 1.000000e+00 : f32
    %43 = vector.broadcast %cst_19 : f32 to vector<64x32xf32>
    %44 = arith.subf %43, %42 : vector<64x32xf32>
    %45 = arith.mulf %16, %44 : vector<64x32xf32>
    %cst_20 = arith.constant 1.000000e+00 : f32
    %46 = vector.broadcast %cst_20 : f32 to vector<64x32xf32>
    %47 = arith.addf %46, %45 : vector<64x32xf32>
    %48 = arith.mulf %9, %47 : vector<64x32xf32>
    %cst_21 = arith.constant 5.000000e-01 : f32
    %49 = vector.broadcast %cst_21 : f32 to vector<64x32xf32>
    %50 = arith.mulf %49, %1 : vector<64x32xf32>
    %cst_22 = arith.constant 0.707106769 : f32
    %51 = vector.broadcast %cst_22 : f32 to vector<64x32xf32>
    %52 = arith.mulf %1, %51 : vector<64x32xf32>
    %cst_23 = arith.constant 0.000000e+00 : f32
    %53 = vector.broadcast %cst_23 : f32 to vector<64x32xf32>
    %54 = arith.cmpf oge, %52, %53 : vector<64x32xf32>
    %cst_24 = arith.constant 1.000000e+00 : f32
    %cst_25 = arith.constant -1.000000e+00 : f32
    %55 = vector.broadcast %cst_24 : f32 to vector<64x32xf32>
    %56 = vector.broadcast %cst_25 : f32 to vector<64x32xf32>
    %57 = arith.select %54, %55, %56 : vector<64x32xi1>, vector<64x32xf32>
    %58 = math.absf %52 : vector<64x32xf32>
    %cst_26 = arith.constant 0.327591091 : f32
    %59 = vector.broadcast %cst_26 : f32 to vector<64x32xf32>
    %60 = arith.mulf %59, %58 : vector<64x32xf32>
    %cst_27 = arith.constant 1.000000e+00 : f32
    %61 = vector.broadcast %cst_27 : f32 to vector<64x32xf32>
    %62 = arith.addf %61, %60 : vector<64x32xf32>
    %cst_28 = arith.constant 1.000000e+00 : f32
    %63 = vector.broadcast %cst_28 : f32 to vector<64x32xf32>
    %64 = arith.divf %63, %62 : vector<64x32xf32>
    %cst_29 = arith.constant 1.06140542 : f32
    %65 = vector.broadcast %cst_29 : f32 to vector<64x32xf32>
    %66 = arith.mulf %65, %64 : vector<64x32xf32>
    %cst_30 = arith.constant -1.45315206 : f32
    %67 = vector.broadcast %cst_30 : f32 to vector<64x32xf32>
    %68 = arith.addf %66, %67 : vector<64x32xf32>
    %69 = arith.mulf %68, %64 : vector<64x32xf32>
    %cst_31 = arith.constant 1.42141378 : f32
    %70 = vector.broadcast %cst_31 : f32 to vector<64x32xf32>
    %71 = arith.addf %69, %70 : vector<64x32xf32>
    %72 = arith.mulf %71, %64 : vector<64x32xf32>
    %cst_32 = arith.constant -0.284496725 : f32
    %73 = vector.broadcast %cst_32 : f32 to vector<64x32xf32>
    %74 = arith.addf %72, %73 : vector<64x32xf32>
    %75 = arith.mulf %74, %64 : vector<64x32xf32>
    %cst_33 = arith.constant 0.254829586 : f32
    %76 = vector.broadcast %cst_33 : f32 to vector<64x32xf32>
    %77 = arith.addf %75, %76 : vector<64x32xf32>
    %78 = arith.mulf %77, %64 : vector<64x32xf32>
    %cst_34 = arith.constant 0.000000e+00 : f32
    %79 = vector.broadcast %cst_34 : f32 to vector<64x32xf32>
    %80 = arith.subf %79, %58 : vector<64x32xf32>
    %81 = arith.mulf %80, %58 : vector<64x32xf32>
    %82 = math.exp %81 : vector<64x32xf32>
    %83 = arith.mulf %78, %82 : vector<64x32xf32>
    %cst_35 = arith.constant 1.000000e+00 : f32
    %84 = vector.broadcast %cst_35 : f32 to vector<64x32xf32>
    %85 = arith.subf %84, %83 : vector<64x32xf32>
    %86 = arith.mulf %57, %85 : vector<64x32xf32>
    %cst_36 = arith.constant 1.000000e+00 : f32
    %87 = vector.broadcast %cst_36 : f32 to vector<64x32xf32>
    %88 = arith.addf %87, %86 : vector<64x32xf32>
    %89 = arith.mulf %50, %88 : vector<64x32xf32>
    %c0_37 = arith.constant 0 : index
    %c0_38 = arith.constant 0 : index
    %90 = vector.load %arg17[%c0_37, %c0_38] : memref<64x32xf32, #tpu.memory_space<vmem>>, vector<64x32xf32>
    tpu.vector_store %arg17[%c0_37, %c0_38], %89 {strides = array<i32>} : memref<64x32xf32, #tpu.memory_space<vmem>>, vector<64x32xf32>,
    %c0_39 = arith.constant 0 : index
    %c0_40 = arith.constant 0 : index
    %91 = vector.load %arg10[%c0_39, %c0_40] : memref<1x32xf32, #tpu.memory_space<vmem>>, vector<1x32xf32>
    %92 = vector.broadcast %91 : vector<1x32xf32> to vector<64x32xf32>
    %93 = arith.mulf %92, %48 : vector<64x32xf32>
    %c0_41 = arith.constant 0 : index
    %c0_42 = arith.constant 0 : index
    %94 = vector.load %arg16[%c0_41, %c0_42] : memref<64x32xf32, #tpu.memory_space<vmem>>, vector<64x32xf32>
    tpu.vector_store %arg16[%c0_41, %c0_42], %93 {strides = array<i32>} : memref<64x32xf32, #tpu.memory_space<vmem>>, vector<64x32xf32>,
    %c0_43 = arith.constant 0 : index
    %c0_44 = arith.constant 0 : index
    %95 = vector.load %arg5[%c0_43, %c0_44] : memref<32x34xf32, #tpu.memory_space<vmem>>, vector<32x34xf32>
    %cst_45 = arith.constant dense<0.000000e+00> : vector<64x34xf32>
    %96 = tpu.matmul %48, %95, %cst_45 {dimension_numbers = #tpu.dot_dimension_numbers<[1], [0], [0], [1], [0, 0, 1, 1], [], []>, precision = #tpu.contract_precision<fp32>} : vector<64x32xf32>, vector<32x34xf32>, vector<64x34xf32> -> vector<64x34xf32>
    %c0_46 = arith.constant 0 : index
    %c0_47 = arith.constant 0 : index
    %97 = vector.load %arg6[%c0_46, %c0_47] : memref<1x34xf32, #tpu.memory_space<vmem>>, vector<1x34xf32>
    %98 = vector.broadcast %97 : vector<1x34xf32> to vector<64x34xf32>
    %99 = arith.addf %96, %98 : vector<64x34xf32>
    %100 = vector.extract_strided_slice %99 {offsets = [0, 0], sizes = [64, 2], strides = [1, 1]} : vector<64x34xf32> to vector<64x2xf32>
    %101 = vector.extract_strided_slice %99 {offsets = [0, 2], sizes = [64, 16], strides = [1, 1]} : vector<64x34xf32> to vector<64x16xf32>
    %102 = vector.extract_strided_slice %99 {offsets = [0, 18], sizes = [64, 16], strides = [1, 1]} : vector<64x34xf32> to vector<64x16xf32>
    %c0_48 = arith.constant 0 : index
    %c0_49 = arith.constant 0 : index
    %103 = vector.load %arg15[%c0_48, %c0_49] : memref<64x16xf32, #tpu.memory_space<vmem>>, vector<64x16xf32>
    tpu.vector_store %arg15[%c0_48, %c0_49], %102 {strides = array<i32>} : memref<64x16xf32, #tpu.memory_space<vmem>>, vector<64x16xf32>,
    %c0_50 = arith.constant 0 : index
    %c0_51 = arith.constant 0 : index
    %104 = vector.load %arg7[%c0_50, %c0_51] : memref<2x32xf32, #tpu.memory_space<vmem>>, vector<2x32xf32>
    %cst_52 = arith.constant dense<0.000000e+00> : vector<64x32xf32>
    %105 = tpu.matmul %100, %104, %cst_52 {dimension_numbers = #tpu.dot_dimension_numbers<[1], [0], [0], [1], [0, 0, 1, 1], [], []>, precision = #tpu.contract_precision<fp32>} : vector<64x2xf32>, vector<2x32xf32>, vector<64x32xf32> -> vector<64x32xf32>
    %c0_53 = arith.constant 0 : index
    %c0_54 = arith.constant 0 : index
    %106 = vector.load %arg8[%c0_53, %c0_54] : memref<1x32xf32, #tpu.memory_space<vmem>>, vector<1x32xf32>
    %107 = vector.broadcast %106 : vector<1x32xf32> to vector<64x32xf32>
    %108 = arith.addf %105, %107 : vector<64x32xf32>
    %cst_55 = arith.constant 0.000000e+00 : f32
    %109 = vector.broadcast %cst_55 : f32 to vector<64x32xf32>
    %110 = arith.maximumf %108, %109 : vector<64x32xf32>
    %111 = math.absf %108 : vector<64x32xf32>
    %cst_56 = arith.constant 0.000000e+00 : f32
    %112 = vector.broadcast %cst_56 : f32 to vector<64x32xf32>
    %113 = arith.subf %112, %111 : vector<64x32xf32>
    %114 = math.exp %113 : vector<64x32xf32>
    %cst_57 = arith.constant 1.000000e+00 : f32
    %115 = vector.broadcast %cst_57 : f32 to vector<64x32xf32>
    %116 = arith.addf %115, %114 : vector<64x32xf32>
    %117 = math.log %116 : vector<64x32xf32>
    %118 = arith.addf %110, %117 : vector<64x32xf32>
    %119 = vector.shape_cast %118 : vector<64x32xf32> to vector<64x1x32xf32>
    %c0_58 = arith.constant 0 : index
    %c0_59 = arith.constant 0 : index
    %120 = vector.load %arg9[%c0_58, %c0_59] : memref<16x32xf32, #tpu.memory_space<vmem>>, vector<16x32xf32>
    %121 = vector.shape_cast %120 : vector<16x32xf32> to vector<1x16x32xf32>
    %122 = vector.broadcast %119 : vector<64x1x32xf32> to vector<64x16x32xf32>
    %123 = vector.broadcast %121 : vector<1x16x32xf32> to vector<64x16x32xf32>
    %124 = arith.mulf %122, %123 : vector<64x16x32xf32>
    %125 = math.exp %124 : vector<64x16x32xf32>
    %c0_60 = arith.constant 0 : index
    %c0_61 = arith.constant 0 : index
    %c0_62 = arith.constant 0 : index
    %126 = vector.load %arg13[%c0_60, %c0_61, %c0_62] : memref<64x16x32xf32, #tpu.memory_space<vmem>>, vector<64x16x32xf32>
    tpu.vector_store %arg13[%c0_60, %c0_61, %c0_62], %125 {strides = array<i32>} : memref<64x16x32xf32, #tpu.memory_space<vmem>>, vector<64x16x32xf32>,
    %127 = vector.shape_cast %101 : vector<64x16xf32> to vector<64x16x1xf32>
    %128 = arith.mulf %118, %48 : vector<64x32xf32>
    %129 = vector.shape_cast %128 : vector<64x32xf32> to vector<64x1x32xf32>
    %130 = vector.broadcast %127 : vector<64x16x1xf32> to vector<64x16x32xf32>
    %131 = vector.broadcast %129 : vector<64x1x32xf32> to vector<64x16x32xf32>
    %132 = arith.mulf %130, %131 : vector<64x16x32xf32>
    %c0_63 = arith.constant 0 : index
    %c0_64 = arith.constant 0 : index
    %c0_65 = arith.constant 0 : index
    %133 = vector.load %arg14[%c0_63, %c0_64, %c0_65] : memref<64x16x32xf32, #tpu.memory_space<vmem>>, vector<64x16x32xf32>
    tpu.vector_store %arg14[%c0_63, %c0_64, %c0_65], %132 {strides = array<i32>} : memref<64x16x32xf32, #tpu.memory_space<vmem>>, vector<64x16x32xf32>,
    %c0_i32 = arith.constant 0 : i32
    %134 = arith.cmpi eq, %arg1, %c0_i32 : i32
    %135 = arith.extui %134 : i1 to i32
    %c0_i32_66 = arith.constant 0 : i32
    %136 = arith.cmpi ne, %135, %c0_i32_66 : i32
    scf.if %136 {
      %cst_73 = arith.constant 0.000000e+00 : f32
      %142 = vector.broadcast %cst_73 : f32 to vector<16x32xf32>
      %c0_74 = arith.constant 0 : index
      %c0_75 = arith.constant 0 : index
      %143 = vector.load %arg12[%c0_74, %c0_75] : memref<16x32xf32, #tpu.memory_space<vmem>>, vector<16x32xf32>
      tpu.vector_store %arg12[%c0_74, %c0_75], %142 {strides = array<i32>} : memref<16x32xf32, #tpu.memory_space<vmem>>, vector<16x32xf32>,
    } else {
    }
    %137 = tpu.iota {dimensions = array<i32: 0>} : vector<8x32xi32>
    %c0_67 = arith.constant 0 : index
    %c0_68 = arith.constant 0 : index
    %138 = vector.load %arg12[%c0_67, %c0_68] : memref<16x32xf32, #tpu.memory_space<vmem>>, vector<16x32xf32>
    %c0_i32_69 = arith.constant 0 : i32
    %c8_i32 = arith.constant 8 : i32
    %139 = arith.addi %c0_i32_69, %c8_i32 : i32
    %c1_i32 = arith.constant 1 : i32
    %140 = scf.for %arg19 = %c0_i32_69 to %139 step %c1_i32 iter_args(%arg20 = %138) -> (vector<16x32xf32>)  : i32 {
      %c8_i32_73 = arith.constant 8 : i32
      %142 = arith.muli %arg19, %c8_i32_73 : i32
      %143 = tpu.assume_multiple %142, 8 : i32
      %144 = arith.index_cast %143 : i32 to index
      %c0_74 = arith.constant 0 : index
      %145 = vector.load %arg15[%144, %c0_74] : memref<64x16xf32, #tpu.memory_space<vmem>>, vector<8x16xf32>
      %146 = vector.shape_cast %145 : vector<8x16xf32> to vector<8x16x1xf32>
      %cst_75 = arith.constant 0.000000e+00 : f32
      %147 = vector.broadcast %cst_75 : f32 to vector<8x32xf32>
      %c0_i32_76 = arith.constant 0 : i32
      %148 = arith.addi %143, %c0_i32_76 : i32
      %149 = arith.index_cast %148 : i32 to index
      %c0_77 = arith.constant 0 : index
      %c0_78 = arith.constant 0 : index
      %150 = vector.load %arg13[%149, %c0_77, %c0_78] : memref<64x16x32xf32, #tpu.memory_space<vmem>>, vector<1x16x32xf32>
      %151 = vector.shape_cast %150 : vector<1x16x32xf32> to vector<16x32xf32>
      %152 = arith.mulf %151, %arg20 : vector<16x32xf32>
      %153 = arith.index_cast %148 : i32 to index
      %c0_79 = arith.constant 0 : index
      %c0_80 = arith.constant 0 : index
      %154 = vector.load %arg14[%153, %c0_79, %c0_80] : memref<64x16x32xf32, #tpu.memory_space<vmem>>, vector<1x16x32xf32>
      %155 = vector.shape_cast %154 : vector<1x16x32xf32> to vector<16x32xf32>
      %156 = arith.addf %152, %155 : vector<16x32xf32>
      %157 = vector.extract_strided_slice %146 {offsets = [0, 0, 0], sizes = [1, 16, 1], strides = [1, 1, 1]} : vector<8x16x1xf32> to vector<1x16x1xf32>
      %158 = vector.shape_cast %157 : vector<1x16x1xf32> to vector<16x1xf32>
      %159 = vector.broadcast %158 : vector<16x1xf32> to vector<16x32xf32>
      %160 = arith.mulf %156, %159 : vector<16x32xf32>
      %cst_81 = arith.constant dense<0.000000e+00> : vector<32xf32>
      %161 = vector.multi_reduction <add>, %160, %cst_81 [0] : vector<16x32xf32> to vector<32xf32>
      %162 = vector.shape_cast %161 : vector<32xf32> to vector<1x32xf32>
      %c0_i32_82 = arith.constant 0 : i32
      %163 = vector.broadcast %c0_i32_82 : i32 to vector<8x32xi32>
      %164 = arith.cmpi eq, %137, %163 : vector<8x32xi32>
      %165 = vector.shape_cast %162 : vector<1x32xf32> to vector<1x32xf32>
      %166 = vector.broadcast %165 : vector<1x32xf32> to vector<8x32xf32>
      %167 = arith.select %164, %166, %147 : vector<8x32xi1>, vector<8x32xf32>
      %c1_i32_83 = arith.constant 1 : i32
      %168 = arith.addi %143, %c1_i32_83 : i32
      %169 = arith.index_cast %168 : i32 to index
      %c0_84 = arith.constant 0 : index
      %c0_85 = arith.constant 0 : index
      %170 = vector.load %arg13[%169, %c0_84, %c0_85] : memref<64x16x32xf32, #tpu.memory_space<vmem>>, vector<1x16x32xf32>
      %171 = vector.shape_cast %170 : vector<1x16x32xf32> to vector<16x32xf32>
      %172 = arith.mulf %171, %156 : vector<16x32xf32>
      %173 = arith.index_cast %168 : i32 to index
      %c0_86 = arith.constant 0 : index
      %c0_87 = arith.constant 0 : index
      %174 = vector.load %arg14[%173, %c0_86, %c0_87] : memref<64x16x32xf32, #tpu.memory_space<vmem>>, vector<1x16x32xf32>
      %175 = vector.shape_cast %174 : vector<1x16x32xf32> to vector<16x32xf32>
      %176 = arith.addf %172, %175 : vector<16x32xf32>
      %177 = vector.extract_strided_slice %146 {offsets = [1, 0, 0], sizes = [1, 16, 1], strides = [1, 1, 1]} : vector<8x16x1xf32> to vector<1x16x1xf32>
      %178 = vector.shape_cast %177 : vector<1x16x1xf32> to vector<16x1xf32>
      %179 = vector.broadcast %178 : vector<16x1xf32> to vector<16x32xf32>
      %180 = arith.mulf %176, %179 : vector<16x32xf32>
      %cst_88 = arith.constant dense<0.000000e+00> : vector<32xf32>
      %181 = vector.multi_reduction <add>, %180, %cst_88 [0] : vector<16x32xf32> to vector<32xf32>
      %182 = vector.shape_cast %181 : vector<32xf32> to vector<1x32xf32>
      %c1_i32_89 = arith.constant 1 : i32
      %183 = vector.broadcast %c1_i32_89 : i32 to vector<8x32xi32>
      %184 = arith.cmpi eq, %137, %183 : vector<8x32xi32>
      %185 = vector.shape_cast %182 : vector<1x32xf32> to vector<1x32xf32>
      %186 = vector.broadcast %185 : vector<1x32xf32> to vector<8x32xf32>
      %187 = arith.select %184, %186, %167 : vector<8x32xi1>, vector<8x32xf32>
      %c2_i32 = arith.constant 2 : i32
      %188 = arith.addi %143, %c2_i32 : i32
      %189 = arith.index_cast %188 : i32 to index
      %c0_90 = arith.constant 0 : index
      %c0_91 = arith.constant 0 : index
      %190 = vector.load %arg13[%189, %c0_90, %c0_91] : memref<64x16x32xf32, #tpu.memory_space<vmem>>, vector<1x16x32xf32>
      %191 = vector.shape_cast %190 : vector<1x16x32xf32> to vector<16x32xf32>
      %192 = arith.mulf %191, %176 : vector<16x32xf32>
      %193 = arith.index_cast %188 : i32 to index
      %c0_92 = arith.constant 0 : index
      %c0_93 = arith.constant 0 : index
      %194 = vector.load %arg14[%193, %c0_92, %c0_93] : memref<64x16x32xf32, #tpu.memory_space<vmem>>, vector<1x16x32xf32>
      %195 = vector.shape_cast %194 : vector<1x16x32xf32> to vector<16x32xf32>
      %196 = arith.addf %192, %195 : vector<16x32xf32>
      %197 = vector.extract_strided_slice %146 {offsets = [2, 0, 0], sizes = [1, 16, 1], strides = [1, 1, 1]} : vector<8x16x1xf32> to vector<1x16x1xf32>
      %198 = vector.shape_cast %197 : vector<1x16x1xf32> to vector<16x1xf32>
      %199 = vector.broadcast %198 : vector<16x1xf32> to vector<16x32xf32>
      %200 = arith.mulf %196, %199 : vector<16x32xf32>
      %cst_94 = arith.constant dense<0.000000e+00> : vector<32xf32>
      %201 = vector.multi_reduction <add>, %200, %cst_94 [0] : vector<16x32xf32> to vector<32xf32>
      %202 = vector.shape_cast %201 : vector<32xf32> to vector<1x32xf32>
      %c2_i32_95 = arith.constant 2 : i32
      %203 = vector.broadcast %c2_i32_95 : i32 to vector<8x32xi32>
      %204 = arith.cmpi eq, %137, %203 : vector<8x32xi32>
      %205 = vector.shape_cast %202 : vector<1x32xf32> to vector<1x32xf32>
      %206 = vector.broadcast %205 : vector<1x32xf32> to vector<8x32xf32>
      %207 = arith.select %204, %206, %187 : vector<8x32xi1>, vector<8x32xf32>
      %c3_i32 = arith.constant 3 : i32
      %208 = arith.addi %143, %c3_i32 : i32
      %209 = arith.index_cast %208 : i32 to index
      %c0_96 = arith.constant 0 : index
      %c0_97 = arith.constant 0 : index
      %210 = vector.load %arg13[%209, %c0_96, %c0_97] : memref<64x16x32xf32, #tpu.memory_space<vmem>>, vector<1x16x32xf32>
      %211 = vector.shape_cast %210 : vector<1x16x32xf32> to vector<16x32xf32>
      %212 = arith.mulf %211, %196 : vector<16x32xf32>
      %213 = arith.index_cast %208 : i32 to index
      %c0_98 = arith.constant 0 : index
      %c0_99 = arith.constant 0 : index
      %214 = vector.load %arg14[%213, %c0_98, %c0_99] : memref<64x16x32xf32, #tpu.memory_space<vmem>>, vector<1x16x32xf32>
      %215 = vector.shape_cast %214 : vector<1x16x32xf32> to vector<16x32xf32>
      %216 = arith.addf %212, %215 : vector<16x32xf32>
      %217 = vector.extract_strided_slice %146 {offsets = [3, 0, 0], sizes = [1, 16, 1], strides = [1, 1, 1]} : vector<8x16x1xf32> to vector<1x16x1xf32>
      %218 = vector.shape_cast %217 : vector<1x16x1xf32> to vector<16x1xf32>
      %219 = vector.broadcast %218 : vector<16x1xf32> to vector<16x32xf32>
      %220 = arith.mulf %216, %219 : vector<16x32xf32>
      %cst_100 = arith.constant dense<0.000000e+00> : vector<32xf32>
      %221 = vector.multi_reduction <add>, %220, %cst_100 [0] : vector<16x32xf32> to vector<32xf32>
      %222 = vector.shape_cast %221 : vector<32xf32> to vector<1x32xf32>
      %c3_i32_101 = arith.constant 3 : i32
      %223 = vector.broadcast %c3_i32_101 : i32 to vector<8x32xi32>
      %224 = arith.cmpi eq, %137, %223 : vector<8x32xi32>
      %225 = vector.shape_cast %222 : vector<1x32xf32> to vector<1x32xf32>
      %226 = vector.broadcast %225 : vector<1x32xf32> to vector<8x32xf32>
      %227 = arith.select %224, %226, %207 : vector<8x32xi1>, vector<8x32xf32>
      %c4_i32 = arith.constant 4 : i32
      %228 = arith.addi %143, %c4_i32 : i32
      %229 = arith.index_cast %228 : i32 to index
      %c0_102 = arith.constant 0 : index
      %c0_103 = arith.constant 0 : index
      %230 = vector.load %arg13[%229, %c0_102, %c0_103] : memref<64x16x32xf32, #tpu.memory_space<vmem>>, vector<1x16x32xf32>
      %231 = vector.shape_cast %230 : vector<1x16x32xf32> to vector<16x32xf32>
      %232 = arith.mulf %231, %216 : vector<16x32xf32>
      %233 = arith.index_cast %228 : i32 to index
      %c0_104 = arith.constant 0 : index
      %c0_105 = arith.constant 0 : index
      %234 = vector.load %arg14[%233, %c0_104, %c0_105] : memref<64x16x32xf32, #tpu.memory_space<vmem>>, vector<1x16x32xf32>
      %235 = vector.shape_cast %234 : vector<1x16x32xf32> to vector<16x32xf32>
      %236 = arith.addf %232, %235 : vector<16x32xf32>
      %237 = vector.extract_strided_slice %146 {offsets = [4, 0, 0], sizes = [1, 16, 1], strides = [1, 1, 1]} : vector<8x16x1xf32> to vector<1x16x1xf32>
      %238 = vector.shape_cast %237 : vector<1x16x1xf32> to vector<16x1xf32>
      %239 = vector.broadcast %238 : vector<16x1xf32> to vector<16x32xf32>
      %240 = arith.mulf %236, %239 : vector<16x32xf32>
      %cst_106 = arith.constant dense<0.000000e+00> : vector<32xf32>
      %241 = vector.multi_reduction <add>, %240, %cst_106 [0] : vector<16x32xf32> to vector<32xf32>
      %242 = vector.shape_cast %241 : vector<32xf32> to vector<1x32xf32>
      %c4_i32_107 = arith.constant 4 : i32
      %243 = vector.broadcast %c4_i32_107 : i32 to vector<8x32xi32>
      %244 = arith.cmpi eq, %137, %243 : vector<8x32xi32>
      %245 = vector.shape_cast %242 : vector<1x32xf32> to vector<1x32xf32>
      %246 = vector.broadcast %245 : vector<1x32xf32> to vector<8x32xf32>
      %247 = arith.select %244, %246, %227 : vector<8x32xi1>, vector<8x32xf32>
      %c5_i32 = arith.constant 5 : i32
      %248 = arith.addi %143, %c5_i32 : i32
      %249 = arith.index_cast %248 : i32 to index
      %c0_108 = arith.constant 0 : index
      %c0_109 = arith.constant 0 : index
      %250 = vector.load %arg13[%249, %c0_108, %c0_109] : memref<64x16x32xf32, #tpu.memory_space<vmem>>, vector<1x16x32xf32>
      %251 = vector.shape_cast %250 : vector<1x16x32xf32> to vector<16x32xf32>
      %252 = arith.mulf %251, %236 : vector<16x32xf32>
      %253 = arith.index_cast %248 : i32 to index
      %c0_110 = arith.constant 0 : index
      %c0_111 = arith.constant 0 : index
      %254 = vector.load %arg14[%253, %c0_110, %c0_111] : memref<64x16x32xf32, #tpu.memory_space<vmem>>, vector<1x16x32xf32>
      %255 = vector.shape_cast %254 : vector<1x16x32xf32> to vector<16x32xf32>
      %256 = arith.addf %252, %255 : vector<16x32xf32>
      %257 = vector.extract_strided_slice %146 {offsets = [5, 0, 0], sizes = [1, 16, 1], strides = [1, 1, 1]} : vector<8x16x1xf32> to vector<1x16x1xf32>
      %258 = vector.shape_cast %257 : vector<1x16x1xf32> to vector<16x1xf32>
      %259 = vector.broadcast %258 : vector<16x1xf32> to vector<16x32xf32>
      %260 = arith.mulf %256, %259 : vector<16x32xf32>
      %cst_112 = arith.constant dense<0.000000e+00> : vector<32xf32>
      %261 = vector.multi_reduction <add>, %260, %cst_112 [0] : vector<16x32xf32> to vector<32xf32>
      %262 = vector.shape_cast %261 : vector<32xf32> to vector<1x32xf32>
      %c5_i32_113 = arith.constant 5 : i32
      %263 = vector.broadcast %c5_i32_113 : i32 to vector<8x32xi32>
      %264 = arith.cmpi eq, %137, %263 : vector<8x32xi32>
      %265 = vector.shape_cast %262 : vector<1x32xf32> to vector<1x32xf32>
      %266 = vector.broadcast %265 : vector<1x32xf32> to vector<8x32xf32>
      %267 = arith.select %264, %266, %247 : vector<8x32xi1>, vector<8x32xf32>
      %c6_i32 = arith.constant 6 : i32
      %268 = arith.addi %143, %c6_i32 : i32
      %269 = arith.index_cast %268 : i32 to index
      %c0_114 = arith.constant 0 : index
      %c0_115 = arith.constant 0 : index
      %270 = vector.load %arg13[%269, %c0_114, %c0_115] : memref<64x16x32xf32, #tpu.memory_space<vmem>>, vector<1x16x32xf32>
      %271 = vector.shape_cast %270 : vector<1x16x32xf32> to vector<16x32xf32>
      %272 = arith.mulf %271, %256 : vector<16x32xf32>
      %273 = arith.index_cast %268 : i32 to index
      %c0_116 = arith.constant 0 : index
      %c0_117 = arith.constant 0 : index
      %274 = vector.load %arg14[%273, %c0_116, %c0_117] : memref<64x16x32xf32, #tpu.memory_space<vmem>>, vector<1x16x32xf32>
      %275 = vector.shape_cast %274 : vector<1x16x32xf32> to vector<16x32xf32>
      %276 = arith.addf %272, %275 : vector<16x32xf32>
      %277 = vector.extract_strided_slice %146 {offsets = [6, 0, 0], sizes = [1, 16, 1], strides = [1, 1, 1]} : vector<8x16x1xf32> to vector<1x16x1xf32>
      %278 = vector.shape_cast %277 : vector<1x16x1xf32> to vector<16x1xf32>
      %279 = vector.broadcast %278 : vector<16x1xf32> to vector<16x32xf32>
      %280 = arith.mulf %276, %279 : vector<16x32xf32>
      %cst_118 = arith.constant dense<0.000000e+00> : vector<32xf32>
      %281 = vector.multi_reduction <add>, %280, %cst_118 [0] : vector<16x32xf32> to vector<32xf32>
      %282 = vector.shape_cast %281 : vector<32xf32> to vector<1x32xf32>
      %c6_i32_119 = arith.constant 6 : i32
      %283 = vector.broadcast %c6_i32_119 : i32 to vector<8x32xi32>
      %284 = arith.cmpi eq, %137, %283 : vector<8x32xi32>
      %285 = vector.shape_cast %282 : vector<1x32xf32> to vector<1x32xf32>
      %286 = vector.broadcast %285 : vector<1x32xf32> to vector<8x32xf32>
      %287 = arith.select %284, %286, %267 : vector<8x32xi1>, vector<8x32xf32>
      %c7_i32 = arith.constant 7 : i32
      %288 = arith.addi %143, %c7_i32 : i32
      %289 = arith.index_cast %288 : i32 to index
      %c0_120 = arith.constant 0 : index
      %c0_121 = arith.constant 0 : index
      %290 = vector.load %arg13[%289, %c0_120, %c0_121] : memref<64x16x32xf32, #tpu.memory_space<vmem>>, vector<1x16x32xf32>
      %291 = vector.shape_cast %290 : vector<1x16x32xf32> to vector<16x32xf32>
      %292 = arith.mulf %291, %276 : vector<16x32xf32>
      %293 = arith.index_cast %288 : i32 to index
      %c0_122 = arith.constant 0 : index
      %c0_123 = arith.constant 0 : index
      %294 = vector.load %arg14[%293, %c0_122, %c0_123] : memref<64x16x32xf32, #tpu.memory_space<vmem>>, vector<1x16x32xf32>
      %295 = vector.shape_cast %294 : vector<1x16x32xf32> to vector<16x32xf32>
      %296 = arith.addf %292, %295 : vector<16x32xf32>
      %297 = vector.extract_strided_slice %146 {offsets = [7, 0, 0], sizes = [1, 16, 1], strides = [1, 1, 1]} : vector<8x16x1xf32> to vector<1x16x1xf32>
      %298 = vector.shape_cast %297 : vector<1x16x1xf32> to vector<16x1xf32>
      %299 = vector.broadcast %298 : vector<16x1xf32> to vector<16x32xf32>
      %300 = arith.mulf %296, %299 : vector<16x32xf32>
      %cst_124 = arith.constant dense<0.000000e+00> : vector<32xf32>
      %301 = vector.multi_reduction <add>, %300, %cst_124 [0] : vector<16x32xf32> to vector<32xf32>
      %302 = vector.shape_cast %301 : vector<32xf32> to vector<1x32xf32>
      %c7_i32_125 = arith.constant 7 : i32
      %303 = vector.broadcast %c7_i32_125 : i32 to vector<8x32xi32>
      %304 = arith.cmpi eq, %137, %303 : vector<8x32xi32>
      %305 = vector.shape_cast %302 : vector<1x32xf32> to vector<1x32xf32>
      %306 = vector.broadcast %305 : vector<1x32xf32> to vector<8x32xf32>
      %307 = arith.select %304, %306, %287 : vector<8x32xi1>, vector<8x32xf32>
      %308 = arith.index_cast %143 : i32 to index
      %c0_126 = arith.constant 0 : index
      %309 = vector.load %arg16[%308, %c0_126] : memref<64x32xf32, #tpu.memory_space<vmem>>, vector<8x32xf32>
      %310 = arith.addf %307, %309 : vector<8x32xf32>
      %311 = arith.index_cast %143 : i32 to index
      %c0_127 = arith.constant 0 : index
      %312 = vector.load %arg17[%311, %c0_127] : memref<64x32xf32, #tpu.memory_space<vmem>>, vector<8x32xf32>
      %313 = arith.mulf %310, %312 : vector<8x32xf32>
      %c0_128 = arith.constant 0 : index
      %314 = arith.index_cast %143 : i32 to index
      %c0_129 = arith.constant 0 : index
      %315 = vector.load %arg11[%c0_128, %314, %c0_129] : memref<1x64x32xf32, #tpu.memory_space<vmem>>, vector<1x8x32xf32>
      %316 = vector.shape_cast %315 : vector<1x8x32xf32> to vector<8x32xf32>
      %317 = vector.shape_cast %313 : vector<8x32xf32> to vector<1x8x32xf32>
      tpu.vector_store %arg11[%c0_128, %314, %c0_129], %317 {strides = array<i32>} : memref<1x64x32xf32, #tpu.memory_space<vmem>>, vector<1x8x32xf32>,
      scf.yield %296 : vector<16x32xf32>
    }
    %c8_i32_70 = arith.constant 8 : i32
    %c0_71 = arith.constant 0 : index
    %c0_72 = arith.constant 0 : index
    %141 = vector.load %arg12[%c0_71, %c0_72] : memref<16x32xf32, #tpu.memory_space<vmem>>, vector<16x32xf32>
    tpu.vector_store %arg12[%c0_71, %c0_72], %140 {strides = array<i32>} : memref<16x32xf32, #tpu.memory_space<vmem>>, vector<16x32xf32>,
    return
  }
  func.func @transform_0(%arg0: i32, %arg1: i32) -> (i32, i32, i32) {
    %c0_i32 = arith.constant 0 : i32
    %c0_i32_0 = arith.constant 0 : i32
    return %arg0, %arg1, %c0_i32 : i32, i32, i32
  }
  func.func @transform_1(%arg0: i32, %arg1: i32) -> (i32, i32) {
    %c0_i32 = arith.constant 0 : i32
    %c0_i32_0 = arith.constant 0 : i32
    %c0_i32_1 = arith.constant 0 : i32
    return %c0_i32, %c0_i32_0 : i32, i32
  }
  func.func @transform_2(%arg0: i32, %arg1: i32) -> (i32, i32) {
    %c0_i32 = arith.constant 0 : i32
    %c0_i32_0 = arith.constant 0 : i32
    %c0_i32_1 = arith.constant 0 : i32
    return %c0_i32, %c0_i32_0 : i32, i32
  }
  func.func @transform_3(%arg0: i32, %arg1: i32) -> (i32, i32) {
    %c0_i32 = arith.constant 0 : i32
    %c0_i32_0 = arith.constant 0 : i32
    %c0_i32_1 = arith.constant 0 : i32
    return %c0_i32, %c0_i32_0 : i32, i32
  }
  func.func @transform_4(%arg0: i32, %arg1: i32) -> (i32, i32) {
    %c0_i32 = arith.constant 0 : i32
    %c0_i32_0 = arith.constant 0 : i32
    %c0_i32_1 = arith.constant 0 : i32
    return %c0_i32, %c0_i32_0 : i32, i32
  }
  func.func @transform_5(%arg0: i32, %arg1: i32) -> (i32, i32) {
    %c0_i32 = arith.constant 0 : i32
    %c0_i32_0 = arith.constant 0 : i32
    %c0_i32_1 = arith.constant 0 : i32
    return %c0_i32, %c0_i32_0 : i32, i32
  }
  func.func @transform_6(%arg0: i32, %arg1: i32) -> (i32, i32) {
    %c0_i32 = arith.constant 0 : i32
    %c0_i32_0 = arith.constant 0 : i32
    %c0_i32_1 = arith.constant 0 : i32
    return %c0_i32, %c0_i32_0 : i32, i32
  }
  func.func @transform_7(%arg0: i32, %arg1: i32) -> (i32, i32) {
    %c0_i32 = arith.constant 0 : i32
    %c0_i32_0 = arith.constant 0 : i32
    %c0_i32_1 = arith.constant 0 : i32
    return %c0_i32, %c0_i32_0 : i32, i32
  }
  func.func @transform_8(%arg0: i32, %arg1: i32) -> (i32, i32) {
    %c0_i32 = arith.constant 0 : i32
    %c0_i32_0 = arith.constant 0 : i32
    %c0_i32_1 = arith.constant 0 : i32
    return %c0_i32, %c0_i32_0 : i32, i32
  }
  func.func @transform_9(%arg0: i32, %arg1: i32) -> (i32, i32, i32) {
    %c0_i32 = arith.constant 0 : i32
    %c0_i32_0 = arith.constant 0 : i32
    return %arg0, %arg1, %c0_i32 : i32, i32, i32
  }
}

</mosaic_0001>

<bundles_post_ra>
// kernel: tpu_custom_call.1
= control target key start
LH: loop header
LB: loop body
LE: loop exit
PB: predicated region body
PF: predicated region fallthrough
CT: control target
= control target key end

     0   :  { %s7128_s30 = smov 0   ;;  %s7130_s10 = smov 0   ;;  %s9534_s0 = inlined_call_operand.vmem [shape: f32[2,64,32], index: 0, kind: input, shape index: {}]   ;;  %s9535_s1 = inlined_call_operand.vmem [shape: f32[1,32], index: 1, kind: input, shape index: {}]   ;;  %s9536_s2 = inlined_call_operand.vmem [shape: f32[1,32], index: 2, kind: input, shape index: {}]   ;;  %s9537_s3 = inlined_call_operand.vmem [shape: f32[32,34], index: 3, kind: input, shape index: {}]   ;;  %s9538_s4 = inlined_call_operand.vmem [shape: f32[1,34], index: 4, kind: input, shape index: {}]   ;;  %s9539_s5 = inlined_call_operand.vmem [shape: f32[2,32], index: 5, kind: input, shape index: {}]   ;;  %s9540_s6 = inlined_call_operand.vmem [shape: f32[1,32], index: 6, kind: input, shape index: {}]   ;;  %s9541_s7 = inlined_call_operand.vmem [shape: f32[16,32], index: 7, kind: input, shape index: {}]   ;;  %s9542_s8 = inlined_call_operand.vmem [shape: f32[1,32], index: 8, kind: input, shape index: {}]   ;;  %s9543_s9 = inlined_call_operand.vmem [shape: f32[2,64,32], index: 9, kind: output, shape index: {}]  }
   0x1   :  { %s7132_s11 = smov 0  }
   0x2 LB: > { %s31_s12 = sadd.s32 1, %s7056_s10  ;;  %p6058_p0 = scmp.ge.s32.totalorder %s7060_s11, 1  ;;  %s7060_s11 = sphi %s7132_s11, %s19_s11   ;;  %s7056_s10 = sphi %s7130_s10, %s9770_s10   ;;  %s7052_s30 = sphi %s7128_s30, %s9769_s30  }
   0x3   : > { %p33_p1 = scmp.ge.s32.totalorder %s31_s12, 2  ;;  %p308_p2 = scmp.lt.s32.totalorder %s7060_s11, 3 }
   0x5   : > { %s9772_s12 = smov (%p33_p1, %s31_s12), 0  ;;  %p309_p3 = pnand %p6058_p0, %p308_p2 }
   0x7   : > { %312 = sbr.rel (%p309_p3) target bundleno = 1212 (0x4bc), region = 56 }
   0xe   : > { %v874_v0 = vld [vmem:[%s9537_s3] sm:$0xff]  ;;  %v875_v1 = vld [vmem:[%s9537_s3 + $0x8] sm:$0xff]  ;;  %v876_v2 = vld [vmem:[%s9537_s3 + $0x10] sm:$0xff]  ;;  %p353_p4 = scmp.lt.s32.totalorder %s7052_s30, 1  ;;  %v7074_v50 = vmov -1.0   ;;  %vm842_vm6 = vcmask 261120  }
   0xf   : > { %v910_v3 = vand.u32 4294901760, %v874_v0  ;;  %v913_v4 = vand.u32 4294901760, %v875_v1  ;;  %v877_v5 = vld [vmem:[%s9537_s3 + $0x18] sm:$0xff]  ;;  %v916_v6 = vand.u32 4294901760, %v876_v2  ;;  %v7169_v12 = vld [vmem:[%s9535_s1] ss:$0 sm:$0xff] }
  0x10   : > { %v919_v7 = vand.u32 4294901760, %v877_v5  ;;  %s9774_s30 = smov (!%p353_p4, %s7052_s30), 1  ;;  %v7189_v16 = vld [vmem:[%s9536_s2] ss:$0 sm:$0xff]  ;;  %s7075_s20 = smov 110  }
  0x11   : > { %v7158_v8 = vpack.c.bf16 %v913_v4, %v910_v3  ;;  %v7160_v9 = vsub.f32 %v874_v0, %v910_v3  ;;  %v7162_v10 = vsub.f32 %v875_v1, %v913_v4  ;;  %s6128_s21 = sshll.u32 %s9774_s30, 6  ;;  %v7204_v29 = vsub.f32 %v876_v2, %v916_v6  ;;  %s9421_s16 = smov 0  }
  0x12   : > { %v7164_v11 = vpack.c.bf16 %v919_v7, %v916_v6  ;;  %s7175_s26 = scalar_lea.vmem %s9534_s0, %s6128_s21  ;;  %s7180_s29 = scalar_lea.vmem %s9543_s9, %s6128_s21  ;;  %v7208_v35 = vsub.f32 %v877_v5, %v919_v7 }
  0x13   : > { %6476 = vmatprep.subr.bf16.mxu0 %v7158_v8  ;;  %v9551_v13 = vand.u32 4294901760, %v7160_v9  ;;  %v9550_v14 = vand.u32 4294901760, %v7162_v10  ;;  %v372_v15 = vld [vmem:[%s7175_s26] sm:$0xff]  ;;  %v373_v17 = vld [vmem:[%s7175_s26 + $0x8] sm:$0xff]  ;;  %v9548_v40 = vand.u32 4294901760, %v7204_v29  ;;  %v374_v44 = vld [vmem:[%s7175_s26 + $0x10] sm:$0xff] }
  0x14   : > { %6478 = vmatpush3.bf16.msra.mxu0 %v7158_v8  ;;  %v387_v18 = vmul.f32 %v7169_v12, %v372_v15  ;;  %v634_v19 = vmul.f32 0.70710677, %v372_v15  ;;  %v388_v22 = vmul.f32 %v7169_v12, %v373_v17  ;;  %v635_v28 = vmul.f32 0.70710677, %v373_v17  ;;  %v7224_v57 = vld [vmem:[%s7175_s26 + $0x18] sm:$0xff] }
  0x15   : > { %6480 = vmatprep.subr.bf16.mxu0 %v7164_v11  ;;  %v1062_v20 = vsub.f32 %v7160_v9, %v9551_v13  ;;  %v1069_v21 = vsub.f32 %v7162_v10, %v9550_v14  ;;  %v7213_v45 = vmul.f32 0.5, %v372_v15  ;;  %v9547_v48 = vand.u32 4294901760, %v7208_v35 }
  0x16   : > { %v402_v23 = vadd.f32 %v7189_v16, %v387_v18  ;;  %v658_v24 = vand.u32 2147483647, %v634_v19  ;;  %v403_v27 = vadd.f32 %v7189_v16, %v388_v22  ;;  %vm642_vm0 = vcmp.ge.f32.partialorder %v634_v19, 0.0 }
  0x17   : > { %v1063_v25 = vand.u32 4294901760, %v1062_v20  ;;  %v1070_v26 = vand.u32 4294901760, %v1069_v21  ;;  %v659_v39 = vand.u32 2147483647, %v635_v28  ;;  %v7218_v51 = vsel %vm642_vm0, 1.0, %v7074_v50 }
  0x18   : > { %6482 = vmatpush3.bf16.msra.mxu0 %v7164_v11  ;;  %v418_v30 = vmul.f32 0.70710677, %v402_v23  ;;  %v666_v31 = vmul.f32 0.3275911, %v658_v24  ;;  %v770_v32 = vsub.f32 0.0, %v658_v24  ;;  %v7220_v52 = vmul.f32 0.5, %v373_v17 }
  0x19   : > { %v7206_v33 = vpack.c.bf16 %v1070_v26, %v1063_v25  ;;  %v419_v34 = vmul.f32 0.70710677, %v403_v27  ;;  %v667_v47 = vmul.f32 0.3275911, %v659_v39  ;;  %vm643_vm1 = vcmp.ge.f32.partialorder %v635_v28, 0.0 }
  0x1a   : > { %v442_v36 = vand.u32 2147483647, %v418_v30  ;;  %v674_v37 = vadd.f32 1.0, %v666_v31  ;;  %v778_v43 = vmul.f32 %v770_v32, %v658_v24  ;;  %v389_v56 = vmul.f32 %v7169_v12, %v374_v44 }
  0x1b   : > { %6484 = vmatprep.subr.bf16.mxu0 %v7206_v33  ;;  %v443_v38 = vand.u32 2147483647, %v419_v34  ;;  %vm426_vm2 = vcmp.ge.f32.partialorder %v418_v30, 0.0  ;;  %v675_v59 = vadd.f32 1.0, %v667_v47  ;;  %v771_v60 = vsub.f32 0.0, %v659_v39 }
  0x1c   : > { %v450_v41 = vmul.f32 0.3275911, %v442_v36  ;;  %v554_v42 = vsub.f32 0.0, %v442_v36  ;;  %6671 = vrcp.f32 %v674_v37  ;;  %v786_v58 = vmul.f32 1.442695, %v778_v43 }
  0x1d   : > { %v451_v46 = vmul.f32 0.3275911, %v443_v38  ;;  %v555_v55 = vsub.f32 0.0, %v443_v38  ;;  %v404_v61 = vadd.f32 %v7189_v16, %v389_v56  ;;  %v636_v62 = vmul.f32 0.70710677, %v374_v44 }
  0x1e   : > { %v458_v49 = vadd.f32 1.0, %v450_v41  ;;  %v562_v53 = vmul.f32 %v554_v42, %v442_v36  ;;  %v7227_v63 = vmul.f32 0.5, %v402_v23  ;;  %v7229_v0 = vmul.f32 0.5, %v403_v27 }
  0x1f   : > { %v459_v54 = vadd.f32 1.0, %v451_v46  ;;  %vm427_vm3 = vcmp.ge.f32.partialorder %v419_v34, 0.0  ;;  %v390_v1 = vmul.f32 %v7169_v12, %v7224_v57  ;;  %v563_v3 = vmul.f32 %v555_v55, %v443_v38 }
  0x20   : > { %6673 = vrcp.f32 %v458_v49  ;;  %v570_v2 = vmul.f32 1.442695, %v562_v53  ;;  %v7235_v4 = vsel %vm643_vm1, 1.0, %v7074_v50  ;;  %v7237_v5 = vmul.f32 0.70710677, %v404_v61 }
  0x21   : > { %6675 = vrcp.f32 %v459_v54  ;;  %v7241_v6 = vsel %vm426_vm2, 1.0, %v7074_v50  ;;  %v660_v7 = vand.u32 2147483647, %v636_v62  ;;  %v7244_v15 = vadd.f32 %v7189_v16, %v390_v1 }
  0x22   : > { %6677 = vrcp.f32 %v675_v59  ;;  %v7247_v17 = vsel %vm427_vm3, 1.0, %v7074_v50  ;;  %v779_v18 = vmul.f32 %v771_v60, %v659_v39  ;;  %v444_v19 = vand.u32 2147483647, %v7237_v5 }
  0x23   : > { %6679 = vpow2.f32 %v786_v58  ;;  %v7252_v21 = vmul.f32 0.5, %v374_v44  ;;  %v668_v22 = vmul.f32 0.3275911, %v660_v7  ;;  %v772_v23 = vsub.f32 0.0, %v660_v7 }
  0x24   : > { %v7255_v24 = vmul.f32 0.70710677, %v7224_v57  ;;  %6681 = vpow2.f32 %v570_v2  ;;  %v572_v26 = vmul.f32 1.442695, %v563_v3  ;;  %v452_v27 = vmul.f32 0.3275911, %v444_v19 }
  0x25   : > { %vm644_vm4 = vcmp.ge.f32.partialorder %v636_v62, 0.0  ;;  %v676_v28 = vadd.f32 1.0, %v668_v22  ;;  %v780_v30 = vmul.f32 %v772_v23, %v660_v7  ;;  %v7259_v31 = vmul.f32 0.70710677, %v7244_v15 }
  0x26   : > { %v7250_v20 = vpop.eup %6671  ;;  %v788_v34 = vmul.f32 1.442695, %v779_v18  ;;  %v7261_v36 = vmul.f32 0.5, %v404_v61  ;;  %v460_v37 = vadd.f32 1.0, %v452_v27  ;;  %v556_v39 = vsub.f32 0.0, %v444_v19  ;;  %v7284_v27 = vld [vmem:[%s7175_s26 + $0x20] sm:$0xff] }
  0x27   : > { %v698_v25 = vmul.f32 1.0614054, %v7250_v20  ;;  %6683 = vrcp.f32 %v676_v28  ;;  %v445_v41 = vand.u32 2147483647, %v7259_v31  ;;  %v661_v42 = vand.u32 2147483647, %v7255_v24 }
  0x28   : > { %6685 = vrcp.f32 %v460_v37  ;;  %v7273_v47 = vsel %vm644_vm4, 1.0, %v7074_v50  ;;  %v790_v53 = vmul.f32 1.442695, %v780_v30  ;;  %vm428_vm5 = vcmp.ge.f32.partialorder %v7237_v5, 0.0 }
  0x29   : > { %v706_v32 = vadd.f32 -1.4531521, %v698_v25  ;;  %6687 = vpow2.f32 %v572_v26  ;;  %v453_v54 = vmul.f32 0.3275911, %v445_v41  ;;  %v557_v58 = vsub.f32 0.0, %v445_v41 }
  0x2a   : > { %v7263_v38 = vpop.eup %6673  ;;  %v564_v61 = vmul.f32 %v556_v39, %v444_v19  ;;  %v669_v2 = vmul.f32 0.3275911, %v661_v42  ;;  %v773_v22 = vsub.f32 0.0, %v661_v42  ;;  %v7289_v39 = vsel %vm428_vm5, 1.0, %v7074_v50 }
  0x2b   : > { %v7267_v43 = vpop.eup %6675  ;;  %v482_v44 = vmul.f32 1.0614054, %v7263_v38  ;;  %v714_v46 = vmul.f32 %v7250_v20, %v706_v32  ;;  %v461_v1 = vadd.f32 1.0, %v453_v54  ;;  %v565_v25 = vmul.f32 %v557_v58, %v445_v41 }
  0x2c   : > { %v483_v49 = vmul.f32 1.0614054, %v7267_v43  ;;  %v7277_v59 = vpop.eup %6677  ;;  %v677_v26 = vadd.f32 1.0, %v669_v2  ;;  %v781_v54 = vmul.f32 %v773_v22, %v661_v42  ;;  %v391_v5 = vmul.f32 %v7169_v12, %v7284_v27 }
  0x2d   : > { %v490_v55 = vadd.f32 -1.4531521, %v482_v44  ;;  %v722_v56 = vadd.f32 1.4214138, %v714_v46  ;;  %v6680_v62 = vpop.eup %6679  ;;  %v699_v18 = vmul.f32 1.0614054, %v7277_v59  ;;  %6689 = vrcp.f32 %v461_v1 }
  0x2e   : > { %v491_v60 = vadd.f32 -1.4531521, %v483_v49  ;;  %v6682_v28 = vpop.eup %6681  ;;  %6691 = vpow2.f32 %v788_v34  ;;  %v574_v44 = vmul.f32 1.442695, %v564_v61  ;;  %v7298_v34 = vmul.f32 0.5, %v7244_v15 }
  0x2f   : > { %v498_v3 = vmul.f32 %v7263_v38, %v490_v55  ;;  %v730_v7 = vmul.f32 %v7250_v20, %v722_v56  ;;  %v707_v32 = vadd.f32 -1.4531521, %v699_v18  ;;  %6693 = vrcp.f32 %v677_v26 }
  0x30   : > { %v499_v23 = vmul.f32 %v7267_v43, %v491_v60  ;;  %v576_v58 = vmul.f32 1.442695, %v565_v25  ;;  %6695 = vpow2.f32 %v790_v53  ;;  %v792_v25 = vmul.f32 1.442695, %v781_v54 }
  0x31   : > { %v506_v30 = vadd.f32 1.4214138, %v498_v3  ;;  %v738_v19 = vadd.f32 -0.28449672, %v730_v7  ;;  %v715_v49 = vmul.f32 %v7277_v59, %v707_v32  ;;  %v7294_v55 = vpop.eup %6683  ;;  %6697 = vpow2.f32 %v574_v44 }
  0x32   : > { %v507_v37 = vadd.f32 1.4214138, %v499_v23  ;;  %v7302_v60 = vpop.eup %6685  ;;  %v700_v18 = vmul.f32 1.0614054, %v7294_v55  ;;  %v7311_v53 = vadd.f32 %v7189_v16, %v391_v5  ;;  %6699 = vpow2.f32 %v576_v58 }
  0x33   : > { %v514_v46 = vmul.f32 %v7263_v38, %v506_v30  ;;  %v746_v41 = vmul.f32 %v7250_v20, %v738_v19  ;;  %v723_v2 = vadd.f32 1.4214138, %v715_v49  ;;  %v6688_v3 = vpop.eup %6687  ;;  %v484_v42 = vmul.f32 1.0614054, %v7302_v60 }
  0x34   : > { %v515_v56 = vmul.f32 %v7267_v43, %v507_v37  ;;  %v708_v19 = vadd.f32 -1.4531521, %v700_v18  ;;  %v7318_v54 = vmul.f32 0.70710677, %v7284_v27  ;;  %v7327_v18 = vmul.f32 0.70710677, %v7311_v53 }
  0x35   : > { %v522_v61 = vadd.f32 -0.28449672, %v514_v46  ;;  %v754_v1 = vadd.f32 0.2548296, %v746_v41  ;;  %v731_v23 = vmul.f32 %v7277_v59, %v723_v2  ;;  %v492_v30 = vadd.f32 -1.4531521, %v484_v42 }
  0x36   : > { %v523_v7 = vadd.f32 -0.28449672, %v515_v56  ;;  %v716_v49 = vmul.f32 %v7294_v55, %v708_v19  ;;  %vm429_vm7 = vcmp.ge.f32.partialorder %v7259_v31, 0.0  ;;  %6701 = vpow2.f32 %v792_v25  ;;  %v7345_v25 = vld [vmem:[%s9542_s8] ss:$0 sm:$0xff] }
  0x37   : > { %v530_v15 = vmul.f32 %v7263_v38, %v522_v61  ;;  %v762_v22 = vmul.f32 %v7250_v20, %v754_v1  ;;  %v739_v46 = vadd.f32 -0.28449672, %v731_v23  ;;  %v7313_v44 = vpop.eup %6689  ;;  %v500_v20 = vmul.f32 %v7302_v60, %v492_v30 }
  0x38   : > { %v531_v26 = vmul.f32 %v7267_v43, %v523_v7  ;;  %v6692_v56 = vpop.eup %6691  ;;  %v724_v42 = vadd.f32 1.4214138, %v716_v49  ;;  %vm645_vm8 = vcmp.ge.f32.partialorder %v7255_v24, 0.0  ;;  %vm430_vm9 = vcmp.ge.f32.partialorder %v7327_v18, 0.0 }
  0x39   : > { %v538_v32 = vadd.f32 0.2548296, %v530_v15  ;;  %v802_v37 = vmul.f32 %v6680_v62, %v762_v22  ;;  %v747_v1 = vmul.f32 %v7277_v59, %v739_v46  ;;  %v485_v62 = vmul.f32 1.0614054, %v7313_v44  ;;  %v7323_v58 = vpop.eup %6693 }
  0x3a   : > { %v539_v41 = vadd.f32 0.2548296, %v531_v26  ;;  %v508_v7 = vadd.f32 1.4214138, %v500_v20  ;;  %v732_v19 = vmul.f32 %v7294_v55, %v724_v42  ;;  %vm646_vm10 = vcmp.ge.f32.partialorder %v7318_v54, 0.0 }
  0x3b   : > { %v546_v61 = vmul.f32 %v7263_v38, %v538_v32  ;;  %v810_v5 = vsub.f32 1.0, %v802_v37  ;;  %v755_v23 = vadd.f32 0.2548296, %v747_v1  ;;  %v493_v26 = vadd.f32 -1.4531521, %v485_v62  ;;  %v6696_v37 = vpop.eup %6695 }
  0x3c   : > { %v547_v2 = vmul.f32 %v7267_v43, %v539_v41  ;;  %v516_v30 = vmul.f32 %v7302_v60, %v508_v7  ;;  %v701_v32 = vmul.f32 1.0614054, %v7323_v58  ;;  %v6698_v49 = vpop.eup %6697  ;;  %vm1761_vm1 = vcmask 1041408  }
  0x3d   : > { %v586_v15 = vmul.f32 %v6682_v28, %v546_v61  ;;  %v818_v22 = vmul.f32 %v810_v5, %v7218_v51  ;;  %v763_v41 = vmul.f32 %v7277_v59, %v755_v23  ;;  %v501_v20 = vmul.f32 %v7313_v44, %v493_v26 }
  0x3e   : > { %v587_v38 = vmul.f32 %v6688_v3, %v547_v2  ;;  %v524_v61 = vadd.f32 -0.28449672, %v516_v30  ;;  %v740_v51 = vadd.f32 -0.28449672, %v732_v19  ;;  %v709_v42 = vadd.f32 -1.4531521, %v701_v32 }
  0x3f   : > { %v594_v46 = vsub.f32 1.0, %v586_v15  ;;  %v826_v43 = vadd.f32 1.0, %v818_v22  ;;  %v803_v1 = vmul.f32 %v6692_v56, %v763_v41  ;;  %v509_v62 = vadd.f32 1.4214138, %v501_v20  ;;  %v6700_v15 = vpop.eup %6699 }
  0x40   : > { %v595_v28 = vsub.f32 1.0, %v587_v38  ;;  %v532_v7 = vmul.f32 %v7302_v60, %v524_v61  ;;  %v748_v59 = vmul.f32 %v7294_v55, %v740_v51  ;;  %v7349_v56 = vand.u32 2147483647, %v7327_v18 }
  0x41   : > { %v602_v3 = vmul.f32 %v594_v46, %v7241_v6  ;;  %v834_v5 = vmul.f32 %v826_v43, %v7213_v45  ;;  %v811_v6 = vsub.f32 1.0, %v803_v1  ;;  %v517_v45 = vmul.f32 %v7313_v44, %v509_v62 }
  0x42   : > { %v603_v2 = vmul.f32 %v595_v28, %v7247_v17  ;;  %v540_v23 = vadd.f32 0.2548296, %v532_v7  ;;  %v756_v26 = vadd.f32 0.2548296, %v748_v59  ;;  %v717_v38 = vmul.f32 %v7323_v58, %v709_v42  ;;  %v6702_v7 = vpop.eup %6701 }
  0x43   : > { %v610_v22 = vadd.f32 1.0, %v602_v3  ;;  %843 = vst.msk [vmem:[#allocation7] sm:$0xff] %vm842_vm6, %v834_v5  ;;  %v819_v19 = vmul.f32 %v811_v6, %v7235_v4  ;;  %v525_v32 = vadd.f32 -0.28449672, %v517_v45  ;;  %v454_v46 = vmul.f32 0.3275911, %v7349_v56 }
  0x44   : > { %v611_v17 = vadd.f32 1.0, %v603_v2  ;;  %v548_v41 = vmul.f32 %v7302_v60, %v540_v23  ;;  %v764_v20 = vmul.f32 %v7294_v55, %v756_v26  ;;  %v725_v28 = vadd.f32 1.4214138, %v717_v38 }
  0x45   : > { %v7353_v30 = vmul.f32 %v610_v22, %v7227_v63  ;;  %v827_v51 = vadd.f32 1.0, %v819_v19  ;;  %v533_v4 = vmul.f32 %v7313_v44, %v525_v32  ;;  %v462_v6 = vadd.f32 1.0, %v454_v46 }
  0x46   : > { %v7358_v43 = vmul.f32 %v611_v17, %v7229_v0  ;;  %v588_v5 = vmul.f32 %v6698_v49, %v548_v41  ;;  %v804_v62 = vmul.f32 %v6696_v37, %v764_v20  ;;  %v733_v22 = vmul.f32 %v7323_v58, %v725_v28 }
  0x47   : > { %v858_v61 = vmul.f32 %v7345_v25, %v7353_v30  ;;  %v886_v63 = vsel %vm842_vm6, %v7353_v30, 0  ;;  %v835_v55 = vmul.f32 %v827_v51, %v7220_v52  ;;  %v541_v2 = vadd.f32 0.2548296, %v533_v4 }
  0x48   : > { %v7367_v3 = vand.u32 4294901760, %v886_v63  ;;  %v859_v0 = vmul.f32 %v7345_v25, %v7358_v43  ;;  %v889_v60 = vsel %vm842_vm6, %v7358_v43, 0  ;;  %v596_v42 = vsub.f32 1.0, %v588_v5 }
  0x49   : > { %866 = vst.msk [vmem:[#allocation6] sm:$0xff] %vm842_vm6, %v858_v61  ;;  %v7375_v1 = vand.u32 4294901760, %v889_v60  ;;  %844 = vst.msk [vmem:[#allocation7 + $0x8] sm:$0xff] %vm842_vm6, %v835_v55  ;;  %v812_v52 = vsub.f32 1.0, %v804_v62  ;;  %v437_v37 = vsel %vm429_vm7, 1.0, %v7074_v50  ;;  %v549_v45 = vmul.f32 %v7313_v44, %v541_v2  ;;  %v7412_v55 = vld [vmem:[%s7175_s26 + $0x28] sm:$0xff] }
  0x4a   : > { %v7378_v59 = vsub.f32 %v886_v63, %v7367_v3  ;;  %867 = vst.msk [vmem:[#allocation6 + $0x8] sm:$0xff] %vm842_vm6, %v859_v0  ;;  %v604_v23 = vmul.f32 %v596_v42, %v7289_v39  ;;  %v741_v26 = vadd.f32 -0.28449672, %v733_v22  ;;  %6703 = vrcp.f32 %v462_v6 }
  0x4b   : > { %v7384_v49 = vsub.f32 %v889_v60, %v7375_v1  ;;  %v820_v19 = vmul.f32 %v812_v52, %v7273_v47  ;;  %v589_v32 = vmul.f32 %v6700_v15, %v549_v45  ;;  %v1076_v46 = vsub.f32 %v7204_v29, %v9548_v40 }
  0x4c   : > { %v9549_v17 = vand.u32 4294901760, %v7378_v59  ;;  %v612_v44 = vadd.f32 1.0, %v604_v23  ;;  %v749_v41 = vmul.f32 %v7323_v58, %v741_v26  ;;  %v662_v39 = vand.u32 2147483647, %v7318_v54 }
  0x4d   : > { %v9546_v38 = vand.u32 4294901760, %v7384_v49  ;;  %v828_v47 = vadd.f32 1.0, %v820_v19  ;;  %v597_v15 = vsub.f32 1.0, %v589_v32  ;;  %v558_v28 = vsub.f32 0.0, %v7349_v56 }
  0x4e   : > { %v981_v31 = vsub.f32 %v7378_v59, %v9549_v17  ;;  %v7407_v63 = vmul.f32 %v612_v44, %v7261_v36  ;;  %v757_v51 = vadd.f32 0.2548296, %v749_v41  ;;  %v670_v4 = vmul.f32 0.3275911, %v662_v39 }
  0x4f   : > { %v991_v20 = vsub.f32 %v7384_v49, %v9546_v38  ;;  %v836_v60 = vmul.f32 %v828_v47, %v7252_v21  ;;  %v605_v5 = vmul.f32 %v597_v15, %v437_v37  ;;  %v566_v6 = vmul.f32 %v558_v28, %v7349_v56 }
  0x50   : > { %v982_v61 = vand.u32 4294901760, %v981_v31  ;;  %9575 = vst [vmem:[#allocation9_spill] sm:$0xff] %v7407_v63  ;;  %v860_v62 = vmul.f32 %v7345_v25, %v7407_v63  ;;  %v892_v2 = vsel %vm842_vm6, %v7407_v63, 0  ;;  %v765_v36 = vmul.f32 %v7323_v58, %v757_v51 }
  0x51   : > { %v992_v0 = vand.u32 4294901760, %v991_v20  ;;  %v678_v42 = vadd.f32 1.0, %v670_v4  ;;  %845 = vst.msk [vmem:[#allocation7 + $0x10] sm:$0xff] %vm842_vm6, %v836_v60  ;;  %v7420_v22 = vand.u32 4294901760, %v892_v2  ;;  %v613_v21 = vadd.f32 1.0, %v605_v5  ;;  %v7467_v5 = vld [vmem:[%s7175_s26 + $0x30] sm:$0xff] }
  0x52   : > { %6279 = vmatprep.mubr.f32.mxu0 %v982_v61  ;;  %v1077_v52 = vand.u32 4294901760, %v1076_v46  ;;  %868 = vst.msk [vmem:[#allocation6 + $0x10] sm:$0xff] %vm842_vm6, %v860_v62  ;;  %v805_v37 = vmul.f32 %v6702_v7, %v765_v36  ;;  %v1083_v58 = vsub.f32 %v7208_v35, %v9547_v48  ;;  %v392_v45 = vmul.f32 %v7169_v12, %v7412_v55 }
  0x53   : > { %6280 = vmatmul.mubr.f32.vlgmr.msra.gmra.mrb[0].mxu0 %v992_v0  ;;  %6705 = vrcp.f32 %v678_v42  ;;  %v7431_v23 = vsub.f32 %v892_v2, %v7420_v22  ;;  %v7434_v26 = vmul.f32 %v613_v21, %v7298_v34  ;;  %v629_v56 = vmul.f32 0.5, %v7224_v57 }
  0x54   : > { %6486 = vmatpush3.bf16.msra.mxu0 %v7206_v33  ;;  %v653_v33 = vsel %vm645_vm8, 1.0, %v7074_v50  ;;  %v7440_v7 = vpop.eup %6703  ;;  %v813_v19 = vsub.f32 1.0, %v805_v37  ;;  %v774_v32 = vsub.f32 0.0, %v662_v39  ;;  %v1084_v46 = vand.u32 4294901760, %v1083_v58 }
  0x55   : > { %9576 = vst [vmem:[#allocation10_spill] sm:$0xff] %v7434_v26  ;;  %v7443_v31 = vadd.f32 %v7189_v16, %v392_v45  ;;  %v9545_v44 = vand.u32 4294901760, %v7431_v23  ;;  %v861_v34 = vmul.f32 %v7345_v25, %v7434_v26  ;;  %v895_v57 = vsel %vm842_vm6, %v7434_v26, 0 }
  0x56   : > { %v486_v24 = vmul.f32 1.0614054, %v7440_v7  ;;  %v821_v41 = vmul.f32 %v813_v19, %v653_v33  ;;  %v7451_v20 = vand.u32 4294901760, %v895_v57  ;;  %v578_v47 = vmul.f32 1.442695, %v566_v6 }
  0x57   : > { %v6487_v15 = vpack.c.bf16 %v1084_v46, %v1077_v52  ;;  %v1001_v28 = vsub.f32 %v7431_v23, %v9545_v44  ;;  %869 = vst.msk [vmem:[#allocation6 + $0x18] sm:$0xff] %vm842_vm6, %v861_v34  ;;  %v7458_v51 = vmul.f32 0.70710677, %v7443_v31  ;;  %v7464_v60 = vmul.f32 0.70710677, %v7412_v55 }
  0x58   : > { %v494_v61 = vadd.f32 -1.4531521, %v486_v24  ;;  %v829_v4 = vadd.f32 1.0, %v821_v41  ;;  %v7461_v0 = vsub.f32 %v895_v57, %v7451_v20  ;;  %v782_v36 = vmul.f32 %v774_v32, %v662_v39 }
  0x59   : > { %6488 = vmatprep.subr.bf16.mxu0 %v6487_v15  ;;  %v1002_v62 = vand.u32 4294901760, %v1001_v28  ;;  %v447_v42 = vand.u32 2147483647, %v7458_v51  ;;  %6707 = vpow2.f32 %v578_v47  ;;  %v393_v58 = vmul.f32 %v7169_v12, %v7467_v5 }
  0x5a   : > { %v502_v2 = vmul.f32 %v7440_v7, %v494_v61  ;;  %6490 = vmatpush3.bf16.msra.mxu0 %v6487_v15  ;;  %v837_v21 = vmul.f32 %v829_v4, %v629_v56  ;;  %v9544_v6 = vand.u32 4294901760, %v7461_v0  ;;  %v663_v33 = vand.u32 2147483647, %v7464_v60 }
  0x5b   : > { %6282 = vmatprep.mubr.f32.mxu0 %v1002_v62  ;;  %v455_v37 = vmul.f32 0.3275911, %v447_v42  ;;  %v794_v32 = vmul.f32 1.442695, %v782_v36  ;;  %v7484_v24 = vadd.f32 %v7189_v16, %v393_v58  ;;  %v559_v15 = vsub.f32 0.0, %v447_v42 }
  0x5c   : > { %v510_v52 = vadd.f32 1.4214138, %v502_v2  ;;  %846 = vst.msk [vmem:[#allocation7 + $0x18] sm:$0xff] %vm842_vm6, %v837_v21  ;;  %v1011_v39 = vsub.f32 %v7461_v0, %v9544_v6  ;;  %v671_v57 = vmul.f32 0.3275911, %v663_v33  ;;  %v775_v36 = vsub.f32 0.0, %v663_v33 }
  0x5d   : > { %v7474_v45 = vpop.eup %6705  ;;  %v463_v46 = vadd.f32 1.0, %v455_v37  ;;  %v7487_v61 = vmul.f32 0.70710677, %v7484_v24  ;;  %v7490_v4 = vmul.f32 0.70710677, %v7467_v5  ;;  %v7537_v44 = vpack.c.bf16 %v7162_v10, %v7160_v9 }
  0x5e   : > { %v518_v56 = vmul.f32 %v7440_v7, %v510_v52  ;;  %v702_v19 = vmul.f32 1.0614054, %v7474_v45  ;;  %v1012_v34 = vand.u32 4294901760, %v1011_v39  ;;  %v679_v28 = vadd.f32 1.0, %v671_v57  ;;  %v7496_v52 = vld [vmem:[%s7175_s26 + $0x38] sm:$0xff] }
  0x5f   : > { %6709 = vrcp.f32 %v463_v46  ;;  %v448_v21 = vand.u32 2147483647, %v7487_v61  ;;  %v664_v46 = vand.u32 2147483647, %v7490_v4  ;;  %6492 = vmatprep.subr.bf16.mxu0 %v7537_v44  ;;  %vm431_vm11 = vcmp.ge.f32.partialorder %v7458_v51, 0.0 }
  0x60   : > { %v526_v41 = vadd.f32 -0.28449672, %v518_v56  ;;  %v710_v47 = vadd.f32 -1.4531521, %v702_v19  ;;  %6283 = vmatmul.mubr.f32.gmra.mrb[2].mxu0 %v1012_v34  ;;  %6711 = vpow2.f32 %v794_v32  ;;  %v567_v56 = vmul.f32 %v559_v15, %v447_v42 }
  0x61   : > { %6713 = vrcp.f32 %v679_v28  ;;  %v456_v19 = vmul.f32 0.3275911, %v448_v21  ;;  %v783_v32 = vmul.f32 %v775_v36, %v663_v33  ;;  %v672_v28 = vmul.f32 0.3275911, %v664_v46 }
  0x62   : > { %v534_v62 = vmul.f32 %v7440_v7, %v526_v41  ;;  %v718_v2 = vmul.f32 %v7474_v45, %v710_v47  ;;  %v394_v41 = vmul.f32 %v7169_v12, %v7496_v52  ;;  %v438_v42 = vsel %vm430_vm9, 1.0, %v7074_v50 }
  0x63   : > { %v6708_v39 = vpop.eup %6707  ;;  %v464_v47 = vadd.f32 1.0, %v456_v19  ;;  %v580_v15 = vmul.f32 1.442695, %v567_v56  ;;  %v796_v12 = vmul.f32 1.442695, %v783_v32  ;;  %v439_v51 = vsel %vm431_vm11, 1.0, %v7074_v50 }
  0x64   : > { %v542_v37 = vadd.f32 0.2548296, %v534_v62  ;;  %v726_v58 = vadd.f32 1.4214138, %v718_v2  ;;  %v7506_v18 = vadd.f32 %v7189_v16, %v394_v41  ;;  %v7519_v19 = vmul.f32 0.70710677, %v7496_v52 }
  0x65   : > { %6715 = vrcp.f32 %v464_v47  ;;  %vm647_vm12 = vcmp.ge.f32.partialorder %v7464_v60, 0.0  ;;  %vm432_vm13 = vcmp.ge.f32.partialorder %v7487_v61, 0.0  ;;  %vm648_vm14 = vcmp.ge.f32.partialorder %v7490_v4, 0.0 }
  0x66   : > { %v550_v34 = vmul.f32 %v7440_v7, %v542_v37  ;;  %v734_v57 = vmul.f32 %v7474_v45, %v726_v58  ;;  %v680_v7 = vadd.f32 1.0, %v672_v28  ;;  %v7513_v37 = vmul.f32 0.70710677, %v7506_v18 }
  0x67   : > { %v414_v58 = vmul.f32 0.5, %v7311_v53  ;;  %v560_v53 = vsub.f32 0.0, %v448_v21  ;;  %vm649_vm0 = vcmp.ge.f32.partialorder %v7519_v19, 0.0  ;;  %vm1744_vm2 = vcmask 15360  }
  0x68   : > { %v590_v6 = vmul.f32 %v6708_v39, %v550_v34  ;;  %v742_v62 = vadd.f32 -0.28449672, %v734_v57  ;;  %v630_v39 = vmul.f32 0.5, %v7284_v27  ;;  %6717 = vrcp.f32 %v680_v7 }
  0x69   : > { %v7509_v2 = vpop.eup %6709  ;;  %6719 = vpow2.f32 %v580_v15  ;;  %v449_v27 = vand.u32 2147483647, %v7513_v37  ;;  %vm433_vm15 = vcmp.ge.f32.partialorder %v7513_v37, 0.0  ;;  %vm1727_vm3 = vcmask 130048  }
  0x6a   : > { %v598_v33 = vsub.f32 1.0, %v590_v6  ;;  %v750_v36 = vmul.f32 %v7474_v45, %v742_v62  ;;  %v487_v16 = vmul.f32 1.0614054, %v7509_v2  ;;  %v6712_v56 = vpop.eup %6711  ;;  %v654_v6 = vsel %vm646_vm10, 1.0, %v7074_v50 }
  0x6b   : > { %v7524_v32 = vpop.eup %6713  ;;  %6721 = vpow2.f32 %v796_v12  ;;  %v457_v54 = vmul.f32 0.3275911, %v449_v27  ;;  %v441_v37 = vsel %vm433_vm15, 1.0, %v7074_v50 }
  0x6c   : > { %v606_v34 = vmul.f32 %v598_v33, %v438_v42  ;;  %v758_v57 = vadd.f32 0.2548296, %v750_v36  ;;  %v495_v41 = vadd.f32 -1.4531521, %v487_v16  ;;  %v703_v62 = vmul.f32 1.0614054, %v7524_v32 }
  0x6d   : > { %v776_v33 = vsub.f32 0.0, %v664_v46  ;;  %v7531_v36 = vand.u32 2147483647, %v7519_v19 }
  0x6e   : > { %v614_v47 = vadd.f32 1.0, %v606_v34  ;;  %v766_v28 = vmul.f32 %v7474_v45, %v758_v57  ;;  %v503_v42 = vmul.f32 %v7509_v2, %v495_v41  ;;  %v711_v15 = vadd.f32 -1.4531521, %v703_v62 }
  0x6f   : > { %v568_v45 = vmul.f32 %v560_v53, %v448_v21  ;;  %v465_v57 = vadd.f32 1.0, %v457_v54  ;;  %v673_v12 = vmul.f32 0.3275911, %v7531_v36  ;;  %v784_v53 = vmul.f32 %v776_v33, %v664_v46 }
  0x70   : > { %v7533_v7 = vmul.f32 %v614_v47, %v414_v58  ;;  %v806_v16 = vmul.f32 %v6712_v56, %v766_v28  ;;  %v511_v34 = vadd.f32 1.4214138, %v503_v42  ;;  %v719_v58 = vmul.f32 %v7524_v32, %v711_v15  ;;  %v7546_v56 = vpop.eup %6715 }
  0x71   : > { %6723 = vrcp.f32 %v465_v57  ;;  %v488_v42 = vmul.f32 1.0614054, %v7546_v56  ;;  %v681_v54 = vadd.f32 1.0, %v673_v12  ;;  %v582_v40 = vmul.f32 1.442695, %v568_v45 }
  0x72   : > { %9577 = vst [vmem:[#allocation11_spill] sm:$0xff] %v7533_v7  ;;  %v814_v38 = vsub.f32 1.0, %v806_v16  ;;  %v862_v41 = vmul.f32 %v7345_v25, %v7533_v7  ;;  %v898_v48 = vsel %vm842_vm6, %v7533_v7, 0  ;;  %v519_v21 = vmul.f32 %v7509_v2, %v511_v34  ;;  %v7556_v17 = vpop.eup %6717 }
  0x73   : > { %v7548_v47 = vand.u32 4294901760, %v898_v48  ;;  %v727_v62 = vadd.f32 1.4214138, %v719_v58  ;;  %v496_v34 = vadd.f32 -1.4531521, %v488_v42  ;;  %6725 = vrcp.f32 %v681_v54  ;;  %v6720_v46 = vpop.eup %6719 }
  0x74   : > { %v822_v28 = vmul.f32 %v814_v38, %v654_v6  ;;  %870 = vst.msk [vmem:[#allocation6 + $0x20] sm:$0xff] %vm842_vm6, %v862_v41  ;;  %v527_v15 = vadd.f32 -0.28449672, %v519_v21  ;;  %v704_v33 = vmul.f32 1.0614054, %v7556_v17  ;;  %v561_v57 = vsub.f32 0.0, %v449_v27 }
  0x75   : > { %v7554_v16 = vsub.f32 %v898_v48, %v7548_v47  ;;  %v735_v13 = vmul.f32 %v7524_v32, %v727_v62  ;;  %v6722_v12 = vpop.eup %6721  ;;  %v504_v45 = vmul.f32 %v7546_v56, %v496_v34  ;;  %v798_v58 = vmul.f32 1.442695, %v784_v53 }
  0x76   : > { %v830_v14 = vadd.f32 1.0, %v822_v28  ;;  %v535_v6 = vmul.f32 %v7509_v2, %v527_v15  ;;  %6727 = vpow2.f32 %v582_v40  ;;  %v712_v62 = vadd.f32 -1.4531521, %v704_v33 }
  0x77   : > { %v1020_v38 = vand.u32 4294901760, %v7554_v16  ;;  %v743_v41 = vadd.f32 -0.28449672, %v735_v13  ;;  %v512_v54 = vadd.f32 1.4214138, %v504_v45  ;;  %v569_v15 = vmul.f32 %v561_v57, %v449_v27 }
  0x78   : > { %v838_v48 = vmul.f32 %v830_v14, %v630_v39  ;;  %v543_v28 = vadd.f32 0.2548296, %v535_v6  ;;  %v777_v14 = vsub.f32 0.0, %v7531_v36  ;;  %v720_v53 = vmul.f32 %v7556_v17, %v712_v62 }
  0x79   : > { %v1021_v21 = vsub.f32 %v7554_v16, %v1020_v38  ;;  %v751_v42 = vmul.f32 %v7524_v32, %v743_v41  ;;  %v631_v34 = vmul.f32 0.5, %v7412_v55  ;;  %v520_v40 = vmul.f32 %v7546_v56, %v512_v54 }
  0x7a   : > { %847 = vst.msk [vmem:[#allocation7 + $0x20] sm:$0xff] %vm842_vm6, %v838_v48  ;;  %v551_v39 = vmul.f32 %v7509_v2, %v543_v28  ;;  %6729 = vpow2.f32 %v798_v58  ;;  %v728_v41 = vadd.f32 1.4214138, %v720_v53  ;;  %v785_v55 = vmul.f32 %v777_v14, %v7531_v36 }
  0x7b   : > { %v1022_v13 = vand.u32 4294901760, %v1021_v21  ;;  %v759_v6 = vadd.f32 0.2548296, %v751_v42  ;;  %v7574_v33 = vpop.eup %6723  ;;  %v528_v45 = vadd.f32 -0.28449672, %v520_v40  ;;  %v415_v57 = vmul.f32 0.5, %v7443_v31 }
  0x7c   : > { %v591_v48 = vmul.f32 %v6720_v46, %v551_v39  ;;  %v489_v27 = vmul.f32 1.0614054, %v7574_v33  ;;  %v736_v58 = vmul.f32 %v7556_v17, %v728_v41  ;;  %v584_v28 = vmul.f32 1.442695, %v569_v15 }
  0x7d   : > { %6285 = vmatprep.mubr.f32.mxu0 %v1022_v13  ;;  %v767_v2 = vmul.f32 %v7524_v32, %v759_v6  ;;  %v7583_v62 = vpop.eup %6725  ;;  %v655_v46 = vsel %vm647_vm12, 1.0, %v7074_v50  ;;  %v536_v60 = vmul.f32 %v7546_v56, %v528_v45  ;;  %v800_v53 = vmul.f32 1.442695, %v785_v55 }
  0x7e   : > { %v599_v21 = vsub.f32 1.0, %v591_v48  ;;  %v497_v54 = vadd.f32 -1.4531521, %v489_v27  ;;  %v744_v13 = vadd.f32 -0.28449672, %v736_v58  ;;  %6731 = vpow2.f32 %v584_v28 }
  0x7f   : > { %v807_v42 = vmul.f32 %v6722_v12, %v767_v2  ;;  %v705_v36 = vmul.f32 1.0614054, %v7583_v62  ;;  %v544_v31 = vadd.f32 0.2548296, %v536_v60  ;;  %v440_v45 = vsel %vm432_vm13, 1.0, %v7074_v50 }
  0x80   : > { %v607_v32 = vmul.f32 %v599_v21, %v439_v51  ;;  %v505_v39 = vmul.f32 %v7574_v33, %v497_v54  ;;  %v6728_v15 = vpop.eup %6727  ;;  %v752_v40 = vmul.f32 %v7556_v17, %v744_v13  ;;  %6733 = vpow2.f32 %v800_v53 }
  0x81   : > { %v815_v14 = vsub.f32 1.0, %v807_v42  ;;  %v713_v12 = vadd.f32 -1.4531521, %v705_v36  ;;  %v552_v41 = vmul.f32 %v7546_v56, %v544_v31  ;;  %v416_v36 = vmul.f32 0.5, %v7484_v24 }
  0x82   : > { %v615_v6 = vadd.f32 1.0, %v607_v32  ;;  %v513_v51 = vadd.f32 1.4214138, %v505_v39  ;;  %v760_v27 = vadd.f32 0.2548296, %v752_v40 }
  0x83   : > { %v823_v48 = vmul.f32 %v815_v14, %v655_v46  ;;  %v721_v55 = vmul.f32 %v7583_v62, %v713_v12  ;;  %v592_v42 = vmul.f32 %v6728_v15, %v552_v41  ;;  %v632_v41 = vmul.f32 0.5, %v7467_v5 }
  0x84   : > { %v7593_v2 = vmul.f32 %v615_v6, %v415_v57  ;;  %v6730_v21 = vpop.eup %6729  ;;  %v521_v28 = vmul.f32 %v7574_v33, %v513_v51  ;;  %v768_v46 = vmul.f32 %v7556_v17, %v760_v27  ;;  %v656_v17 = vsel %vm648_vm14, 1.0, %v7074_v50 }
  0x85   : > { %v831_v58 = vadd.f32 1.0, %v823_v48  ;;  %v729_v60 = vadd.f32 1.4214138, %v721_v55  ;;  %v600_v32 = vsub.f32 1.0, %v592_v42 }
  0x86   : > { %9578 = vst [vmem:[#allocation12_spill] sm:$0xff] %v7593_v2  ;;  %v863_v56 = vmul.f32 %v7345_v25, %v7593_v2  ;;  %v901_v57 = vsel %vm842_vm6, %v7593_v2, 0  ;;  %v529_v13 = vadd.f32 -0.28449672, %v521_v28  ;;  %v808_v14 = vmul.f32 %v6730_v21, %v768_v46 }
  0x87   : > { %v839_v61 = vmul.f32 %v831_v58, %v631_v34  ;;  %v7605_v54 = vand.u32 4294901760, %v901_v57  ;;  %v737_v31 = vmul.f32 %v7583_v62, %v729_v60  ;;  %v608_v53 = vmul.f32 %v600_v32, %v440_v45 }
  0x88   : > { %871 = vst.msk [vmem:[#allocation6 + $0x28] sm:$0xff] %vm842_vm6, %v863_v56  ;;  %v537_v34 = vmul.f32 %v7574_v33, %v529_v13  ;;  %v816_v15 = vsub.f32 1.0, %v808_v14  ;;  %v6732_v48 = vpop.eup %6731 }
  0x89   : > { %848 = vst.msk [vmem:[#allocation7 + $0x28] sm:$0xff] %vm842_vm6, %v839_v61  ;;  %v7612_v39 = vsub.f32 %v901_v57, %v7605_v54  ;;  %v745_v6 = vadd.f32 -0.28449672, %v737_v31  ;;  %v616_v24 = vadd.f32 1.0, %v608_v53  ;;  %v657_v31 = vsel %vm649_vm0, 1.0, %v7074_v50 }
  0x8a   : > { %v545_v12 = vadd.f32 0.2548296, %v537_v34  ;;  %v824_v51 = vmul.f32 %v816_v15, %v656_v17  ;;  %v6734_v42 = vpop.eup %6733  ;;  %v633_v15 = vmul.f32 0.5, %v7496_v52 }
  0x8b   : > { %v1030_v40 = vand.u32 4294901760, %v7612_v39  ;;  %v753_v27 = vmul.f32 %v7583_v62, %v745_v6  ;;  %v7624_v4 = vmul.f32 %v616_v24, %v416_v36  ;;  %v417_v36 = vmul.f32 0.5, %v7506_v18 }
  0x8c   : > { %v553_v55 = vmul.f32 %v7574_v33, %v545_v12  ;;  %v832_v21 = vadd.f32 1.0, %v824_v51 }
  0x8d   : > { %v1031_v45 = vsub.f32 %v7612_v39, %v1030_v40  ;;  %9579 = vst [vmem:[#allocation13_spill] sm:$0xff] %v7624_v4  ;;  %v761_v58 = vadd.f32 0.2548296, %v753_v27  ;;  %v864_v5 = vmul.f32 %v7345_v25, %v7624_v4  ;;  %v904_v56 = vsel %vm842_vm6, %v7624_v4, 0 }
  0x8e   : > { %v593_v57 = vmul.f32 %v6732_v48, %v553_v55  ;;  %v840_v46 = vmul.f32 %v832_v21, %v632_v41  ;;  %v7633_v60 = vand.u32 4294901760, %v904_v56  ;;  %v9582_v55 = vand.u32 4294901760, %v7162_v10 }
  0x8f   : > { %v1032_v28 = vand.u32 4294901760, %v1031_v45  ;;  %v769_v33 = vmul.f32 %v7583_v62, %v761_v58  ;;  %872 = vst.msk [vmem:[#allocation6 + $0x30] sm:$0xff] %vm842_vm6, %v864_v5  ;;  %v9583_v58 = vand.u32 4294901760, %v7378_v59  ;;  %v9585_v10 = vand.u32 4294901760, %v7208_v35 }
  0x90   : > { %v601_v61 = vsub.f32 1.0, %v593_v57  ;;  %849 = vst.msk [vmem:[#allocation7 + $0x30] sm:$0xff] %vm842_vm6, %v840_v46  ;;  %v7640_v32 = vsub.f32 %v904_v56, %v7633_v60  ;;  %v9587_v5 = vand.u32 4294901760, %v7431_v23  ;;  %v9588_v56 = vand.u32 4294901760, %v7461_v0 }
  0x91   : > { %6286 = vmatmul.mubr.f32.gmra.mrb[4].mxu0 %v1032_v28  ;;  %v809_v13 = vmul.f32 %v6734_v42, %v769_v33  ;;  %v9586_v28 = vand.u32 4294901760, %v7384_v49 }
  0x92   : > { %v609_v14 = vmul.f32 %v601_v61, %v441_v37  ;;  %v1040_v53 = vand.u32 4294901760, %v7640_v32 }
  0x93   : > { %v817_v62 = vsub.f32 1.0, %v809_v13 }
  0x94   : > { %v617_v17 = vadd.f32 1.0, %v609_v14  ;;  %v1041_v34 = vsub.f32 %v7640_v32, %v1040_v53 }
  0x95   : > { %v825_v6 = vmul.f32 %v817_v62, %v657_v31 }
  0x96   : > { %v7649_v24 = vmul.f32 %v617_v17, %v417_v36  ;;  %v1042_v12 = vand.u32 4294901760, %v1041_v34 }
  0x97   : > { %v833_v48 = vadd.f32 1.0, %v825_v6 }
  0x98   : > { %9580 = vst [vmem:[#allocation14_spill] sm:$0xff] %v7649_v24  ;;  %v865_v18 = vmul.f32 %v7345_v25, %v7649_v24  ;;  %v907_v19 = vsel %vm842_vm6, %v7649_v24, 0  ;;  %6288 = vmatprep.mubr.f32.mxu0 %v1042_v12  ;;  %v6495_v25 = vpack.c.bf16 %v7208_v35, %v7204_v29 }
  0x99   : > { %v841_v50 = vmul.f32 %v833_v48, %v633_v15  ;;  %v7655_v41 = vand.u32 4294901760, %v907_v19 }
  0x9a   : > { %873 = vst.msk [vmem:[#allocation6 + $0x38] sm:$0xff] %vm842_vm6, %v865_v18 }
  0x9b   : > { %850 = vst.msk [vmem:[#allocation7 + $0x38] sm:$0xff] %vm842_vm6, %v841_v50  ;;  %v1049_v52 = vsub.f32 %v907_v19, %v7655_v41 }
  0x9d   : > { %v1050_v51 = vand.u32 4294901760, %v1049_v52 }
  0x9f   : > { %v1051_v27 = vsub.f32 %v1049_v52, %v1050_v51 }
  0xa1   : > { %v1052_v45 = vand.u32 4294901760, %v1051_v27 }
  0xa3   : > { %6289 = vmatmul.mubr.f32.gmra.mrb[6].mxu0 %v1052_v45 }
  0xa4   : > { %6299 = vmatprep.mubr.f32.mxu0 %v7367_v3 }
  0xa7   : > { %6300 = vmatmul.mubr.f32.vlgmr.msra.gmra.mrb[0].mxu0 %v7375_v1 }
  0xa8   : > { %6494 = vmatpush3.bf16.msra.mxu0 %v7537_v44  ;;  %6302 = vmatprep.mubr.f32.mxu0 %v7420_v22  ;;  %v9581_v44 = vand.u32 4294901760, %v7160_v9  ;;  %v9584_v9 = vand.u32 4294901760, %v7204_v29 }
  0xa9   : > { %6496 = vmatprep.subr.bf16.mxu0 %v6495_v25 }
  0xaa   : > { %v6507_v21 = vpack.c.bf16 %v9582_v55, %v9581_v44  ;;  %v6511_v42 = vpack.c.bf16 %v9585_v10, %v9584_v9 }
  0xab   : > { %6303 = vmatmul.mubr.f32.gmra.mrb[2].mxu0 %v7451_v20 }
  0xac   : > { %6305 = vmatprep.mubr.f32.mxu0 %v7548_v47  ;;  %6498 = vmatpush3.bf16.msra.mxu0 %v6495_v25 }
  0xad   : > { %6500 = vmatprep.subr.bf16.mxu0 %v7158_v8 }
  0xaf   : > { %6306 = vmatmul.mubr.f32.gmra.mrb[4].mxu0 %v7605_v54 }
  0xb0   : > { %6308 = vmatprep.mubr.f32.mxu0 %v7633_v60 }
  0xb3   : > { %6309 = vmatmul.mubr.f32.gmra.mrb[6].mxu0 %v7655_v41 }
  0xb4   : > { %6319 = vmatprep.mubr.f32.mxu0 %v7378_v59 }
  0xb7   : > { %6320 = vmatmul.mubr.f32.vlgmr.msra.gmra.mrb[0].mxu0 %v7384_v49  ;;  %v2596_v49 = vlaneseq }
  0xb8   : > { %6502 = vmatpush3.bf16.msra.mxu0 %v7158_v8  ;;  %6322 = vmatprep.mubr.f32.mxu0 %v7431_v23  ;;  %v6066_v23 = vld [vmem:[%s9538_s4] ss:$0 sm:$0xff] }
  0xb9   : > { %6504 = vmatprep.subr.bf16.mxu0 %v7164_v11 }
  0xbb   : > { %6323 = vmatmul.mubr.f32.gmra.mrb[2].mxu0 %v7461_v0 }
  0xbc   : > { %6325 = vmatprep.mubr.f32.mxu0 %v7554_v16  ;;  %6506 = vmatpush3.bf16.msra.mxu0 %v7164_v11 }
  0xbd   : > { %6508 = vmatprep.subr.bf16.mxu0 %v6507_v21 }
  0xbf   : > { %6326 = vmatmul.mubr.f32.gmra.mrb[4].mxu0 %v7612_v39 }
  0xc0   : > { %6328 = vmatprep.mubr.f32.mxu0 %v7640_v32 }
  0xc3   : > { %6329 = vmatmul.mubr.f32.gmra.mrb[6].mxu0 %v1049_v52 }
  0xc4   : > { %6339 = vmatprep.mubr.f32.mxu0 %v9583_v58 }
  0xc7   : > { %6340 = vmatmul.mubr.f32.vlgmr.msra.gmra.mrb[0].mxu0 %v9586_v28 }
  0xc8   : > { %6510 = vmatpush3.bf16.msra.mxu0 %v6507_v21  ;;  %6342 = vmatprep.mubr.f32.mxu0 %v9587_v5 }
  0xc9   : > { %6512 = vmatprep.subr.bf16.mxu0 %v6511_v42 }
  0xcb   : > { %6343 = vmatmul.mubr.f32.gmra.mrb[2].mxu0 %v9588_v56 }
  0xcc   : > { %6345 = vmatprep.mubr.f32.mxu0 %v1020_v38  ;;  %6514 = vmatpush3.bf16.msra.mxu0 %v6511_v42 }
  0xcd   : > { %6516 = vmatprep.subr.bf16.mxu0 %v7158_v8 }
  0xcf   : > { %6346 = vmatmul.mubr.f32.gmra.mrb[4].mxu0 %v1030_v40 }
  0xd0   : > { %6348 = vmatprep.mubr.f32.mxu0 %v1040_v53 }
  0xd3   : > { %6349 = vmatmul.mubr.f32.gmra.mrb[6].mxu0 %v1050_v51 }
  0xd4   : > { %6359 = vmatprep.mubr.f32.mxu0 %v7367_v3 }
  0xd7   : > { %6360 = vmatmul.mubr.f32.vlgmr.msra.gmra.mrb[0].mxu0 %v7375_v1 }
  0xd8   : > { %6518 = vmatpush3.bf16.msra.mxu0 %v7158_v8  ;;  %6362 = vmatprep.mubr.f32.mxu0 %v7420_v22  ;;  %v1736_v8 = vld [vmem:[%s9539_s5] sm:$0x3] }
  0xd9   : > { %6520 = vmatprep.subr.bf16.mxu0 %v7164_v11 }
  0xdb   : > { %6363 = vmatmul.mubr.f32.gmra.mrb[2].mxu0 %v7451_v20 }
  0xdc   : > { %6365 = vmatprep.mubr.f32.mxu0 %v7548_v47  ;;  %6522 = vmatpush3.bf16.msra.mxu0 %v7164_v11  ;;  %v1763_v11 = vsel %vm1761_vm1, %v1736_v8, 0 }
  0xdd   : > { %v7725_v29 = vand.u32 4294901760, %v1763_v11 }
  0xdf   : > { %6366 = vmatmul.mubr.f32.gmra.mrb[4].mxu0 %v7605_v54  ;;  %6391 = vmatprep.subr.mxu1 %v7725_v29  ;;  %v7730_v35 = vsub.f32 %v1763_v11, %v7725_v29 }
  0xe0   : > { %6368 = vmatprep.mubr.f32.mxu0 %v7633_v60  ;;  %6392 = vmatpush3.msra.mxu1 %v7725_v29 }
  0xe3   : > { %6369 = vmatmul.mubr.f32.gmra.mrb[6].mxu0 %v7655_v41 }
  0xe4   : > { %6379 = vmatprep.mubr.f32.mxu0 %v7367_v3  ;;  %v7733_v3 = vand.u32 4294901760, %v7730_v35 }
  0xe7   : > { %6380 = vmatmul.mubr.f32.vlgmr.msra.gmra.mrb[0].mxu0 %v7375_v1  ;;  %v1915_v1 = vsub.f32 %v7730_v35, %v7733_v3 }
  0xe8   : > { %6382 = vmatprep.mubr.f32.mxu0 %v7420_v22  ;;  %v7740_v22 = vshrl.u32 %v2596_v49, 7 }
  0xe9   : > { %v7737_v59 = vand.u32 4294901760, %v1915_v1 }
  0xea   : > { %9589 = vst [vmem:[#allocation15_spill] sm:$0xff] %v7740_v22  ;;  %v7757_v39 = vsub.s32 1, %v7740_v22  ;;  %v7772_v13 = vsub.s32 2, %v7740_v22  ;;  %v7785_v53 = vsub.s32 3, %v7740_v22  ;;  %v7795_v12 = vsub.s32 4, %v7740_v22 }
  0xeb   : > { %6383 = vmatmul.mubr.f32.gmra.mrb[2].mxu0 %v7451_v20  ;;  %6405 = vmatprep.subr.mxu1 %v7737_v59  ;;  %v7746_v20 = vsub.s32 0, %v7740_v22  ;;  %v7814_v45 = vsub.s32 6, %v7740_v22 }
  0xec   : > { %6385 = vmatprep.mubr.f32.mxu0 %v7548_v47  ;;  %9590 = vst [vmem:[#allocation16_spill] sm:$0xff] %v7757_v39  ;;  %9591 = vst [vmem:[#allocation17_spill] sm:$0xff] %v7772_v13 }
  0xed   : > { %9592 = vst [vmem:[#allocation18_spill] sm:$0xff] %v7785_v53  ;;  %9593 = vst [vmem:[#allocation19_spill] sm:$0xff] %v7795_v12 }
  0xee   : > { %9595 = vst [vmem:[#allocation21_spill] sm:$0xff] %v7814_v45 }
  0xef   : > { %6386 = vmatmul.mubr.f32.gmra.mrb[4].mxu0 %v7605_v54 }
  0xf0   : > { %6388 = vmatprep.mubr.f32.mxu0 %v7633_v60 }
  0xf3   : > { %6389 = vmatmul.mubr.f32.gmra.mrb[6].mxu0 %v7655_v41  ;;  %v7803_v41 = vsub.s32 5, %v7740_v22 }
  0xf5   : > { %9594 = vst [vmem:[#allocation20_spill] sm:$0xff] %v7803_v41 }
 0x1ba   : > { %v6381_v0 = vpop.f32.mrb[0].mxu0 }
 0x1bb   : > { %v7748_v47 = vadd.f32 %v6381_v0, %v6066_v23  ;;  %v1649_v16 = vpop.f32.mrb[1].mxu0 }
 0x1bc   : > { %v7750_v38 = vadd.f32 %v6066_v23, %v1649_v16 }
 0x1bd   : > { %1705 = vrot.lane.b32.xlu0 %v7748_v47, %s7075_s20  ;;  %v3917_v54 = vrot.slane %v7748_v47, %v7746_v20  ;;  %v1747_v40 = vsel %vm1744_vm2, %v7748_v47, 0  ;;  %v3929_v14 = vrot.slane %v7748_v47, %v7757_v39  ;;  %v3941_v25 = vrot.slane %v7748_v47, %v7772_v13 }
 0x1be   : > { %v6384_v57 = vpop.f32.mrb[2].mxu0  ;;  %v1745_v46 = vsel %vm1744_vm2, %v7750_v38, 0  ;;  %v7763_v60 = vand.u32 4294901760, %v1747_v40  ;;  %v3953_v9 = vrot.slane %v7748_v47, %v7785_v53 }
 0x1bf   : > { %v7765_v37 = vadd.f32 %v6384_v57, %v6066_v23  ;;  %3924 = vbcast.lane.b32.xlu1 %v3917_v54, 266  ;;  %v1661_v33 = vpop.f32.mrb[3].mxu0  ;;  %v7767_v61 = vand.u32 4294901760, %v1745_v46  ;;  %v3965_v57 = vrot.slane %v7748_v47, %v7795_v12 }
 0x1c0   : > { %v7769_v32 = vadd.f32 %v6066_v23, %v1661_v33  ;;  %v7775_v36 = vsub.f32 %v1747_v40, %v7763_v60 }
 0x1c1   : > { %1703 = vrot.lane.b32.xlu0 %v7750_v38, %s7075_s20  ;;  %v7782_v31 = vsub.f32 %v1745_v46, %v7767_v61  ;;  %v1751_v62 = vsel %vm1744_vm2, %v7765_v37, 0 }
 0x1c2   : > { %v6387_v17 = vpop.f32.mrb[4].mxu0  ;;  %v9556_v34 = vand.u32 4294901760, %v7775_v36  ;;  %v1749_v15 = vsel %vm1744_vm2, %v7769_v32, 0  ;;  %v7792_v6 = vand.u32 4294901760, %v1751_v62 }
 0x1c3   : > { %v7797_v48 = vadd.f32 %v6387_v17, %v6066_v23  ;;  %3936 = vbcast.lane.b32.xlu1 %v3929_v14, 266  ;;  %v1673_v18 = vpop.f32.mrb[5].mxu0  ;;  %v1833_v19 = vand.u32 4294901760, %v7782_v31  ;;  %v7800_v50 = vand.u32 4294901760, %v1749_v15 }
 0x1c4   : > { %v7805_v52 = vadd.f32 %v6066_v23, %v1673_v18  ;;  %v1844_v51 = vsub.f32 %v7775_v36, %v9556_v34  ;;  %v7811_v27 = vsub.f32 %v1751_v62, %v7792_v6 }
 0x1c5   : > { %3920 = vbcast.lane.b32.xlu0 %v3917_v54, 258  ;;  %v1834_v44 = vsub.f32 %v7782_v31, %v1833_v19  ;;  %v7822_v55 = vsub.f32 %v1749_v15, %v7800_v50  ;;  %v1755_v21 = vsel %vm1744_vm2, %v7797_v48, 0 }
 0x1c6   : > { %v6390_v58 = vpop.f32.mrb[6].mxu0  ;;  %v9554_v10 = vand.u32 4294901760, %v7811_v27  ;;  %v1753_v42 = vsel %vm1744_vm2, %v7805_v52, 0  ;;  %v7831_v28 = vand.u32 4294901760, %v1755_v21  ;;  %v1845_v0 = vand.u32 4294901760, %v1844_v51 }
 0x1c7   : > { %v7833_v5 = vadd.f32 %v6390_v58, %v6066_v23  ;;  %3948 = vbcast.lane.b32.xlu1 %v3941_v25, 266  ;;  %v1685_v56 = vpop.f32.mrb[7].mxu0  ;;  %v1835_v8 = vand.u32 4294901760, %v1834_v44  ;;  %v9555_v11 = vand.u32 4294901760, %v7822_v55  ;;  %v7836_v1 = vand.u32 4294901760, %v1753_v42 }
 0x1c8   : > { %v7838_v49 = vadd.f32 %v6066_v23, %v1685_v56  ;;  %v1864_v16 = vsub.f32 %v7811_v27, %v9554_v10  ;;  %v7844_v54 = vsub.f32 %v1755_v21, %v7831_v28  ;;  %v7867_v44 = vrot.slane %v7765_v37, %v7757_v39 }
 0x1c9   : > { %3932 = vbcast.lane.b32.xlu0 %v3929_v14, 258  ;;  %6393 = vmatprep.mubr.f32.mxu1 %v1835_v8  ;;  %v1854_v40 = vsub.f32 %v7822_v55, %v9555_v11  ;;  %v7852_v23 = vsub.f32 %v1753_v42, %v7836_v1  ;;  %v1759_v46 = vsel %vm1744_vm2, %v7833_v5, 0  ;;  %v7882_v42 = vrot.slane %v7765_v37, %v7785_v53 }
 0x1ca   : > { %6394 = vmatmul.mubr.f32.vlgmr.msra.gmra.mrb[0].mxu1 %v1845_v0  ;;  %v1865_v33 = vand.u32 4294901760, %v1864_v16  ;;  %v9552_v62 = vand.u32 4294901760, %v7844_v54  ;;  %v1757_v14 = vsel %vm1744_vm2, %v7838_v49, 0  ;;  %v7859_v17 = vand.u32 4294901760, %v1759_v46 }
 0x1cb   : > { %3960 = vbcast.lane.b32.xlu1 %v3953_v9, 266  ;;  %v1855_v15 = vand.u32 4294901760, %v1854_v40  ;;  %6406 = vmatpush3.msra.mxu1 %v7737_v59  ;;  %v9553_v18 = vand.u32 4294901760, %v7852_v23  ;;  %v7863_v51 = vand.u32 4294901760, %v1757_v14  ;;  %v7878_v59 = vrot.slane %v7765_v37, %v7772_v13 }
 0x1cc   : > { %v1884_v21 = vsub.f32 %v7844_v54, %v9552_v62  ;;  %v7873_v58 = vsub.f32 %v1759_v46, %v7859_v17  ;;  %6419 = vmatprep.subr.mxu1 %v7730_v35  ;;  %v7891_v0 = vsub.s32 7, %v7740_v22  ;;  %v7895_v16 = vrot.slane %v7765_v37, %v7795_v12 }
 0x1cd   : > { %3944 = vbcast.lane.b32.xlu0 %v3941_v25, 258  ;;  %6396 = vmatprep.mubr.f32.mxu1 %v1855_v15  ;;  %v1874_v56 = vsub.f32 %v7852_v23, %v9553_v18  ;;  %v7888_v8 = vsub.f32 %v1757_v14, %v7863_v51  ;;  %v7900_v25 = vrot.slane %v7765_v37, %v7803_v41 }
 0x1ce   : > { %9596 = vst [vmem:[#allocation22_spill] sm:$0xff] %v7891_v0  ;;  %6397 = vmatmul.mubr.f32.gmra.mrb[2].mxu1 %v1865_v33  ;;  %v1903_v40 = vand.u32 4294901760, %v7873_v58  ;;  %v7904_v46 = vrot.slane %v7765_v37, %v7814_v45  ;;  %v7909_v62 = vrot.slane %v7765_v37, %v7891_v0  ;;  %v1885_v18 = vand.u32 4294901760, %v1884_v21 }
 0x1cf   : > { %3972 = vbcast.lane.b32.xlu1 %v3965_v57, 266  ;;  %v1875_v14 = vand.u32 4294901760, %v1874_v56  ;;  %v1893_v15 = vand.u32 4294901760, %v7888_v8  ;;  %v3977_v10 = vrot.slane %v7748_v47, %v7803_v41  ;;  %v3989_v21 = vrot.slane %v7748_v47, %v7814_v45 }
 0x1d0   : > { %v1904_v33 = vsub.f32 %v7873_v58, %v1903_v40  ;;  %v4493_v4 = vrot.slane %v7833_v5, %v7746_v20  ;;  %v4505_v24 = vrot.slane %v7833_v5, %v7757_v39 }
 0x1d1   : > { %3956 = vbcast.lane.b32.xlu0 %v3953_v9, 258  ;;  %6399 = vmatprep.mubr.f32.mxu1 %v1875_v14  ;;  %v1894_v56 = vsub.f32 %v7888_v8, %v1893_v15  ;;  %v4001_v9 = vrot.slane %v7748_v47, %v7891_v0  ;;  %v3833_v47 = vrot.slane %v7750_v38, %v7757_v39 }
 0x1d2   : > { %6400 = vmatmul.mubr.f32.gmra.mrb[4].mxu1 %v1885_v18  ;;  %v1905_v34 = vand.u32 4294901760, %v1904_v33  ;;  %v3893_v18 = vrot.slane %v7750_v38, %v7814_v45  ;;  %v3905_v14 = vrot.slane %v7750_v38, %v7891_v0  ;;  %v9597_v33 = vand.u32 4294901760, %v7775_v36 }
 0x1d3   : > { %3984 = vbcast.lane.b32.xlu1 %v3977_v10, 266  ;;  %v1895_v11 = vand.u32 4294901760, %v1894_v56  ;;  %v9598_v56 = vand.u32 4294901760, %v7822_v55 }
 0x1d5   : > { %3968 = vbcast.lane.b32.xlu0 %v3965_v57, 258  ;;  %6402 = vmatprep.mubr.f32.mxu1 %v1895_v11  ;;  %v3821_v11 = vrot.slane %v7750_v38, %v7746_v20  ;;  %v3881_v57 = vrot.slane %v7750_v38, %v7803_v41 }
 0x1d6   : > { %6403 = vmatmul.mubr.f32.gmra.mrb[6].mxu1 %v1905_v34  ;;  %v3857_v34 = vrot.slane %v7750_v38, %v7785_v53 }
 0x1d7   : > { %3996 = vbcast.lane.b32.xlu1 %v3989_v21, 266  ;;  %6407 = vmatprep.mubr.f32.mxu1 %v7767_v61 }
 0x1d9   : > { %3980 = vbcast.lane.b32.xlu0 %v3977_v10, 258  ;;  %v3869_v10 = vrot.slane %v7750_v38, %v7795_v12 }
 0x1da   : > { %6408 = vmatmul.mubr.f32.vlgmr.msra.gmra.mrb[0].mxu1 %v7763_v60 }
 0x1db   : > { %4008 = vbcast.lane.b32.xlu1 %v4001_v9, 266  ;;  %6410 = vmatprep.mubr.f32.mxu1 %v7800_v50 }
 0x1dc   : > { %6420 = vmatpush3.msra.mxu1 %v7730_v35  ;;  %v3845_v35 = vrot.slane %v7750_v38, %v7772_v13  ;;  %v9600_v38 = vand.u32 4294901760, %v7852_v23 }
 0x1dd   : > { %3992 = vbcast.lane.b32.xlu0 %v3989_v21, 258  ;;  %6433 = vmatprep.subr.mxu1 %v7725_v29  ;;  %v9599_v21 = vand.u32 4294901760, %v7811_v27 }
 0x1de   : > { %6411 = vmatmul.mubr.f32.gmra.mrb[2].mxu1 %v7792_v6 }
 0x1df   : > { %3828 = vbcast.lane.b32.xlu1 %v3821_v11, 266  ;;  %6413 = vmatprep.mubr.f32.mxu1 %v7836_v1 }
 0x1e1   : > { %4004 = vbcast.lane.b32.xlu0 %v4001_v9, 258 }
 0x1e2   : > { %6414 = vmatmul.mubr.f32.gmra.mrb[4].mxu1 %v7831_v28 }
 0x1e3   : > { %3840 = vbcast.lane.b32.xlu1 %v3833_v47, 266  ;;  %6416 = vmatprep.mubr.f32.mxu1 %v7863_v51 }
 0x1e5   : > { %3824 = vbcast.lane.b32.xlu0 %v3821_v11, 258 }
 0x1e6   : > { %6417 = vmatmul.mubr.f32.gmra.mrb[6].mxu1 %v7859_v17 }
 0x1e7   : > { %3852 = vbcast.lane.b32.xlu1 %v3845_v35, 266  ;;  %6421 = vmatprep.mubr.f32.mxu1 %v7782_v31  ;;  %v4049_v31 = vrot.slane %v7769_v32, %v7785_v53 }
 0x1e9   : > { %3836 = vbcast.lane.b32.xlu0 %v3833_v47, 258  ;;  %v4337_v47 = vrot.slane %v7797_v48, %v7785_v53 }
 0x1ea   : > { %6422 = vmatmul.mubr.f32.vlgmr.msra.gmra.mrb[0].mxu1 %v7775_v36  ;;  %v9601_v36 = vand.u32 4294901760, %v7844_v54 }
 0x1eb   : > { %3864 = vbcast.lane.b32.xlu1 %v3857_v34, 266  ;;  %6424 = vmatprep.mubr.f32.mxu1 %v7822_v55 }
 0x1ec   : > { %6434 = vmatpush3.msra.mxu1 %v7725_v29 }
 0x1ed   : > { %3848 = vbcast.lane.b32.xlu0 %v3845_v35, 258  ;;  %6447 = vmatprep.subr.mxu1 %v7733_v3 }
 0x1ee   : > { %6425 = vmatmul.mubr.f32.gmra.mrb[2].mxu1 %v7811_v27 }
 0x1ef   : > { %3876 = vbcast.lane.b32.xlu1 %v3869_v10, 266  ;;  %6427 = vmatprep.mubr.f32.mxu1 %v7852_v23  ;;  %v4085_v23 = vrot.slane %v7769_v32, %v7814_v45 }
 0x1f1   : > { %3860 = vbcast.lane.b32.xlu0 %v3857_v34, 258 }
 0x1f2   : > { %6428 = vmatmul.mubr.f32.gmra.mrb[4].mxu1 %v7844_v54 }
 0x1f3   : > { %3888 = vbcast.lane.b32.xlu1 %v3881_v57, 266  ;;  %6430 = vmatprep.mubr.f32.mxu1 %v7888_v8  ;;  %v4301_v8 = vrot.slane %v7797_v48, %v7746_v20 }
 0x1f5   : > { %3872 = vbcast.lane.b32.xlu0 %v3869_v10, 258  ;;  %v4349_v10 = vrot.slane %v7797_v48, %v7795_v12 }
 0x1f6   : > { %6431 = vmatmul.mubr.f32.gmra.mrb[6].mxu1 %v7873_v58 }
 0x1f7   : > { %3900 = vbcast.lane.b32.xlu1 %v3893_v18, 266  ;;  %6435 = vmatprep.mubr.f32.mxu1 %v1833_v19 }
 0x1f9   : > { %3884 = vbcast.lane.b32.xlu0 %v3881_v57, 258 }
 0x1fa   : > { %6436 = vmatmul.mubr.f32.vlgmr.msra.gmra.mrb[0].mxu1 %v9597_v33 }
 0x1fb   : > { %3912 = vbcast.lane.b32.xlu1 %v3905_v14, 266  ;;  %6438 = vmatprep.mubr.f32.mxu1 %v9598_v56 }
 0x1fc   : > { %6448 = vmatpush3.msra.mxu1 %v7733_v3  ;;  %v4109_v3 = vrot.slane %v7765_v37, %v7746_v20 }
 0x1fd   : > { %3896 = vbcast.lane.b32.xlu0 %v3893_v18, 258  ;;  %6461 = vmatprep.subr.mxu1 %v7725_v29 }
 0x1fe   : > { %6439 = vmatmul.mubr.f32.gmra.mrb[2].mxu1 %v9599_v21  ;;  %v4373_v21 = vrot.slane %v7797_v48, %v7814_v45 }
 0x1ff   : > { %1709 = vrot.lane.b32.xlu1 %v7765_v37, %s7075_s20  ;;  %6441 = vmatprep.mubr.f32.mxu1 %v9600_v38  ;;  %v4037_v37 = vrot.slane %v7769_v32, %v7772_v13 }
 0x201   : > { %3908 = vbcast.lane.b32.xlu0 %v3905_v14, 258  ;;  %v4361_v14 = vrot.slane %v7797_v48, %v7803_v41 }
 0x202   : > { %6442 = vmatmul.mubr.f32.gmra.mrb[4].mxu1 %v9601_v36 }
 0x203   : > { %1707 = vrot.lane.b32.xlu1 %v7769_v32, %s7075_s20  ;;  %6444 = vmatprep.mubr.f32.mxu1 %v1893_v15  ;;  %v4325_v15 = vrot.slane %v7797_v48, %v7772_v13 }
 0x205   : > { %4112 = vbcast.lane.b32.xlu0 %v4109_v3, 258 }
 0x206   : > { %6445 = vmatmul.mubr.f32.gmra.mrb[6].mxu1 %v1903_v40  ;;  %v4313_v40 = vrot.slane %v7797_v48, %v7757_v39 }
 0x207   : > { %4116 = vbcast.lane.b32.xlu1 %v4109_v3, 266  ;;  %6449 = vmatprep.mubr.f32.mxu1 %v7767_v61  ;;  %v4385_v3 = vrot.slane %v7797_v48, %v7891_v0 }
 0x209   : > { %4124 = vbcast.lane.b32.xlu0 %v7867_v44, 258 }
 0x20a   : > { %6450 = vmatmul.mubr.f32.vlgmr.msra.gmra.mrb[0].mxu1 %v7763_v60 }
 0x20b   : > { %4128 = vbcast.lane.b32.xlu1 %v7867_v44, 266  ;;  %6452 = vmatprep.mubr.f32.mxu1 %v7800_v50 }
 0x20c   : > { %6462 = vmatpush3.msra.mxu1 %v7725_v29  ;;  %v4013_v29 = vrot.slane %v7769_v32, %v7746_v20 }
 0x20d   : > { %4136 = vbcast.lane.b32.xlu0 %v7878_v59, 258 }
 0x20e   : > { %6453 = vmatmul.mubr.f32.gmra.mrb[2].mxu1 %v7792_v6 }
 0x20f   : > { %4140 = vbcast.lane.b32.xlu1 %v7878_v59, 266  ;;  %6455 = vmatprep.mubr.f32.mxu1 %v7836_v1 }
 0x211   : > { %4148 = vbcast.lane.b32.xlu0 %v7882_v42, 258 }
 0x212   : > { %6456 = vmatmul.mubr.f32.gmra.mrb[4].mxu1 %v7831_v28 }
 0x213   : > { %4152 = vbcast.lane.b32.xlu1 %v7882_v42, 266  ;;  %6458 = vmatprep.mubr.f32.mxu1 %v7863_v51 }
 0x215   : > { %4160 = vbcast.lane.b32.xlu0 %v7895_v16, 258 }
 0x216   : > { %6459 = vmatmul.mubr.f32.gmra.mrb[6].mxu1 %v7859_v17 }
 0x217   : > { %4164 = vbcast.lane.b32.xlu1 %v7895_v16, 266  ;;  %6463 = vmatprep.mubr.f32.mxu1 %v7767_v61 }
 0x219   : > { %4172 = vbcast.lane.b32.xlu0 %v7900_v25, 258 }
 0x21a   : > { %6464 = vmatmul.mubr.f32.vlgmr.msra.gmra.mrb[0].mxu1 %v7763_v60  ;;  %v4025_v60 = vrot.slane %v7769_v32, %v7757_v39 }
 0x21b   : > { %4176 = vbcast.lane.b32.xlu1 %v7900_v25, 266  ;;  %6466 = vmatprep.mubr.f32.mxu1 %v7800_v50  ;;  %v4061_v50 = vrot.slane %v7769_v32, %v7795_v12 }
 0x21d   : > { %4184 = vbcast.lane.b32.xlu0 %v7904_v46, 258 }
 0x21e   : > { %6467 = vmatmul.mubr.f32.gmra.mrb[2].mxu1 %v7792_v6 }
 0x21f   : > { %4188 = vbcast.lane.b32.xlu1 %v7904_v46, 266  ;;  %6469 = vmatprep.mubr.f32.mxu1 %v7836_v1 }
 0x221   : > { %4196 = vbcast.lane.b32.xlu0 %v7909_v62, 258 }
 0x222   : > { %6470 = vmatmul.mubr.f32.gmra.mrb[4].mxu1 %v7831_v28  ;;  %v4073_v28 = vrot.slane %v7769_v32, %v7803_v41 }
 0x223   : > { %4200 = vbcast.lane.b32.xlu1 %v7909_v62, 266  ;;  %6472 = vmatprep.mubr.f32.mxu1 %v7863_v51  ;;  %v4097_v51 = vrot.slane %v7769_v32, %v7891_v0 }
 0x225   : > { %4016 = vbcast.lane.b32.xlu0 %v4013_v29, 258 }
 0x226   : > { %6473 = vmatmul.mubr.f32.gmra.mrb[6].mxu1 %v7859_v17 }
 0x227   : > { %4020 = vbcast.lane.b32.xlu1 %v4013_v29, 266 }
 0x229   : > { %4028 = vbcast.lane.b32.xlu0 %v4025_v60, 258 }
 0x22b   : > { %4032 = vbcast.lane.b32.xlu1 %v4025_v60, 266 }
 0x22d   : > { %4040 = vbcast.lane.b32.xlu0 %v4037_v37, 258 }
 0x22f   : > { %v1706_v61 = vpop.permute.xlu0 %1705  ;;  %4044 = vbcast.lane.b32.xlu1 %v4037_v37, 266  ;;  %v4205_v37 = vrot.slane %v7805_v52, %v7746_v20 }
 0x230   : > { %1729 = vst.msk [vmem:[#allocation5 + $0x8] sm:$0xff] %vm1727_vm3, %v1706_v61 }
 0x231   : > { %v8023_v6 = vpop.permute.xlu1 %3924  ;;  %4052 = vbcast.lane.b32.xlu0 %v4049_v31, 258 }
 0x233   : > { %v1704_v19 = vpop.permute.xlu0 %1703  ;;  %4056 = vbcast.lane.b32.xlu1 %v4049_v31, 266 }
 0x234   : > { %1728 = vst.msk [vmem:[#allocation5] sm:$0xff] %vm1727_vm3, %v1704_v19  ;;  %v4217_v19 = vrot.slane %v7805_v52, %v7757_v39 }
 0x235   : > { %v8028_v27 = vpop.permute.xlu1 %3936  ;;  %4064 = vbcast.lane.b32.xlu0 %v4061_v50, 258 }
 0x237   : > { %v8030_v55 = vpop.permute.xlu0 %3920  ;;  %4068 = vbcast.lane.b32.xlu1 %v4061_v50, 266 }
 0x239   : > { %v8034_v1 = vpop.permute.xlu1 %3948  ;;  %4076 = vbcast.lane.b32.xlu0 %v4073_v28, 258 }
 0x23b   : > { %v8036_v54 = vpop.permute.xlu0 %3932  ;;  %4080 = vbcast.lane.b32.xlu1 %v4073_v28, 266  ;;  %v4229_v28 = vrot.slane %v7805_v52, %v7772_v13 }
 0x23d   : > { %v8040_v62 = vpop.permute.xlu1 %3960  ;;  %4088 = vbcast.lane.b32.xlu0 %v4085_v23, 258 }
 0x23f   : > { %v8042_v17 = vpop.permute.xlu0 %3944  ;;  %4092 = vbcast.lane.b32.xlu1 %v4085_v23, 266 }
 0x241   : > { %v8046_v44 = vpop.permute.xlu1 %3972  ;;  %4100 = vbcast.lane.b32.xlu0 %v4097_v51, 258 }
 0x243   : > { %v8048_v58 = vpop.permute.xlu0 %3956  ;;  %4104 = vbcast.lane.b32.xlu1 %v4097_v51, 266 }
 0x245   : > { %v8050_v59 = vpop.permute.xlu1 %3984  ;;  %1711 = vrot.lane.b32.xlu0 %v7805_v52, %s7075_s20 }
 0x247   : > { %v8054_v42 = vpop.permute.xlu0 %3968  ;;  %1713 = vrot.lane.b32.xlu1 %v7797_v48, %s7075_s20 }
 0x249   : > { %v8060_v32 = vpop.permute.xlu1 %3996  ;;  %4304 = vbcast.lane.b32.xlu0 %v4301_v8, 258 }
 0x24b   : > { %v8062_v16 = vpop.permute.xlu0 %3980  ;;  %4308 = vbcast.lane.b32.xlu1 %v4301_v8, 266  ;;  %v4241_v8 = vrot.slane %v7805_v52, %v7785_v53 }
 0x24d   : > { %v8066_v25 = vpop.permute.xlu1 %4008  ;;  %4316 = vbcast.lane.b32.xlu0 %v4313_v40, 258 }
 0x24f   : > { %v8068_v46 = vpop.permute.xlu0 %3992  ;;  %4320 = vbcast.lane.b32.xlu1 %v4313_v40, 266 }
 0x251   : > { %v8072_v9 = vpop.permute.xlu1 %3828  ;;  %4328 = vbcast.lane.b32.xlu0 %v4325_v15, 258 }
 0x253   : > { %v8074_v11 = vpop.permute.xlu0 %4004  ;;  %4332 = vbcast.lane.b32.xlu1 %v4325_v15, 266 }
 0x255   : > { %v8078_v35 = vpop.permute.xlu1 %3840  ;;  %4340 = vbcast.lane.b32.xlu0 %v4337_v47, 258 }
 0x256   : > { %9602 = vst [vmem:[#allocation23_spill] sm:$0xff] %v8078_v35 }
 0x257   : > { %4344 = vbcast.lane.b32.xlu1 %v4337_v47, 266  ;;  %v8080_v34 = vpop.permute.xlu0 %3824  ;;  %v4253_v47 = vrot.slane %v7805_v52, %v7795_v12 }
 0x259   : > { %v8084_v57 = vpop.permute.xlu1 %3852  ;;  %4352 = vbcast.lane.b32.xlu0 %v4349_v10, 258 }
 0x25a   : > { %9603 = vst [vmem:[#allocation24_spill] sm:$0xff] %v8084_v57 }
 0x25b   : > { %4356 = vbcast.lane.b32.xlu1 %v4349_v10, 266  ;;  %v8086_v18 = vpop.permute.xlu0 %3836 }
 0x25c   : > { %9604 = vst [vmem:[#allocation25_spill] sm:$0xff] %v8086_v18 }
 0x25d   : > { %v8090_v33 = vpop.permute.xlu1 %3864  ;;  %4364 = vbcast.lane.b32.xlu0 %v4361_v14, 258 }
 0x25e   : > { %9605 = vst [vmem:[#allocation26_spill] sm:$0xff] %v8090_v33 }
 0x25f   : > { %4368 = vbcast.lane.b32.xlu1 %v4361_v14, 266  ;;  %v8092_v56 = vpop.permute.xlu0 %3848 }
 0x260   : > { %9606 = vst [vmem:[#allocation27_spill] sm:$0xff] %v8092_v56 }
 0x261   : > { %v8096_v38 = vpop.permute.xlu1 %3876  ;;  %4376 = vbcast.lane.b32.xlu0 %v4373_v21, 258 }
 0x262   : > { %9607 = vst [vmem:[#allocation28_spill] sm:$0xff] %v8096_v38 }
 0x263   : > { %4380 = vbcast.lane.b32.xlu1 %v4373_v21, 266  ;;  %v8098_v36 = vpop.permute.xlu0 %3860  ;;  %v4265_v21 = vrot.slane %v7805_v52, %v7803_v41 }
 0x264   : > { %9608 = vst [vmem:[#allocation29_spill] sm:$0xff] %v8098_v36 }
 0x265   : > { %v8102_v29 = vpop.permute.xlu1 %3888  ;;  %4388 = vbcast.lane.b32.xlu0 %v4385_v3, 258 }
 0x266   : > { %9609 = vst [vmem:[#allocation30_spill] sm:$0xff] %v8102_v29 }
 0x267   : > { %4392 = vbcast.lane.b32.xlu1 %v4385_v3, 266  ;;  %v8104_v60 = vpop.permute.xlu0 %3872 }
 0x268   : > { %9610 = vst [vmem:[#allocation31_spill] sm:$0xff] %v8104_v60 }
 0x269   : > { %v8108_v61 = vpop.permute.xlu1 %3900  ;;  %4208 = vbcast.lane.b32.xlu0 %v4205_v37, 258 }
 0x26a   : > { %9611 = vst [vmem:[#allocation32_spill] sm:$0xff] %v8108_v61 }
 0x26b   : > { %4212 = vbcast.lane.b32.xlu1 %v4205_v37, 266  ;;  %v8110_v31 = vpop.permute.xlu0 %3884 }
 0x26c   : > { %9612 = vst [vmem:[#allocation33_spill] sm:$0xff] %v8110_v31 }
 0x26d   : > { %v8114_v50 = vpop.permute.xlu1 %3912  ;;  %4220 = vbcast.lane.b32.xlu0 %v4217_v19, 258 }
 0x26e   : > { %9613 = vst [vmem:[#allocation34_spill] sm:$0xff] %v8114_v50 }
 0x26f   : > { %4224 = vbcast.lane.b32.xlu1 %v4217_v19, 266  ;;  %v8116_v48 = vpop.permute.xlu0 %3896  ;;  %v4277_v19 = vrot.slane %v7805_v52, %v7814_v45 }
 0x270   : > { %9614 = vst [vmem:[#allocation35_spill] sm:$0xff] %v8116_v48 }
 0x271   : > { %v1710_v23 = vpop.permute.xlu1 %1709  ;;  %4232 = vbcast.lane.b32.xlu0 %v4229_v28, 258 }
 0x272   : > { %1731 = vst.msk [vmem:[#allocation5 + $0x18] sm:$0xff] %vm1727_vm3, %v1710_v23 }
 0x273   : > { %4236 = vbcast.lane.b32.xlu1 %v4229_v28, 266  ;;  %v8121_v51 = vpop.permute.xlu0 %3908 }
 0x274   : > { %9615 = vst [vmem:[#allocation36_spill] sm:$0xff] %v8121_v51 }
 0x275   : > { %v1708_v40 = vpop.permute.xlu1 %1707  ;;  %4244 = vbcast.lane.b32.xlu0 %v4241_v8, 258 }
 0x276   : > { %1730 = vst.msk [vmem:[#allocation5 + $0x10] sm:$0xff] %vm1727_vm3, %v1708_v40 }
 0x277   : > { %4248 = vbcast.lane.b32.xlu1 %v4241_v8, 266  ;;  %v8126_v15 = vpop.permute.xlu0 %4112  ;;  %v4289_v8 = vrot.slane %v7805_v52, %v7891_v0 }
 0x278   : > { %9616 = vst [vmem:[#allocation37_spill] sm:$0xff] %v8126_v15 }
 0x279   : > { %v8130_v10 = vpop.permute.xlu1 %4116  ;;  %4256 = vbcast.lane.b32.xlu0 %v4253_v47, 258 }
 0x27a   : > { %9617 = vst [vmem:[#allocation38_spill] sm:$0xff] %v8130_v10 }
 0x27b   : > { %4260 = vbcast.lane.b32.xlu1 %v4253_v47, 266  ;;  %v8132_v14 = vpop.permute.xlu0 %4124 }
 0x27c   : > { %9618 = vst [vmem:[#allocation39_spill] sm:$0xff] %v8132_v14 }
 0x27d   : > { %v8136_v3 = vpop.permute.xlu1 %4128  ;;  %4268 = vbcast.lane.b32.xlu0 %v4265_v21, 258 }
 0x27e   : > { %9619 = vst [vmem:[#allocation40_spill] sm:$0xff] %v8136_v3 }
 0x27f   : > { %4272 = vbcast.lane.b32.xlu1 %v4265_v21, 266  ;;  %v8138_v37 = vpop.permute.xlu0 %4136 }
 0x280   : > { %9620 = vst [vmem:[#allocation41_spill] sm:$0xff] %v8138_v37 }
 0x281   : > { %v8142_v28 = vpop.permute.xlu1 %4140  ;;  %4280 = vbcast.lane.b32.xlu0 %v4277_v19, 258 }
 0x282   : > { %9621 = vst [vmem:[#allocation42_spill] sm:$0xff] %v8142_v28 }
 0x283   : > { %4284 = vbcast.lane.b32.xlu1 %v4277_v19, 266  ;;  %v8144_v23 = vpop.permute.xlu0 %4148 }
 0x284   : > { %9622 = vst [vmem:[#allocation43_spill] sm:$0xff] %v8144_v23 }
 0x285   : > { %v8148_v40 = vpop.permute.xlu1 %4152  ;;  %4292 = vbcast.lane.b32.xlu0 %v4289_v8, 258 }
 0x286   : > { %9623 = vst [vmem:[#allocation44_spill] sm:$0xff] %v8148_v40 }
 0x287   : > { %4296 = vbcast.lane.b32.xlu1 %v4289_v8, 266  ;;  %v8150_v47 = vpop.permute.xlu0 %4160 }
 0x288   : > { %9624 = vst [vmem:[#allocation45_spill] sm:$0xff] %v8150_v47 }
 0x289   : > { %v8152_v21 = vpop.permute.xlu1 %4164  ;;  %1715 = vrot.lane.b32.xlu0 %v7838_v49, %s7075_s20 }
 0x28a   : > { %9625 = vst [vmem:[#allocation46_spill] sm:$0xff] %v8152_v21 }
 0x28b   : > { %1717 = vrot.lane.b32.xlu1 %v7833_v5, %s7075_s20  ;;  %v8158_v19 = vpop.permute.xlu0 %4172 }
 0x28c   : > { %9626 = vst [vmem:[#allocation47_spill] sm:$0xff] %v8158_v19  ;;  %v4517_v19 = vrot.slane %v7833_v5, %v7772_v13 }
 0x28d   : > { %v8162_v52 = vpop.permute.xlu1 %4176  ;;  %4496 = vbcast.lane.b32.xlu0 %v4493_v4, 258 }
 0x28e   : > { %9627 = vst [vmem:[#allocation48_spill] sm:$0xff] %v8162_v52 }
 0x28f   : > { %4500 = vbcast.lane.b32.xlu1 %v4493_v4, 266  ;;  %v8164_v8 = vpop.permute.xlu0 %4184  ;;  %v4529_v4 = vrot.slane %v7833_v5, %v7785_v53 }
 0x290   : > { %9628 = vst [vmem:[#allocation49_spill] sm:$0xff] %v8164_v8 }
 0x291   : > { %v8168_v7 = vpop.permute.xlu1 %4188  ;;  %4508 = vbcast.lane.b32.xlu0 %v4505_v24, 258 }
 0x292   : > { %9629 = vst [vmem:[#allocation50_spill] sm:$0xff] %v8168_v7 }
 0x293   : > { %4512 = vbcast.lane.b32.xlu1 %v4505_v24, 266  ;;  %v8170_v2 = vpop.permute.xlu0 %4196  ;;  %v4541_v24 = vrot.slane %v7833_v5, %v7795_v12 }
 0x294   : > { %9630 = vst [vmem:[#allocation51_spill] sm:$0xff] %v8170_v2 }
 0x295   : > { %v8174_v21 = vpop.permute.xlu1 %4200  ;;  %4520 = vbcast.lane.b32.xlu0 %v4517_v19, 258 }
 0x296   : > { %9631 = vst [vmem:[#allocation52_spill] sm:$0xff] %v8174_v21 }
 0x297   : > { %4524 = vbcast.lane.b32.xlu1 %v4517_v19, 266  ;;  %v8176_v52 = vpop.permute.xlu0 %4016  ;;  %v4553_v19 = vrot.slane %v7833_v5, %v7803_v41 }
 0x298   : > { %9632 = vst [vmem:[#allocation53_spill] sm:$0xff] %v8176_v52 }
 0x299   : > { %v8180_v8 = vpop.permute.xlu1 %4020  ;;  %4532 = vbcast.lane.b32.xlu0 %v4529_v4, 258 }
 0x29a   : > { %9633 = vst [vmem:[#allocation54_spill] sm:$0xff] %v8180_v8 }
 0x29b   : > { %4536 = vbcast.lane.b32.xlu1 %v4529_v4, 266  ;;  %v8182_v7 = vpop.permute.xlu0 %4028  ;;  %v4565_v4 = vrot.slane %v7833_v5, %v7814_v45 }
 0x29c   : > { %9634 = vst [vmem:[#allocation55_spill] sm:$0xff] %v8182_v7 }
 0x29d   : > { %v8186_v2 = vpop.permute.xlu1 %4032  ;;  %4544 = vbcast.lane.b32.xlu0 %v4541_v24, 258 }
 0x29e   : > { %9635 = vst [vmem:[#allocation56_spill] sm:$0xff] %v8186_v2 }
 0x29f   : > { %4548 = vbcast.lane.b32.xlu1 %v4541_v24, 266  ;;  %v8188_v21 = vpop.permute.xlu0 %4040  ;;  %v4397_v24 = vrot.slane %v7838_v49, %v7746_v20 }
 0x2a0   : > { %9636 = vst [vmem:[#allocation57_spill] sm:$0xff] %v8188_v21 }
 0x2a1   : > { %v8192_v52 = vpop.permute.xlu1 %4044  ;;  %4556 = vbcast.lane.b32.xlu0 %v4553_v19, 258 }
 0x2a2   : > { %9637 = vst [vmem:[#allocation58_spill] sm:$0xff] %v8192_v52 }
 0x2a3   : > { %4560 = vbcast.lane.b32.xlu1 %v4553_v19, 266  ;;  %v8194_v8 = vpop.permute.xlu0 %4052  ;;  %v4409_v19 = vrot.slane %v7838_v49, %v7757_v39 }
 0x2a4   : > { %9638 = vst [vmem:[#allocation59_spill] sm:$0xff] %v8194_v8 }
 0x2a5   : > { %v8198_v7 = vpop.permute.xlu1 %4056  ;;  %4568 = vbcast.lane.b32.xlu0 %v4565_v4, 258 }
 0x2a6   : > { %9639 = vst [vmem:[#allocation60_spill] sm:$0xff] %v8198_v7 }
 0x2a7   : > { %4572 = vbcast.lane.b32.xlu1 %v4565_v4, 266  ;;  %v8200_v2 = vpop.permute.xlu0 %4064  ;;  %v4421_v4 = vrot.slane %v7838_v49, %v7772_v13 }
 0x2a8   : > { %9640 = vst [vmem:[#allocation61_spill] sm:$0xff] %v8200_v2 }
 0x2a9   : > { %v8204_v21 = vpop.permute.xlu1 %4068  ;;  %4400 = vbcast.lane.b32.xlu0 %v4397_v24, 258 }
 0x2aa   : > { %9641 = vst [vmem:[#allocation62_spill] sm:$0xff] %v8204_v21 }
 0x2ab   : > { %4404 = vbcast.lane.b32.xlu1 %v4397_v24, 266  ;;  %v8206_v52 = vpop.permute.xlu0 %4076  ;;  %v4433_v24 = vrot.slane %v7838_v49, %v7785_v53  ;;  %v4469_v53 = vrot.slane %v7838_v49, %v7814_v45 }
 0x2ac   : > { %9642 = vst [vmem:[#allocation63_spill] sm:$0xff] %v8206_v52 }
 0x2ad   : > { %v8210_v8 = vpop.permute.xlu1 %4080  ;;  %4412 = vbcast.lane.b32.xlu0 %v4409_v19, 258 }
 0x2ae   : > { %9643 = vst [vmem:[#allocation64_spill] sm:$0xff] %v8210_v8 }
 0x2af   : > { %4416 = vbcast.lane.b32.xlu1 %v4409_v19, 266  ;;  %v8212_v7 = vpop.permute.xlu0 %4088  ;;  %v4445_v19 = vrot.slane %v7838_v49, %v7795_v12 }
 0x2b0   : > { %9644 = vst [vmem:[#allocation65_spill] sm:$0xff] %v8212_v7 }
 0x2b1   : > { %v8216_v2 = vpop.permute.xlu1 %4092  ;;  %4424 = vbcast.lane.b32.xlu0 %v4421_v4, 258 }
 0x2b2   : > { %9645 = vst [vmem:[#allocation66_spill] sm:$0xff] %v8216_v2 }
 0x2b3   : > { %4428 = vbcast.lane.b32.xlu1 %v4421_v4, 266  ;;  %v8218_v21 = vpop.permute.xlu0 %4100  ;;  %v4457_v4 = vrot.slane %v7838_v49, %v7803_v41 }
 0x2b4   : > { %9646 = vst [vmem:[#allocation67_spill] sm:$0xff] %v8218_v21 }
 0x2b5   : > { %v8222_v52 = vpop.permute.xlu1 %4104  ;;  %4436 = vbcast.lane.b32.xlu0 %v4433_v24, 258 }
 0x2b6   : > { %9647 = vst [vmem:[#allocation68_spill] sm:$0xff] %v8222_v52 }
 0x2b7   : > { %4440 = vbcast.lane.b32.xlu1 %v4433_v24, 266  ;;  %v1712_v39 = vpop.permute.xlu0 %1711  ;;  %v4481_v24 = vrot.slane %v7838_v49, %v7891_v0 }
 0x2b8   : > { %1732 = vst.msk [vmem:[#allocation5 + $0x20] sm:$0xff] %vm1727_vm3, %v1712_v39  ;;  %v4577_v39 = vrot.slane %v7833_v5, %v7891_v0 }
 0x2b9   : > { %v1714_v13 = vpop.permute.xlu1 %1713  ;;  %4448 = vbcast.lane.b32.xlu0 %v4445_v19, 258 }
 0x2ba   : > { %1733 = vst.msk [vmem:[#allocation5 + $0x28] sm:$0xff] %vm1727_vm3, %v1714_v13 }
 0x2bb   : > { %4452 = vbcast.lane.b32.xlu1 %v4445_v19, 266  ;;  %v8236_v13 = vpop.permute.xlu0 %4304 }
 0x2bc   : > { %9648 = vst [vmem:[#allocation69_spill] sm:$0xff] %v8236_v13 }
 0x2bd   : > { %4460 = vbcast.lane.b32.xlu0 %v4457_v4, 258  ;;  %v8238_v19 = vpop.permute.xlu1 %4308 }
 0x2be   : > { %9649 = vst [vmem:[#allocation70_spill] sm:$0xff] %v8238_v19 }
 0x2bf   : > { %4464 = vbcast.lane.b32.xlu1 %v4457_v4, 266  ;;  %v8243_v4 = vld [vmem:[%s9540_s6] ss:$0 sm:$0xff] }
 0x2c1   : > { %4472 = vbcast.lane.b32.xlu0 %v4469_v53, 258  ;;  %v8247_v49 = vpop.permute.xlu1 %4320 }
 0x2c2   : > { %9651 = vst [vmem:[#allocation72_spill] sm:$0xff] %v8247_v49 }
 0x2c3   : > { %4476 = vbcast.lane.b32.xlu1 %v4469_v53, 266  ;;  %v8245_v53 = vpop.permute.xlu0 %4316 }
 0x2c4   : > { %9650 = vst [vmem:[#allocation71_spill] sm:$0xff] %v8245_v53 }
 0x2c5   : > { %4484 = vbcast.lane.b32.xlu0 %v4481_v24, 258  ;;  %v8265_v21 = vpop.permute.xlu1 %4332 }
 0x2c6   : > { %9653 = vst [vmem:[#allocation74_spill] sm:$0xff] %v8265_v21 }
 0x2c7   : > { %4488 = vbcast.lane.b32.xlu1 %v4481_v24, 266  ;;  %v8257_v19 = vpop.permute.xlu0 %4328 }
 0x2c8   : > { %9652 = vst [vmem:[#allocation73_spill] sm:$0xff] %v8257_v19 }
 0x2c9   : > { %4580 = vbcast.lane.b32.xlu0 %v4577_v39, 258  ;;  %v8279_v28 = vpop.permute.xlu1 %4344 }
 0x2ca   : > { %9657 = vst [vmem:[#allocation78_spill] sm:$0xff] %v8279_v28 }
 0x2cb   : > { %4584 = vbcast.lane.b32.xlu1 %v4577_v39, 266  ;;  %v8275_v40 = vpop.permute.xlu0 %4340 }
 0x2cc   : > { %9656 = vst [vmem:[#allocation77_spill] sm:$0xff] %v8275_v40 }
 0x2cd   : > { %v8283_v40 = vpop.permute.xlu1 %4356 }
 0x2ce   : > { %9659 = vst [vmem:[#allocation80_spill] sm:$0xff] %v8283_v40 }
 0x2ed   : > { %v6465_v45 = vpop.f32.mrb[0].mxu1 }
 0x2ee   : > { %v8250_v24 = vadd.f32 %v6465_v45, %v8243_v4  ;;  %v2466_v5 = vpop.f32.mrb[1].mxu1 }
 0x2ef   : > { %v8253_v39 = vadd.f32 %v8243_v4, %v2466_v5 }
 0x2f0   : > { %v2521_v0 = vand.u32 2147483647, %v8250_v24 }
 0x2f1   : > { %v2520_v41 = vand.u32 2147483647, %v8253_v39  ;;  %v6468_v12 = vpop.f32.mrb[2].mxu1 }
 0x2f2   : > { %v2529_v13 = vsub.f32 0.0, %v2521_v0  ;;  %v8260_v53 = vadd.f32 %v6468_v12, %v8243_v4  ;;  %v2478_v52 = vpop.f32.mrb[3].mxu1 }
 0x2f3   : > { %v2528_v49 = vsub.f32 0.0, %v2520_v41  ;;  %v8263_v45 = vadd.f32 %v8243_v4, %v2478_v52 }
 0x2f4   : > { %v2538_v5 = vmul.f32 1.442695, %v2529_v13  ;;  %v2523_v2 = vand.u32 2147483647, %v8260_v53 }
 0x2f5   : > { %v2536_v7 = vmul.f32 1.442695, %v2528_v49  ;;  %v2522_v8 = vand.u32 2147483647, %v8263_v45  ;;  %v6471_v47 = vpop.f32.mrb[4].mxu1 }
 0x2f6   : > { %6735 = vpow2.f32 %v2538_v5  ;;  %v2531_v19 = vsub.f32 0.0, %v2523_v2  ;;  %v8270_v0 = vadd.f32 %v6471_v47, %v8243_v4  ;;  %v2490_v12 = vpop.f32.mrb[5].mxu1 }
 0x2f7   : > { %6737 = vpow2.f32 %v2536_v7  ;;  %v2530_v41 = vsub.f32 0.0, %v2522_v8  ;;  %v8273_v52 = vadd.f32 %v8243_v4, %v2490_v12  ;;  %v8281_v8 = vpop.permute.xlu0 %4352 }
 0x2f8   : > { %9654 = vst [vmem:[#allocation75_spill] sm:$0xff] %v8270_v0  ;;  %v2542_v13 = vmul.f32 1.442695, %v2531_v19  ;;  %v2525_v21 = vand.u32 2147483647, %v8270_v0  ;;  %9658 = vst [vmem:[#allocation79_spill] sm:$0xff] %v8281_v8 }
 0x2f9   : > { %9655 = vst [vmem:[#allocation76_spill] sm:$0xff] %v8273_v52  ;;  %v2540_v49 = vmul.f32 1.442695, %v2530_v41  ;;  %v2524_v23 = vand.u32 2147483647, %v8273_v52 }
 0x2fa   : > { %6739 = vpow2.f32 %v2542_v13  ;;  %v2533_v2 = vsub.f32 0.0, %v2525_v21 }
 0x2fb   : > { %6741 = vpow2.f32 %v2540_v49  ;;  %v2532_v47 = vsub.f32 0.0, %v2524_v23  ;;  %v8285_v14 = vpop.permute.xlu0 %4364  ;;  %v8287_v23 = vpop.permute.xlu1 %4368  ;;  %v7076_v49 = vmov 1966171168  }
 0x2fc   : > { %v2546_v5 = vmul.f32 1.442695, %v2533_v2  ;;  %9660 = vst [vmem:[#allocation81_spill] sm:$0xff] %v8285_v14  ;;  %9661 = vst [vmem:[#allocation82_spill] sm:$0xff] %v8287_v23  ;;  %v2594_v2 = vunpack.c.l.s4 %v7076_v49 }
 0x2fd   : > { %v2544_v7 = vmul.f32 1.442695, %v2532_v47 }
 0x2fe   : > { %6743 = vpow2.f32 %v2546_v5  ;;  %v6474_v5 = vpop.f32.mrb[6].mxu1 }
 0x2ff   : > { %6745 = vpow2.f32 %v2544_v7  ;;  %v8290_v40 = vadd.f32 %v6474_v5, %v8243_v4  ;;  %v2512_v5 = vmax.f32 %v8253_v39, 0.0 }
 0x300   : > { %v6736_v12 = vpop.eup %6735 }
 0x301   : > { %v6738_v19 = vpop.eup %6737  ;;  %v2553_v37 = vadd.f32 1.0, %v6736_v12  ;;  %9662 = vst [vmem:[#allocation83_spill] sm:$0xff] %v8290_v40 }
 0x302   : > { %v2552_v41 = vadd.f32 1.0, %v6738_v19  ;;  %v2595_v19 = vunpack.c.0.s8 %v2594_v2 }
 0x303   : > { %6747 = vlog2.f32 %v2553_v37  ;;  %v8292_v37 = vpop.permute.xlu0 %4376 }
 0x304   : > { %v6740_v3 = vpop.eup %6739  ;;  %6749 = vlog2.f32 %v2552_v41  ;;  %9663 = vst [vmem:[#allocation84_spill] sm:$0xff] %v8292_v37  ;;  %v2527_v41 = vand.u32 2147483647, %v8290_v40 }
 0x305   : > { %v6742_v21 = vpop.eup %6741  ;;  %v2555_v13 = vadd.f32 1.0, %v6740_v3  ;;  %v8295_v3 = vpop.permute.xlu1 %4380 }
 0x306   : > { %v2554_v47 = vadd.f32 1.0, %v6742_v21  ;;  %9664 = vst [vmem:[#allocation85_spill] sm:$0xff] %v8295_v3  ;;  %v2535_v8 = vsub.f32 0.0, %v2527_v41 }
 0x307   : > { %6751 = vlog2.f32 %v2555_v13  ;;  %v2513_v13 = vmax.f32 %v8250_v24, 0.0  ;;  %v8302_v2 = vpop.permute.xlu0 %4388 }
 0x308   : > { %v6744_v7 = vpop.eup %6743  ;;  %6753 = vlog2.f32 %v2554_v47  ;;  %v8299_v47 = vsub.s32 %v2595_v19, %v7740_v22  ;;  %v2550_v4 = vmul.f32 1.442695, %v2535_v8  ;;  %9665 = vst [vmem:[#allocation86_spill] sm:$0xff] %v8302_v2 }
 0x309   : > { %v6746_v12 = vpop.eup %6745  ;;  %v2557_v14 = vadd.f32 1.0, %v6744_v7 }
 0x30a   : > { %v2556_v23 = vadd.f32 1.0, %v6746_v12 }
 0x30b   : > { %6755 = vlog2.f32 %v2557_v14 }
 0x30c   : > { %6757 = vlog2.f32 %v2556_v23 }
 0x30d   : > { %v6748_v49 = vpop.eup %6747  ;;  %6759 = vpow2.f32 %v2550_v4 }
 0x30e   : > { %v6750_v21 = vpop.eup %6749  ;;  %v2563_v28 = vmul.f32 0.6931472, %v6748_v49  ;;  %v8308_v49 = vpop.permute.xlu1 %4392 }
 0x30f   : > { %v2561_v37 = vmul.f32 0.6931472, %v6750_v21  ;;  %9666 = vst [vmem:[#allocation87_spill] sm:$0xff] %v8308_v49 }
 0x310   : > { %v2577_v7 = vadd.f32 %v2563_v28, %v2513_v13 }
 0x311   : > { %v6752_v41 = vpop.eup %6751  ;;  %v2576_v3 = vadd.f32 %v2561_v37, %v2512_v5 }
 0x312   : > { %v6754_v8 = vpop.eup %6753  ;;  %v2641_v39 = vcombine.high %v2577_v7, %v2577_v7  ;;  %v2648_v14 = vrot.slane %v2577_v7, %v8299_v47  ;;  %v4587_v28 = vmul.f32 %v2577_v7, %v7358_v43  ;;  %v8312_v21 = vmul.f32 0.6931472, %v6752_v41 }
 0x313   : > { %v2592_v13 = vcombine.high %v2576_v3, %v2576_v3  ;;  %v8315_v23 = vrot.slane %v2576_v3, %v8299_v47  ;;  %v8318_v37 = vmul.f32 %v2576_v3, %v7353_v30  ;;  %v8320_v5 = vmul.f32 0.6931472, %v6754_v8  ;;  %v8336_v3 = vpop.permute.xlu0 %4208 }
 0x314   : > { %v2655_v4 = vrot.slane %v2641_v39, %v8299_v47  ;;  %v2656_v19 = vcombine.high %v2648_v14, %v2648_v14  ;;  %v2664_v24 = vrot.slane %v2648_v14, %v8299_v47  ;;  %v4651_v12 = vcombine.high %v4587_v28, %v4587_v28  ;;  %9667 = vst [vmem:[#allocation88_spill] sm:$0xff] %v8336_v3  ;;  %v8360_v3 = vpop.permute.xlu1 %4212 }
 0x315   : > { %v8325_v40 = vrot.slane %v4587_v28, %v8299_v47  ;;  %v8328_v43 = vrot.slane %v2592_v13, %v8299_v47  ;;  %v8334_v30 = vrot.slane %v8315_v23, %v8299_v47  ;;  %v8343_v28 = vld [vmem:[%s9541_s7] sm:$0xff]  ;;  %v8348_v13 = vld [vmem:[%s9541_s7 + $0x8] sm:$0xff]  ;;  %9668 = vst [vmem:[#allocation89_spill] sm:$0xff] %v8360_v3  ;;  %v8364_v10 = vpop.eup %6755 }
 0x316   : > { %v2657_v41 = vcombine.high %v2655_v4, %v2655_v4  ;;  %v2671_v8 = vrot.slane %v2655_v4, %v8299_v47  ;;  %v2678_v39 = vrot.slane %v2656_v19, %v8299_v47  ;;  %v2686_v14 = vcombine.high %v2664_v24, %v2664_v24  ;;  %9669 = vst [vmem:[#allocation90_spill] sm:$0xff] %v8364_v10 }
 0x317   : > { %v3021_v7 = vrot.slane %v2664_v24, %v7746_v20  ;;  %v8352_v22 = vrot.slane %v4651_v12, %v8299_v47  ;;  %v4666_v4 = vcombine.high %v8325_v40, %v8325_v40  ;;  %v8358_v19 = vrot.slane %v8325_v40, %v8299_v47  ;;  %v8370_v40 = vpop.eup %6757 }
 0x318   : > { %v2685_v49 = vrot.slane %v2657_v41, %v8299_v47  ;;  %v2687_v2 = vcombine.high %v2671_v8, %v2671_v8  ;;  %v2688_v52 = vcombine.high %v2678_v39, %v2678_v39  ;;  %v3025_v0 = vrot.slane %v2678_v39, %v7746_v20  ;;  %9670 = vst [vmem:[#allocation91_spill] sm:$0xff] %v8370_v40  ;;  %v8375_v39 = vpop.eup %6759  ;;  %v8391_v29 = vpop.permute.xlu1 %4224 }
 0x319   : > { %v3029_v12 = vrot.slane %v2686_v14, %v7746_v20  ;;  %v3037_v24 = vrot.slane %v2671_v8, %v7746_v20  ;;  %v3322_v15 = vmul.f32 %v3021_v7, %v8343_v28  ;;  %v3323_v63 = vmul.f32 %v3021_v7, %v8348_v13  ;;  %9671 = vst [vmem:[#allocation92_spill] sm:$0xff] %v8375_v39  ;;  %v8381_v7 = vpop.permute.xlu0 %4220 }
 0x31a   : > { %v2689_v26 = vcombine.high %v2685_v49, %v2685_v49  ;;  %v3033_v3 = vrot.slane %v2688_v52, %v7746_v20  ;;  %v3041_v41 = vrot.slane %v2685_v49, %v7746_v20  ;;  %v3045_v50 = vrot.slane %v2687_v2, %v7746_v20  ;;  %9672 = vst [vmem:[#allocation93_spill] sm:$0xff] %v8381_v7 }
 0x31b   : > { %v3324_v10 = vmul.f32 %v3025_v0, %v8343_v28  ;;  %v3325_v14 = vmul.f32 %v3025_v0, %v8348_v13  ;;  %v3326_v8 = vmul.f32 %v3029_v12, %v8343_v28  ;;  %v3327_v51 = vmul.f32 %v3029_v12, %v8348_v13  ;;  %9673 = vst [vmem:[#allocation94_spill] sm:$0xff] %v8391_v29 }
 0x31c   : > { %v3049_v40 = vrot.slane %v2689_v26, %v7746_v20  ;;  %v3328_v52 = vmul.f32 %v3033_v3, %v8343_v28  ;;  %v3329_v49 = vmul.f32 %v3033_v3, %v8348_v13  ;;  %v3330_v2 = vmul.f32 %v3037_v24, %v8343_v28  ;;  %v8402_v18 = vpop.permute.xlu1 %4236 }
 0x31d   : > { %v3331_v39 = vmul.f32 %v3037_v24, %v8348_v13  ;;  %v3332_v61 = vmul.f32 %v3041_v41, %v8343_v28  ;;  %v3333_v0 = vmul.f32 %v3041_v41, %v8348_v13  ;;  %v3334_v48 = vmul.f32 %v3045_v50, %v8343_v28 }
 0x31e   : > { %v3335_v12 = vmul.f32 %v3045_v50, %v8348_v13  ;;  %v3336_v26 = vmul.f32 %v3049_v40, %v8343_v28  ;;  %v3337_v7 = vmul.f32 %v3049_v40, %v8348_v13  ;;  %v3466_v31 = vmul.f32 1.442695, %v3322_v15  ;;  %v8398_v50 = vpop.permute.xlu0 %4232 }
 0x31f   : > { %v3468_v3 = vmul.f32 1.442695, %v3323_v63  ;;  %v3470_v38 = vmul.f32 1.442695, %v3324_v10  ;;  %v3472_v60 = vmul.f32 1.442695, %v3325_v14  ;;  %v4667_v24 = vcombine.high %v8352_v22, %v8352_v22 }
 0x320   : > { %6761 = vpow2.f32 %v3466_v31  ;;  %v3474_v33 = vmul.f32 1.442695, %v3326_v8  ;;  %v3476_v41 = vmul.f32 1.442695, %v3327_v51  ;;  %v3478_v36 = vmul.f32 1.442695, %v3328_v52 }
 0x321   : > { %6763 = vpow2.f32 %v3468_v3  ;;  %v3480_v57 = vmul.f32 1.442695, %v3329_v49  ;;  %v3482_v29 = vmul.f32 1.442695, %v3330_v2  ;;  %v3484_v56 = vmul.f32 1.442695, %v3331_v39 }
 0x322   : > { %6765 = vpow2.f32 %v3470_v38  ;;  %v3486_v35 = vmul.f32 1.442695, %v3332_v61  ;;  %v3488_v40 = vmul.f32 1.442695, %v3333_v0  ;;  %v3490_v15 = vmul.f32 1.442695, %v3334_v48  ;;  %v8417_v52 = vpop.permute.xlu0 %4244 }
 0x323   : > { %6767 = vpow2.f32 %v3472_v60  ;;  %v3492_v63 = vmul.f32 1.442695, %v3335_v12  ;;  %v3494_v10 = vmul.f32 1.442695, %v3336_v26  ;;  %v8400_v14 = vmul.f32 1.442695, %v3337_v7  ;;  %v8425_v26 = vpop.permute.xlu1 %4248 }
 0x324   : > { %6769 = vpow2.f32 %v3474_v33  ;;  %v4681_v31 = vrot.slane %v8352_v22, %v8299_v47  ;;  %v4688_v51 = vrot.slane %v4666_v4, %v8299_v47  ;;  %v4695_v39 = vrot.slane %v4667_v24, %v8299_v47 }
 0x325   : > { %6771 = vpow2.f32 %v3476_v41  ;;  %v4696_v38 = vcombine.high %v8358_v19, %v8358_v19  ;;  %v5029_v60 = vrot.slane %v8358_v19, %v7746_v20  ;;  %v2608_v61 = vcombine.high %v8328_v43, %v8328_v43 }
 0x326   : > { %6773 = vpow2.f32 %v3478_v36  ;;  %v4697_v48 = vcombine.high %v4681_v31, %v4681_v31  ;;  %v4698_v33 = vcombine.high %v4688_v51, %v4688_v51  ;;  %v4699_v8 = vcombine.high %v4695_v39, %v4695_v39 }
 0x327   : > { %6775 = vpow2.f32 %v3480_v57  ;;  %v5033_v22 = vrot.slane %v4688_v51, %v7746_v20  ;;  %v5037_v4 = vrot.slane %v4696_v38, %v7746_v20  ;;  %v5045_v7 = vrot.slane %v4681_v31, %v7746_v20  ;;  %v8477_v31 = vpop.permute.xlu1 %4260 }
 0x328   : > { %6777 = vpow2.f32 %v3482_v29  ;;  %v5041_v49 = vrot.slane %v4698_v33, %v7746_v20  ;;  %v5049_v19 = vrot.slane %v4695_v39, %v7746_v20  ;;  %v5053_v2 = vrot.slane %v4697_v48, %v7746_v20 }
 0x329   : > { %6779 = vpow2.f32 %v3484_v56  ;;  %v5057_v36 = vrot.slane %v4699_v8, %v7746_v20  ;;  %v5330_v57 = vmul.f32 %v5029_v60, %v8030_v55  ;;  %v5331_v0 = vmul.f32 %v5029_v60, %v8023_v6 }
 0x32a   : > { %v6762_v12 = vpop.eup %6761  ;;  %6781 = vpow2.f32 %v3486_v35  ;;  %v5332_v3 = vmul.f32 %v5033_v22, %v8036_v54  ;;  %v5333_v29 = vmul.f32 %v5033_v22, %v8028_v27  ;;  %v5334_v24 = vmul.f32 %v5037_v4, %v8042_v17 }
 0x32b   : > { %v6764_v41 = vpop.eup %6763  ;;  %6783 = vpow2.f32 %v3488_v40  ;;  %3706 = vst.msk [vmem:[#allocation3 + $0x80] sm:$0xff] %vm842_vm6, %v6762_v12  ;;  %v5335_v56 = vmul.f32 %v5037_v4, %v8034_v1  ;;  %v5336_v55 = vmul.f32 %v5041_v49, %v8048_v58  ;;  %v5337_v6 = vmul.f32 %v5041_v49, %v8040_v62  ;;  %5458 = vst.msk [vmem:[#allocation4 + $0x80] sm:$0xff] %vm842_vm6, %v5330_v57 }
 0x32c   : > { %5459 = vst.msk [vmem:[#allocation4 + $0x88] sm:$0xff] %vm842_vm6, %v5331_v0  ;;  %v6766_v35 = vpop.eup %6765  ;;  %6785 = vpow2.f32 %v3490_v15  ;;  %3707 = vst.msk [vmem:[#allocation3 + $0x88] sm:$0xff] %vm842_vm6, %v6764_v41  ;;  %v5338_v27 = vmul.f32 %v5045_v7, %v8054_v42  ;;  %v5339_v54 = vmul.f32 %v5045_v7, %v8046_v44  ;;  %v5340_v17 = vmul.f32 %v5049_v19, %v8062_v16  ;;  %v8450_v16 = vpop.permute.xlu0 %4256 }
 0x32d   : > { %5460 = vst.msk [vmem:[#allocation4 + $0x90] sm:$0xff] %vm842_vm6, %v5332_v3  ;;  %5461 = vst.msk [vmem:[#allocation4 + $0x98] sm:$0xff] %vm842_vm6, %v5333_v29  ;;  %v6768_v1 = vpop.eup %6767  ;;  %6787 = vpow2.f32 %v3492_v63  ;;  %v5341_v62 = vmul.f32 %v5049_v19, %v8050_v59  ;;  %v5342_v58 = vmul.f32 %v5053_v2, %v8068_v46  ;;  %v5343_v42 = vmul.f32 %v5053_v2, %v8060_v32 }
 0x32e   : > { %5462 = vst.msk [vmem:[#allocation4 + $0xa0] sm:$0xff] %vm842_vm6, %v5334_v24  ;;  %3708 = vst.msk [vmem:[#allocation3 + $0x90] sm:$0xff] %vm842_vm6, %v6766_v35  ;;  %v6770_v44 = vpop.eup %6769  ;;  %6789 = vpow2.f32 %v3494_v10  ;;  %v5344_v40 = vmul.f32 %v5057_v36, %v8074_v11  ;;  %v5345_v59 = vmul.f32 %v5057_v36, %v8066_v25  ;;  %v2622_v32 = vrot.slane %v8328_v43, %v8299_v47  ;;  %v8475_v10 = vpop.f32.mrb[7].mxu1 }
 0x32f   : > { %5463 = vst.msk [vmem:[#allocation4 + $0xa8] sm:$0xff] %vm842_vm6, %v5335_v56  ;;  %5464 = vst.msk [vmem:[#allocation4 + $0xb0] sm:$0xff] %vm842_vm6, %v5336_v55  ;;  %v6772_v46 = vpop.eup %6771  ;;  %6791 = vpow2.f32 %v8400_v14  ;;  %v9674_v25 = vcombine.high %v8315_v23, %v8315_v23  ;;  %v2636_v15 = vrot.slane %v2608_v61, %v8299_v47  ;;  %v2637_v63 = vcombine.high %v8334_v30, %v8334_v30 }
 0x330   : > { %5465 = vst.msk [vmem:[#allocation4 + $0xb8] sm:$0xff] %vm842_vm6, %v5337_v6  ;;  %3709 = vst.msk [vmem:[#allocation3 + $0x98] sm:$0xff] %vm842_vm6, %v6768_v1  ;;  %v6774_v14 = vpop.eup %6773  ;;  %v2638_v23 = vcombine.high %v2622_v32, %v2622_v32  ;;  %v2989_v51 = vrot.slane %v8334_v30, %v7746_v20  ;;  %v3005_v43 = vrot.slane %v2622_v32, %v7746_v20  ;;  %v8505_v41 = vpop.permute.xlu0 %4268 }
 0x331   : > { %5466 = vst.msk [vmem:[#allocation4 + $0xc0] sm:$0xff] %vm842_vm6, %v5338_v27  ;;  %5467 = vst.msk [vmem:[#allocation4 + $0xc8] sm:$0xff] %vm842_vm6, %v5339_v54  ;;  %v2629_v11 = vrot.slane %v9674_v25, %v8299_v47  ;;  %v4602_v39 = vcombine.high %v8318_v37, %v8318_v37  ;;  %v6776_v38 = vpop.eup %6775  ;;  %v2640_v61 = vcombine.high %v2636_v15, %v2636_v15 }
 0x332   : > { %5468 = vst.msk [vmem:[#allocation4 + $0xd0] sm:$0xff] %vm842_vm6, %v5340_v17  ;;  %3710 = vst.msk [vmem:[#allocation3 + $0xa0] sm:$0xff] %vm842_vm6, %v6770_v44  ;;  %v2997_v33 = vrot.slane %v2637_v63, %v7746_v20  ;;  %v6778_v8 = vpop.eup %6777  ;;  %v3009_v22 = vrot.slane %v2636_v15, %v7746_v20  ;;  %v3013_v30 = vrot.slane %v2638_v23, %v7746_v20 }
 0x333   : > { %5469 = vst.msk [vmem:[#allocation4 + $0xd8] sm:$0xff] %vm842_vm6, %v5341_v62  ;;  %5470 = vst.msk [vmem:[#allocation4 + $0xe0] sm:$0xff] %vm842_vm6, %v5342_v58  ;;  %v2639_v60 = vcombine.high %v2629_v11, %v2629_v11  ;;  %v2993_v48 = vrot.slane %v2629_v11, %v7746_v20  ;;  %v3306_v4 = vmul.f32 %v2989_v51, %v8343_v28  ;;  %v6780_v49 = vpop.eup %6779 }
 0x334   : > { %5471 = vst.msk [vmem:[#allocation4 + $0xe8] sm:$0xff] %vm842_vm6, %v5343_v42  ;;  %3711 = vst.msk [vmem:[#allocation3 + $0xa8] sm:$0xff] %vm842_vm6, %v6772_v46  ;;  %v3307_v7 = vmul.f32 %v2989_v51, %v8348_v13  ;;  %v3017_v2 = vrot.slane %v2640_v61, %v7746_v20  ;;  %v6782_v0 = vpop.eup %6781  ;;  %v3310_v12 = vmul.f32 %v2997_v33, %v8343_v28  ;;  %v8517_v42 = vpop.permute.xlu1 %4272 }
 0x335   : > { %5472 = vst.msk [vmem:[#allocation4 + $0xf0] sm:$0xff] %vm842_vm6, %v5344_v40  ;;  %5473 = vst.msk [vmem:[#allocation4 + $0xf8] sm:$0xff] %vm842_vm6, %v5345_v59  ;;  %v3001_v19 = vrot.slane %v2639_v60, %v7746_v20  ;;  %v3308_v36 = vmul.f32 %v2993_v48, %v8343_v28  ;;  %v3309_v57 = vmul.f32 %v2993_v48, %v8348_v13  ;;  %v6784_v56 = vpop.eup %6783  ;;  %v3434_v40 = vmul.f32 1.442695, %v3306_v4  ;;  %v8526_v48 = vpop.permute.xlu0 %4280 }
 0x336   : > { %3712 = vst.msk [vmem:[#allocation3 + $0xb0] sm:$0xff] %vm842_vm6, %v6774_v14  ;;  %3713 = vst.msk [vmem:[#allocation3 + $0xb8] sm:$0xff] %vm842_vm6, %v6776_v38  ;;  %v3311_v3 = vmul.f32 %v2997_v33, %v8348_v13  ;;  %v3314_v29 = vmul.f32 %v3005_v43, %v8343_v28  ;;  %v3315_v24 = vmul.f32 %v3005_v43, %v8348_v13  ;;  %v6786_v54 = vpop.eup %6785  ;;  %v3436_v59 = vmul.f32 1.442695, %v3307_v7 }
 0x337   : > { %3714 = vst.msk [vmem:[#allocation3 + $0xc0] sm:$0xff] %vm842_vm6, %v6778_v8  ;;  %3715 = vst.msk [vmem:[#allocation3 + $0xc8] sm:$0xff] %vm842_vm6, %v6780_v49  ;;  %v3312_v55 = vmul.f32 %v3001_v19, %v8343_v28  ;;  %v3313_v6 = vmul.f32 %v3001_v19, %v8348_v13  ;;  %v3316_v35 = vmul.f32 %v3009_v22, %v8343_v28  ;;  %v6788_v44 = vpop.eup %6787  ;;  %v3438_v32 = vmul.f32 1.442695, %v3308_v36 }
 0x338   : > { %3716 = vst.msk [vmem:[#allocation3 + $0xd0] sm:$0xff] %vm842_vm6, %v6782_v0  ;;  %v3317_v27 = vmul.f32 %v3009_v22, %v8348_v13  ;;  %3717 = vst.msk [vmem:[#allocation3 + $0xd8] sm:$0xff] %vm842_vm6, %v6784_v56  ;;  %v3318_v17 = vmul.f32 %v3013_v30, %v8343_v28  ;;  %v3319_v1 = vmul.f32 %v3013_v30, %v8348_v13  ;;  %v6790_v25 = vpop.eup %6789  ;;  %v3440_v11 = vmul.f32 1.442695, %v3309_v57  ;;  %v8530_v7 = vpop.permute.xlu1 %4284 }
 0x339   : > { %v3320_v62 = vmul.f32 %v3017_v2, %v8343_v28  ;;  %v3321_v58 = vmul.f32 %v3017_v2, %v8348_v13  ;;  %3718 = vst.msk [vmem:[#allocation3 + $0xe0] sm:$0xff] %vm842_vm6, %v6786_v54  ;;  %v4609_v46 = vrot.slane %v8318_v37, %v8299_v47  ;;  %3719 = vst.msk [vmem:[#allocation3 + $0xe8] sm:$0xff] %vm842_vm6, %v6788_v44  ;;  %v3442_v15 = vmul.f32 1.442695, %v3310_v12  ;;  %v6792_v23 = vpop.eup %6791 }
 0x33a   : > { %v3444_v63 = vmul.f32 1.442695, %v3311_v3  ;;  %v4616_v14 = vrot.slane %v4602_v39, %v8299_v47  ;;  %3720 = vst.msk [vmem:[#allocation3 + $0xf0] sm:$0xff] %vm842_vm6, %v6790_v25  ;;  %6793 = vpow2.f32 %v3434_v40  ;;  %v3446_v51 = vmul.f32 1.442695, %v3312_v55  ;;  %3721 = vst.msk [vmem:[#allocation3 + $0xf8] sm:$0xff] %vm842_vm6, %v6792_v23 }
 0x33b   : > { %v3448_v43 = vmul.f32 1.442695, %v3313_v6  ;;  %v3450_v38 = vmul.f32 1.442695, %v3314_v29  ;;  %6795 = vpow2.f32 %v3436_v59  ;;  %v3452_v60 = vmul.f32 1.442695, %v3315_v24  ;;  %v8548_v6 = vpop.permute.xlu0 %4292 }
 0x33c   : > { %v3454_v37 = vmul.f32 1.442695, %v3316_v35  ;;  %v3456_v61 = vmul.f32 1.442695, %v3317_v27  ;;  %6797 = vpow2.f32 %v3438_v32  ;;  %v3458_v33 = vmul.f32 1.442695, %v3318_v17 }
 0x33d   : > { %v3460_v8 = vmul.f32 1.442695, %v3319_v1  ;;  %v3462_v22 = vmul.f32 1.442695, %v3320_v62  ;;  %6799 = vpow2.f32 %v3440_v11  ;;  %v8528_v39 = vmul.f32 1.442695, %v3321_v58  ;;  %v8556_v1 = vpop.permute.xlu1 %4296 }
 0x33e   : > { %v4617_v30 = vcombine.high %v4609_v46, %v4609_v46  ;;  %v4618_v4 = vcombine.high %v4616_v14, %v4616_v14  ;;  %6801 = vpow2.f32 %v3442_v15  ;;  %v4625_v49 = vrot.slane %v4609_v46, %v8299_v47  ;;  %v9677_v40 = vld [vmem:[#allocation25_spill] sm:$0xff]  ;;  %v9678_v46 = vld [vmem:[#allocation23_spill] sm:$0xff] }
 0x33f   : > { %v4632_v19 = vrot.slane %v4616_v14, %v8299_v47  ;;  %v9675_v2 = vmax.f32 %v8260_v53, 0.0  ;;  %6803 = vpow2.f32 %v3444_v63  ;;  %v9676_v12 = vmax.f32 %v8263_v45, 0.0  ;;  %v9679_v11 = vld [vmem:[#allocation27_spill] sm:$0xff]  ;;  %v9680_v63 = vld [vmem:[#allocation24_spill] sm:$0xff] }
 0x340   : > { %v4639_v57 = vrot.slane %v4617_v30, %v8299_v47  ;;  %v4646_v0 = vrot.slane %v4618_v4, %v8299_v47  ;;  %6805 = vpow2.f32 %v3446_v51  ;;  %v4647_v29 = vcombine.high %v4625_v49, %v4625_v49  ;;  %v9681_v51 = vld [vmem:[#allocation29_spill] sm:$0xff] }
 0x341   : > { %v8537_v36 = vadd.f32 %v8312_v21, %v9675_v2  ;;  %v8544_v3 = vadd.f32 %v8320_v5, %v9676_v12  ;;  %v4648_v24 = vcombine.high %v4632_v19, %v4632_v19  ;;  %v4997_v56 = vrot.slane %v4625_v49, %v7746_v20  ;;  %v9685_v30 = vld [vmem:[#allocation33_spill] sm:$0xff]  ;;  %v9686_v49 = vld [vmem:[#allocation30_spill] sm:$0xff]  ;;  %v1716_v2 = vpop.permute.xlu0 %1715  ;;  %v9688_v12 = vld [vmem:[#allocation32_spill] sm:$0xff] }
 0x342   : > { %6807 = vpow2.f32 %v3448_v43  ;;  %v4649_v53 = vcombine.high %v4639_v57, %v4639_v57  ;;  %v4650_v55 = vcombine.high %v4646_v0, %v4646_v0  ;;  %v5001_v21 = vrot.slane %v4639_v57, %v7746_v20  ;;  %v9682_v43 = vld [vmem:[#allocation26_spill] sm:$0xff]  ;;  %1734 = vst.msk [vmem:[#allocation5 + $0x30] sm:$0xff] %vm1727_vm3, %v1716_v2 }
 0x343   : > { %6809 = vpow2.f32 %v3450_v38  ;;  %v5005_v35 = vrot.slane %v4647_v29, %v7746_v20  ;;  %v5013_v45 = vrot.slane %v4632_v19, %v7746_v20  ;;  %v5017_v5 = vrot.slane %v4646_v0, %v7746_v20  ;;  %v9683_v38 = vld [vmem:[#allocation31_spill] sm:$0xff] }
 0x344   : > { %6811 = vpow2.f32 %v3452_v60  ;;  %v5009_v27 = vrot.slane %v4649_v53, %v7746_v20  ;;  %v5021_v54 = vrot.slane %v4648_v24, %v7746_v20  ;;  %v5025_v17 = vrot.slane %v4650_v55, %v7746_v20  ;;  %v6794_v62 = vpop.eup %6793  ;;  %v9689_v24 = vld [vmem:[#allocation36_spill] sm:$0xff] }
 0x345   : > { %6813 = vpow2.f32 %v3454_v37  ;;  %v5314_v58 = vmul.f32 %v4997_v56, %v8080_v34  ;;  %v5315_v44 = vmul.f32 %v4997_v56, %v8072_v9  ;;  %v5316_v59 = vmul.f32 %v5001_v21, %v9677_v40  ;;  %v6796_v32 = vpop.eup %6795  ;;  %3690 = vst.msk [vmem:[#allocation3] sm:$0xff] %vm842_vm6, %v6794_v62  ;;  %v9692_v62 = vld [vmem:[#allocation9_spill] sm:$0xff] }
 0x346   : > { %6815 = vpow2.f32 %v3456_v61  ;;  %v5317_v25 = vmul.f32 %v5001_v21, %v9678_v46  ;;  %v5318_v15 = vmul.f32 %v5005_v35, %v9679_v11  ;;  %v5319_v14 = vmul.f32 %v5005_v35, %v9680_v63  ;;  %v6798_v23 = vpop.eup %6797  ;;  %3691 = vst.msk [vmem:[#allocation3 + $0x8] sm:$0xff] %vm842_vm6, %v6796_v32  ;;  %v9684_v61 = vld [vmem:[#allocation28_spill] sm:$0xff]  ;;  %v9693_v32 = vld [vmem:[#allocation90_spill] sm:$0xff] }
 0x347   : > { %6817 = vpow2.f32 %v3458_v33  ;;  %v5320_v34 = vmul.f32 %v5009_v27, %v9681_v51  ;;  %v5321_v9 = vmul.f32 %v5009_v27, %v9682_v43  ;;  %v5322_v60 = vmul.f32 %v5013_v45, %v9683_v38  ;;  %5442 = vst.msk [vmem:[#allocation4] sm:$0xff] %vm842_vm6, %v5314_v58  ;;  %5443 = vst.msk [vmem:[#allocation4 + $0x8] sm:$0xff] %vm842_vm6, %v5315_v44  ;;  %v6800_v37 = vpop.eup %6799 }
 0x348   : > { %5444 = vst.msk [vmem:[#allocation4 + $0x10] sm:$0xff] %vm842_vm6, %v5316_v59  ;;  %6819 = vpow2.f32 %v3460_v8  ;;  %3692 = vst.msk [vmem:[#allocation3 + $0x10] sm:$0xff] %vm842_vm6, %v6798_v23  ;;  %v5323_v33 = vmul.f32 %v5013_v45, %v9684_v61  ;;  %v5324_v4 = vmul.f32 %v5017_v5, %v9685_v30  ;;  %v5325_v19 = vmul.f32 %v5017_v5, %v9686_v49  ;;  %v6802_v57 = vpop.eup %6801  ;;  %v9687_v8 = vld [vmem:[#allocation35_spill] sm:$0xff]  ;;  %v1718_v45 = vpop.permute.xlu1 %1717 }
 0x349   : > { %5445 = vst.msk [vmem:[#allocation4 + $0x18] sm:$0xff] %vm842_vm6, %v5317_v25  ;;  %5446 = vst.msk [vmem:[#allocation4 + $0x20] sm:$0xff] %vm842_vm6, %v5318_v15  ;;  %6821 = vpow2.f32 %v3462_v22  ;;  %v5326_v0 = vmul.f32 %v5021_v54, %v9687_v8  ;;  %v5327_v29 = vmul.f32 %v5021_v54, %v9688_v12  ;;  %v5328_v56 = vmul.f32 %v5025_v17, %v9689_v24  ;;  %v6804_v53 = vpop.eup %6803  ;;  %v9690_v22 = vld [vmem:[#allocation34_spill] sm:$0xff] }
 0x34a   : > { %5447 = vst.msk [vmem:[#allocation4 + $0x28] sm:$0xff] %vm842_vm6, %v5319_v14  ;;  %3693 = vst.msk [vmem:[#allocation3 + $0x18] sm:$0xff] %vm842_vm6, %v6800_v37  ;;  %6823 = vpow2.f32 %v8528_v39  ;;  %v5329_v55 = vmul.f32 %v5025_v17, %v9690_v22  ;;  %v2739_v21 = vcombine.high %v8537_v36, %v8537_v36  ;;  %v2746_v35 = vrot.slane %v8537_v36, %v8299_v47  ;;  %v6806_v5 = vpop.eup %6805  ;;  %v9691_v39 = vld [vmem:[#allocation10_spill] sm:$0xff] }
 0x34b   : > { %5448 = vst.msk [vmem:[#allocation4 + $0x30] sm:$0xff] %vm842_vm6, %v5320_v34  ;;  %5449 = vst.msk [vmem:[#allocation4 + $0x38] sm:$0xff] %vm842_vm6, %v5321_v9  ;;  %v4589_v27 = vmul.f32 %v8537_v36, %v9691_v39  ;;  %v2690_v54 = vcombine.high %v8544_v3, %v8544_v3  ;;  %v8607_v17 = vrot.slane %v8544_v3, %v8299_v47  ;;  %v8619_v46 = vmul.f32 0.6931472, %v9693_v32 }
 0x34c   : > { %5450 = vst.msk [vmem:[#allocation4 + $0x40] sm:$0xff] %vm842_vm6, %v5322_v60  ;;  %3694 = vst.msk [vmem:[#allocation3 + $0x20] sm:$0xff] %vm842_vm6, %v6802_v57  ;;  %v8611_v58 = vmul.f32 %v8544_v3, %v9692_v62  ;;  %v6808_v44 = vpop.eup %6807  ;;  %v2753_v36 = vrot.slane %v2739_v21, %v8299_v47  ;;  %v2754_v40 = vcombine.high %v2746_v35, %v2746_v35 }
 0x34d   : > { %5451 = vst.msk [vmem:[#allocation4 + $0x48] sm:$0xff] %vm842_vm6, %v5323_v33  ;;  %5452 = vst.msk [vmem:[#allocation4 + $0x50] sm:$0xff] %vm842_vm6, %v5324_v4  ;;  %v2762_v59 = vrot.slane %v2746_v35, %v8299_v47  ;;  %v6810_v25 = vpop.eup %6809  ;;  %v4749_v3 = vcombine.high %v4589_v27, %v4589_v27  ;;  %v8623_v11 = vrot.slane %v4589_v27, %v8299_v47 }
 0x34e   : > { %5453 = vst.msk [vmem:[#allocation4 + $0x58] sm:$0xff] %vm842_vm6, %v5325_v19  ;;  %3695 = vst.msk [vmem:[#allocation3 + $0x28] sm:$0xff] %vm842_vm6, %v6804_v53  ;;  %v8626_v15 = vrot.slane %v2690_v54, %v8299_v47  ;;  %v2705_v63 = vcombine.high %v8607_v17, %v8607_v17  ;;  %v6812_v14 = vpop.eup %6811  ;;  %v2755_v23 = vcombine.high %v2753_v36, %v2753_v36 }
 0x34f   : > { %5454 = vst.msk [vmem:[#allocation4 + $0x60] sm:$0xff] %vm842_vm6, %v5326_v0  ;;  %5455 = vst.msk [vmem:[#allocation4 + $0x68] sm:$0xff] %vm842_vm6, %v5327_v29  ;;  %v2769_v51 = vrot.slane %v2753_v36, %v8299_v47  ;;  %v2776_v34 = vrot.slane %v2754_v40, %v8299_v47  ;;  %v2784_v43 = vcombine.high %v2762_v59, %v2762_v59  ;;  %v6814_v9 = vpop.eup %6813 }
 0x350   : > { %5456 = vst.msk [vmem:[#allocation4 + $0x70] sm:$0xff] %vm842_vm6, %v5328_v56  ;;  %3696 = vst.msk [vmem:[#allocation3 + $0x30] sm:$0xff] %vm842_vm6, %v6806_v5  ;;  %v3085_v38 = vrot.slane %v2762_v59, %v7746_v20  ;;  %v8636_v60 = vrot.slane %v4749_v3, %v8299_v47  ;;  %v4764_v37 = vcombine.high %v8623_v11, %v8623_v11  ;;  %v6816_v33 = vpop.eup %6815 }
 0x351   : > { %1735 = vst.msk [vmem:[#allocation5 + $0x38] sm:$0xff] %vm1727_vm3, %v1718_v45  ;;  %v8642_v61 = vrot.slane %v8623_v11, %v8299_v47  ;;  %v2783_v30 = vrot.slane %v2755_v23, %v8299_v47  ;;  %v2785_v4 = vcombine.high %v2769_v51, %v2769_v51  ;;  %v2786_v49 = vcombine.high %v2776_v34, %v2776_v34  ;;  %v6818_v2 = vpop.eup %6817 }
 0x352   : > { %5457 = vst.msk [vmem:[#allocation4 + $0x78] sm:$0xff] %vm842_vm6, %v5329_v55  ;;  %3697 = vst.msk [vmem:[#allocation3 + $0x38] sm:$0xff] %vm842_vm6, %v6808_v44  ;;  %v3089_v19 = vrot.slane %v2776_v34, %v7746_v20  ;;  %v3093_v57 = vrot.slane %v2784_v43, %v7746_v20  ;;  %v3101_v8 = vrot.slane %v2769_v51, %v7746_v20  ;;  %v6820_v29 = vpop.eup %6819 }
 0x353   : > { %3698 = vst.msk [vmem:[#allocation3 + $0x40] sm:$0xff] %vm842_vm6, %v6810_v25  ;;  %3699 = vst.msk [vmem:[#allocation3 + $0x48] sm:$0xff] %vm842_vm6, %v6812_v14  ;;  %v3354_v0 = vmul.f32 %v3085_v38, %v8343_v28  ;;  %v3355_v12 = vmul.f32 %v3085_v38, %v8348_v13  ;;  %v2787_v24 = vcombine.high %v2783_v30, %v2783_v30  ;;  %v6822_v55 = vpop.eup %6821 }
 0x354   : > { %3700 = vst.msk [vmem:[#allocation3 + $0x50] sm:$0xff] %vm842_vm6, %v6814_v9  ;;  %3701 = vst.msk [vmem:[#allocation3 + $0x58] sm:$0xff] %vm842_vm6, %v6816_v33  ;;  %v3097_v56 = vrot.slane %v2786_v49, %v7746_v20  ;;  %v3105_v53 = vrot.slane %v2783_v30, %v7746_v20  ;;  %v3109_v22 = vrot.slane %v2785_v4, %v7746_v20  ;;  %v6824_v39 = vpop.eup %6823 }
 0x355   : > { %3702 = vst.msk [vmem:[#allocation3 + $0x60] sm:$0xff] %vm842_vm6, %v6818_v2  ;;  %3703 = vst.msk [vmem:[#allocation3 + $0x68] sm:$0xff] %vm842_vm6, %v6820_v29  ;;  %v3356_v21 = vmul.f32 %v3089_v19, %v8343_v28  ;;  %v3357_v35 = vmul.f32 %v3089_v19, %v8348_v13  ;;  %v3358_v45 = vmul.f32 %v3093_v57, %v8343_v28  ;;  %v3530_v23 = vmul.f32 1.442695, %v3354_v0 }
 0x356   : > { %v3359_v5 = vmul.f32 %v3093_v57, %v8348_v13  ;;  %3704 = vst.msk [vmem:[#allocation3 + $0x70] sm:$0xff] %vm842_vm6, %v6822_v55  ;;  %v3113_v27 = vrot.slane %v2787_v24, %v7746_v20  ;;  %v3360_v54 = vmul.f32 %v3097_v56, %v8343_v28  ;;  %v3361_v62 = vmul.f32 %v3097_v56, %v8348_v13 }
 0x357   : > { %v3362_v44 = vmul.f32 %v3101_v8, %v8343_v28  ;;  %3705 = vst.msk [vmem:[#allocation3 + $0x78] sm:$0xff] %vm842_vm6, %v6824_v39  ;;  %v3363_v36 = vmul.f32 %v3101_v8, %v8348_v13  ;;  %v3364_v40 = vmul.f32 %v3105_v53, %v8343_v28  ;;  %v3365_v59 = vmul.f32 %v3105_v53, %v8348_v13 }
 0x358   : > { %v3366_v32 = vmul.f32 %v3109_v22, %v8343_v28  ;;  %v3367_v25 = vmul.f32 %v3109_v22, %v8348_v13  ;;  %v3368_v3 = vmul.f32 %v3113_v27, %v8343_v28  ;;  %v3369_v14 = vmul.f32 %v3113_v27, %v8348_v13 }
 0x359   : > { %v3532_v51 = vmul.f32 1.442695, %v3355_v12  ;;  %v3534_v34 = vmul.f32 1.442695, %v3356_v21  ;;  %v3536_v43 = vmul.f32 1.442695, %v3357_v35  ;;  %v4765_v9 = vcombine.high %v8636_v60, %v8636_v60 }
 0x35a   : > { %6825 = vpow2.f32 %v3530_v23  ;;  %v3538_v38 = vmul.f32 1.442695, %v3358_v45  ;;  %v3540_v33 = vmul.f32 1.442695, %v3359_v5  ;;  %v3542_v30 = vmul.f32 1.442695, %v3360_v54 }
 0x35b   : > { %6827 = vpow2.f32 %v3532_v51  ;;  %v3544_v4 = vmul.f32 1.442695, %v3361_v62  ;;  %v3546_v49 = vmul.f32 1.442695, %v3362_v44  ;;  %v3548_v19 = vmul.f32 1.442695, %v3363_v36 }
 0x35c   : > { %6829 = vpow2.f32 %v3534_v34  ;;  %v3550_v2 = vmul.f32 1.442695, %v3364_v40  ;;  %v3552_v57 = vmul.f32 1.442695, %v3365_v59  ;;  %v3554_v8 = vmul.f32 1.442695, %v3366_v32 }
 0x35d   : > { %6831 = vpow2.f32 %v3536_v43  ;;  %v3556_v0 = vmul.f32 1.442695, %v3367_v25  ;;  %v3558_v12 = vmul.f32 1.442695, %v3368_v3  ;;  %v8676_v29 = vmul.f32 1.442695, %v3369_v14 }
 0x35e   : > { %6833 = vpow2.f32 %v3538_v38  ;;  %v4779_v24 = vrot.slane %v8636_v60, %v8299_v47  ;;  %v4786_v56 = vrot.slane %v4764_v37, %v8299_v47  ;;  %v4793_v53 = vrot.slane %v4765_v9, %v8299_v47  ;;  %v9694_v62 = vld [vmem:[#allocation37_spill] sm:$0xff]  ;;  %v9695_v36 = vld [vmem:[#allocation38_spill] sm:$0xff]  ;;  %v9696_v32 = vld [vmem:[#allocation39_spill] sm:$0xff] }
 0x35f   : > { %6835 = vpow2.f32 %v3540_v33  ;;  %v4794_v22 = vcombine.high %v8642_v61, %v8642_v61  ;;  %v5093_v55 = vrot.slane %v8642_v61, %v7746_v20  ;;  %v2706_v21 = vcombine.high %v8626_v15, %v8626_v15  ;;  %v9697_v3 = vld [vmem:[#allocation40_spill] sm:$0xff]  ;;  %v9698_v23 = vld [vmem:[#allocation41_spill] sm:$0xff]  ;;  %v9699_v43 = vld [vmem:[#allocation42_spill] sm:$0xff] }
 0x360   : > { %6837 = vpow2.f32 %v3542_v30  ;;  %v4795_v35 = vcombine.high %v4779_v24, %v4779_v24  ;;  %v4796_v60 = vcombine.high %v4786_v56, %v4786_v56  ;;  %v4797_v45 = vcombine.high %v4793_v53, %v4793_v53  ;;  %v9700_v38 = vld [vmem:[#allocation43_spill] sm:$0xff]  ;;  %v9701_v30 = vld [vmem:[#allocation44_spill] sm:$0xff] }
 0x361   : > { %6839 = vpow2.f32 %v3544_v4  ;;  %v5097_v11 = vrot.slane %v4786_v56, %v7746_v20  ;;  %v5101_v37 = vrot.slane %v4794_v22, %v7746_v20  ;;  %v5109_v5 = vrot.slane %v4779_v24, %v7746_v20  ;;  %v9703_v24 = vld [vmem:[#allocation46_spill] sm:$0xff]  ;;  %v9704_v56 = vld [vmem:[#allocation47_spill] sm:$0xff] }
 0x362   : > { %6841 = vpow2.f32 %v3546_v49  ;;  %v5105_v39 = vrot.slane %v4796_v60, %v7746_v20  ;;  %v5113_v27 = vrot.slane %v4793_v53, %v7746_v20  ;;  %v5117_v61 = vrot.slane %v4795_v35, %v7746_v20  ;;  %v9706_v35 = vld [vmem:[#allocation49_spill] sm:$0xff] }
 0x363   : > { %6843 = vpow2.f32 %v3548_v19  ;;  %v5121_v54 = vrot.slane %v4797_v45, %v7746_v20  ;;  %v5362_v44 = vmul.f32 %v5093_v55, %v9694_v62  ;;  %v5363_v40 = vmul.f32 %v5093_v55, %v9695_v36  ;;  %v9702_v19 = vld [vmem:[#allocation45_spill] sm:$0xff]  ;;  %v9705_v55 = vld [vmem:[#allocation48_spill] sm:$0xff]  ;;  %v9707_v45 = vld [vmem:[#allocation50_spill] sm:$0xff] }
 0x364   : > { %v6826_v59 = vpop.eup %6825  ;;  %6845 = vpow2.f32 %v3550_v2  ;;  %v5364_v25 = vmul.f32 %v5097_v11, %v9696_v32  ;;  %v5365_v14 = vmul.f32 %v5097_v11, %v9697_v3  ;;  %v5366_v51 = vmul.f32 %v5101_v37, %v9698_v23 }
 0x365   : > { %v6828_v34 = vpop.eup %6827  ;;  %6847 = vpow2.f32 %v3552_v57  ;;  %3738 = vst.msk [vmem:[#allocation3 + $0x180] sm:$0xff] %vm842_vm6, %v6826_v59  ;;  %v5367_v9 = vmul.f32 %v5101_v37, %v9699_v43  ;;  %v5368_v33 = vmul.f32 %v5105_v39, %v9700_v38  ;;  %v5369_v4 = vmul.f32 %v5105_v39, %v9701_v30  ;;  %5490 = vst.msk [vmem:[#allocation4 + $0x180] sm:$0xff] %vm842_vm6, %v5362_v44  ;;  %v9709_v39 = vld [vmem:[#allocation52_spill] sm:$0xff] }
 0x366   : > { %5491 = vst.msk [vmem:[#allocation4 + $0x188] sm:$0xff] %vm842_vm6, %v5363_v40  ;;  %v6830_v49 = vpop.eup %6829  ;;  %6849 = vpow2.f32 %v3554_v8  ;;  %3739 = vst.msk [vmem:[#allocation3 + $0x188] sm:$0xff] %vm842_vm6, %v6828_v34  ;;  %v5370_v2 = vmul.f32 %v5109_v5, %v9702_v19  ;;  %v5371_v57 = vmul.f32 %v5109_v5, %v9703_v24  ;;  %v5372_v53 = vmul.f32 %v5113_v27, %v9704_v56  ;;  %v9708_v5 = vld [vmem:[#allocation51_spill] sm:$0xff] }
 0x367   : > { %5492 = vst.msk [vmem:[#allocation4 + $0x190] sm:$0xff] %vm842_vm6, %v5364_v25  ;;  %5493 = vst.msk [vmem:[#allocation4 + $0x198] sm:$0xff] %vm842_vm6, %v5365_v14  ;;  %v6832_v22 = vpop.eup %6831  ;;  %6851 = vpow2.f32 %v3556_v0  ;;  %v5373_v8 = vmul.f32 %v5113_v27, %v9705_v55  ;;  %v5374_v60 = vmul.f32 %v5117_v61, %v9706_v35  ;;  %v5375_v11 = vmul.f32 %v5117_v61, %v9707_v45 }
 0x368   : > { %5494 = vst.msk [vmem:[#allocation4 + $0x1a0] sm:$0xff] %vm842_vm6, %v5366_v51  ;;  %3740 = vst.msk [vmem:[#allocation3 + $0x190] sm:$0xff] %vm842_vm6, %v6830_v49  ;;  %v6834_v37 = vpop.eup %6833  ;;  %6853 = vpow2.f32 %v3558_v12  ;;  %v5376_v0 = vmul.f32 %v5121_v54, %v9708_v5  ;;  %v5377_v62 = vmul.f32 %v5121_v54, %v9709_v39  ;;  %v2713_v27 = vrot.slane %v8607_v17, %v8299_v47 }
 0x369   : > { %5495 = vst.msk [vmem:[#allocation4 + $0x1a8] sm:$0xff] %vm842_vm6, %v5367_v9  ;;  %5496 = vst.msk [vmem:[#allocation4 + $0x1b0] sm:$0xff] %vm842_vm6, %v5368_v33  ;;  %v6836_v61 = vpop.eup %6835  ;;  %6855 = vpow2.f32 %v8676_v29  ;;  %v2720_v12 = vrot.slane %v8626_v15, %v8299_v47  ;;  %v2727_v54 = vrot.slane %v2705_v63, %v8299_v47  ;;  %v2734_v29 = vrot.slane %v2706_v21, %v8299_v47 }
 0x36a   : > { %5497 = vst.msk [vmem:[#allocation4 + $0x1b8] sm:$0xff] %vm842_vm6, %v5369_v4  ;;  %3741 = vst.msk [vmem:[#allocation3 + $0x198] sm:$0xff] %vm842_vm6, %v6832_v22  ;;  %v6838_v44 = vpop.eup %6837  ;;  %v2735_v36 = vcombine.high %v2713_v27, %v2713_v27  ;;  %v3053_v40 = vrot.slane %v2713_v27, %v7746_v20  ;;  %v4700_v59 = vcombine.high %v8611_v58, %v8611_v58 }
 0x36b   : > { %5498 = vst.msk [vmem:[#allocation4 + $0x1c0] sm:$0xff] %vm842_vm6, %v5370_v2  ;;  %5499 = vst.msk [vmem:[#allocation4 + $0x1c8] sm:$0xff] %vm842_vm6, %v5371_v57  ;;  %v8754_v17 = vrot.slane %v8611_v58, %v8299_v47  ;;  %v6840_v63 = vpop.eup %6839  ;;  %v2736_v15 = vcombine.high %v2720_v12, %v2720_v12  ;;  %v2737_v21 = vcombine.high %v2727_v54, %v2727_v54 }
 0x36c   : > { %5500 = vst.msk [vmem:[#allocation4 + $0x1d0] sm:$0xff] %vm842_vm6, %v5372_v53  ;;  %3742 = vst.msk [vmem:[#allocation3 + $0x1a0] sm:$0xff] %vm842_vm6, %v6834_v37  ;;  %v2738_v32 = vcombine.high %v2734_v29, %v2734_v29  ;;  %v3057_v25 = vrot.slane %v2727_v54, %v7746_v20  ;;  %v6842_v3 = vpop.eup %6841  ;;  %v3061_v14 = vrot.slane %v2735_v36, %v7746_v20 }
 0x36d   : > { %5501 = vst.msk [vmem:[#allocation4 + $0x1d8] sm:$0xff] %vm842_vm6, %v5373_v8  ;;  %5502 = vst.msk [vmem:[#allocation4 + $0x1e0] sm:$0xff] %vm842_vm6, %v5374_v60  ;;  %v3069_v23 = vrot.slane %v2720_v12, %v7746_v20  ;;  %v3073_v51 = vrot.slane %v2734_v29, %v7746_v20  ;;  %v3338_v58 = vmul.f32 %v3053_v40, %v8343_v28  ;;  %v6844_v34 = vpop.eup %6843 }
 0x36e   : > { %5503 = vst.msk [vmem:[#allocation4 + $0x1e8] sm:$0xff] %vm842_vm6, %v5375_v11  ;;  %3743 = vst.msk [vmem:[#allocation3 + $0x1a8] sm:$0xff] %vm842_vm6, %v6836_v61  ;;  %v3065_v43 = vrot.slane %v2737_v21, %v7746_v20  ;;  %v3077_v9 = vrot.slane %v2736_v15, %v7746_v20  ;;  %v3081_v38 = vrot.slane %v2738_v32, %v7746_v20  ;;  %v6846_v30 = vpop.eup %6845 }
 0x36f   : > { %5504 = vst.msk [vmem:[#allocation4 + $0x1f0] sm:$0xff] %vm842_vm6, %v5376_v0  ;;  %5505 = vst.msk [vmem:[#allocation4 + $0x1f8] sm:$0xff] %vm842_vm6, %v5377_v62  ;;  %v3339_v33 = vmul.f32 %v3053_v40, %v8348_v13  ;;  %v3340_v4 = vmul.f32 %v3057_v25, %v8343_v28  ;;  %v3341_v49 = vmul.f32 %v3057_v25, %v8348_v13  ;;  %v6848_v24 = vpop.eup %6847  ;;  %v3498_v0 = vmul.f32 1.442695, %v3338_v58 }
 0x370   : > { %3744 = vst.msk [vmem:[#allocation3 + $0x1b0] sm:$0xff] %vm842_vm6, %v6838_v44  ;;  %3745 = vst.msk [vmem:[#allocation3 + $0x1b8] sm:$0xff] %vm842_vm6, %v6840_v63  ;;  %v3342_v19 = vmul.f32 %v3061_v14, %v8343_v28  ;;  %v3343_v2 = vmul.f32 %v3061_v14, %v8348_v13  ;;  %v3344_v57 = vmul.f32 %v3065_v43, %v8343_v28  ;;  %v6850_v55 = vpop.eup %6849 }
 0x371   : > { %3746 = vst.msk [vmem:[#allocation3 + $0x1c0] sm:$0xff] %vm842_vm6, %v6842_v3  ;;  %3747 = vst.msk [vmem:[#allocation3 + $0x1c8] sm:$0xff] %vm842_vm6, %v6844_v34  ;;  %v3345_v56 = vmul.f32 %v3065_v43, %v8348_v13  ;;  %v3346_v53 = vmul.f32 %v3069_v23, %v8343_v28  ;;  %v3347_v22 = vmul.f32 %v3069_v23, %v8348_v13  ;;  %v6852_v11 = vpop.eup %6851  ;;  %v3500_v39 = vmul.f32 1.442695, %v3339_v33  ;;  %v9710_v34 = vld [vmem:[#allocation75_spill] sm:$0xff] }
 0x372   : > { %3748 = vst.msk [vmem:[#allocation3 + $0x1d0] sm:$0xff] %vm842_vm6, %v6846_v30  ;;  %3749 = vst.msk [vmem:[#allocation3 + $0x1d8] sm:$0xff] %vm842_vm6, %v6848_v24  ;;  %v3348_v8 = vmul.f32 %v3073_v51, %v8343_v28  ;;  %v3349_v35 = vmul.f32 %v3073_v51, %v8348_v13  ;;  %v3350_v60 = vmul.f32 %v3077_v9, %v8343_v28  ;;  %v6854_v62 = vpop.eup %6853  ;;  %v3502_v27 = vmul.f32 1.442695, %v3340_v4 }
 0x373   : > { %v3351_v45 = vmul.f32 %v3077_v9, %v8348_v13  ;;  %3750 = vst.msk [vmem:[#allocation3 + $0x1e0] sm:$0xff] %vm842_vm6, %v6850_v55  ;;  %v3352_v37 = vmul.f32 %v3081_v38, %v8343_v28  ;;  %v3353_v5 = vmul.f32 %v3081_v38, %v8348_v13  ;;  %3751 = vst.msk [vmem:[#allocation3 + $0x1e8] sm:$0xff] %vm842_vm6, %v6852_v11  ;;  %v3504_v61 = vmul.f32 1.442695, %v3341_v49  ;;  %v6856_v29 = vpop.eup %6855  ;;  %v9712_v38 = vld [vmem:[#allocation91_spill] sm:$0xff] }
 0x374   : > { %v3506_v12 = vmul.f32 1.442695, %v3342_v19  ;;  %v4714_v54 = vrot.slane %v4700_v59, %v8299_v47  ;;  %3752 = vst.msk [vmem:[#allocation3 + $0x1f0] sm:$0xff] %vm842_vm6, %v6854_v62  ;;  %6857 = vpow2.f32 %v3498_v0  ;;  %v3508_v44 = vmul.f32 1.442695, %v3343_v2  ;;  %3753 = vst.msk [vmem:[#allocation3 + $0x1f8] sm:$0xff] %vm842_vm6, %v6856_v29 }
 0x375   : > { %v3510_v36 = vmul.f32 1.442695, %v3344_v57  ;;  %v3512_v40 = vmul.f32 1.442695, %v3345_v56  ;;  %6859 = vpow2.f32 %v3500_v39  ;;  %v3514_v28 = vmul.f32 1.442695, %v3346_v53 }
 0x376   : > { %v3516_v13 = vmul.f32 1.442695, %v3347_v22  ;;  %v3518_v63 = vmul.f32 1.442695, %v3348_v8  ;;  %6861 = vpow2.f32 %v3502_v27  ;;  %v3520_v15 = vmul.f32 1.442695, %v3349_v35 }
 0x377   : > { %v3522_v21 = vmul.f32 1.442695, %v3350_v60  ;;  %v3524_v32 = vmul.f32 1.442695, %v3351_v45  ;;  %6863 = vpow2.f32 %v3504_v61  ;;  %v3526_v25 = vmul.f32 1.442695, %v3352_v37 }
 0x378   : > { %v8790_v59 = vmul.f32 1.442695, %v3353_v5  ;;  %v4715_v3 = vcombine.high %v8754_v17, %v8754_v17  ;;  %6865 = vpow2.f32 %v3506_v12  ;;  %v4716_v14 = vcombine.high %v4714_v54, %v4714_v54  ;;  %v9713_v35 = vld [vmem:[#allocation53_spill] sm:$0xff]  ;;  %v9714_v45 = vld [vmem:[#allocation54_spill] sm:$0xff]  ;;  %v9715_v5 = vld [vmem:[#allocation55_spill] sm:$0xff] }
 0x379   : > { %v4723_v23 = vrot.slane %v8754_v17, %v8299_v47  ;;  %v4730_v51 = vrot.slane %v4714_v54, %v8299_v47  ;;  %6867 = vpow2.f32 %v3508_v44  ;;  %v9711_v43 = vmax.f32 %v9710_v34, 0.0  ;;  %v9716_v39 = vld [vmem:[#allocation56_spill] sm:$0xff]  ;;  %v9717_v27 = vld [vmem:[#allocation57_spill] sm:$0xff]  ;;  %v9718_v54 = vld [vmem:[#allocation58_spill] sm:$0xff] }
 0x37a   : > { %v4737_v58 = vrot.slane %v4715_v3, %v8299_v47  ;;  %v8804_v33 = vmul.f32 0.6931472, %v9712_v38  ;;  %6869 = vpow2.f32 %v3510_v36  ;;  %v4744_v30 = vrot.slane %v4716_v14, %v8299_v47  ;;  %v9719_v44 = vld [vmem:[#allocation59_spill] sm:$0xff]  ;;  %v9722_v3 = vld [vmem:[#allocation62_spill] sm:$0xff]  ;;  %v9725_v34 = vld [vmem:[#allocation65_spill] sm:$0xff] }
 0x37b   : > { %v8801_v9 = vadd.f32 %v8619_v46, %v9711_v43  ;;  %v4745_v4 = vcombine.high %v4723_v23, %v4723_v23  ;;  %v4746_v49 = vcombine.high %v4730_v51, %v4730_v51  ;;  %6871 = vpow2.f32 %v3512_v40  ;;  %v9720_v40 = vld [vmem:[#allocation60_spill] sm:$0xff]  ;;  %v9723_v14 = vld [vmem:[#allocation63_spill] sm:$0xff]  ;;  %v9726_v38 = vld [vmem:[#allocation66_spill] sm:$0xff] }
 0x37c   : > { %v4747_v17 = vcombine.high %v4737_v58, %v4737_v58  ;;  %v5061_v19 = vrot.slane %v4723_v23, %v7746_v20  ;;  %v5065_v2 = vrot.slane %v4737_v58, %v7746_v20  ;;  %6873 = vpow2.f32 %v3514_v28  ;;  %v9724_v58 = vld [vmem:[#allocation64_spill] sm:$0xff] }
 0x37d   : > { %v4748_v24 = vcombine.high %v4744_v30, %v4744_v30  ;;  %v5069_v57 = vrot.slane %v4745_v4, %v7746_v20  ;;  %v5077_v46 = vrot.slane %v4730_v51, %v7746_v20  ;;  %6875 = vpow2.f32 %v3516_v13 }
 0x37e   : > { %v5073_v56 = vrot.slane %v4747_v17, %v7746_v20  ;;  %v5081_v53 = vrot.slane %v4744_v30, %v7746_v20  ;;  %v5085_v22 = vrot.slane %v4746_v49, %v7746_v20  ;;  %v6858_v55 = vpop.eup %6857  ;;  %6877 = vpow2.f32 %v3518_v63  ;;  %v9721_v63 = vld [vmem:[#allocation61_spill] sm:$0xff]  ;;  %v9728_v17 = vld [vmem:[#allocation68_spill] sm:$0xff] }
 0x37f   : > { %v5089_v8 = vrot.slane %v4748_v24, %v7746_v20  ;;  %v5346_v60 = vmul.f32 %v5061_v19, %v9713_v35  ;;  %v5347_v11 = vmul.f32 %v5061_v19, %v9714_v45  ;;  %v6860_v37 = vpop.eup %6859  ;;  %6879 = vpow2.f32 %v3520_v15  ;;  %3722 = vst.msk [vmem:[#allocation3 + $0x100] sm:$0xff] %vm842_vm6, %v6858_v55  ;;  %v9732_v35 = vld [vmem:[#allocation92_spill] sm:$0xff] }
 0x380   : > { %v5348_v0 = vmul.f32 %v5065_v2, %v9715_v5  ;;  %v5349_v62 = vmul.f32 %v5065_v2, %v9716_v39  ;;  %v5350_v61 = vmul.f32 %v5069_v57, %v9717_v27  ;;  %v6862_v12 = vpop.eup %6861  ;;  %6881 = vpow2.f32 %v3522_v21  ;;  %3723 = vst.msk [vmem:[#allocation3 + $0x108] sm:$0xff] %vm842_vm6, %v6860_v37 }
 0x381   : > { %v5351_v29 = vmul.f32 %v5069_v57, %v9718_v54  ;;  %v5352_v36 = vmul.f32 %v5073_v56, %v9719_v44  ;;  %v5353_v28 = vmul.f32 %v5073_v56, %v9720_v40  ;;  %5474 = vst.msk [vmem:[#allocation4 + $0x100] sm:$0xff] %vm842_vm6, %v5346_v60  ;;  %5475 = vst.msk [vmem:[#allocation4 + $0x108] sm:$0xff] %vm842_vm6, %v5347_v11  ;;  %v6864_v13 = vpop.eup %6863  ;;  %6883 = vpow2.f32 %v3524_v32  ;;  %v9729_v57 = vld [vmem:[#allocation12_spill] sm:$0xff] }
 0x382   : > { %3724 = vst.msk [vmem:[#allocation3 + $0x110] sm:$0xff] %vm842_vm6, %v6862_v12  ;;  %v5354_v15 = vmul.f32 %v5077_v46, %v9721_v63  ;;  %v5355_v21 = vmul.f32 %v5077_v46, %v9722_v3  ;;  %v5356_v23 = vmul.f32 %v5081_v53, %v9723_v14  ;;  %5476 = vst.msk [vmem:[#allocation4 + $0x110] sm:$0xff] %vm842_vm6, %v5348_v0  ;;  %v6866_v51 = vpop.eup %6865  ;;  %6885 = vpow2.f32 %v3526_v25  ;;  %v9727_v25 = vld [vmem:[#allocation67_spill] sm:$0xff]  ;;  %v9730_v56 = vld [vmem:[#allocation76_spill] sm:$0xff] }
 0x383   : > { %5477 = vst.msk [vmem:[#allocation4 + $0x118] sm:$0xff] %vm842_vm6, %v5349_v62  ;;  %5478 = vst.msk [vmem:[#allocation4 + $0x120] sm:$0xff] %vm842_vm6, %v5350_v61  ;;  %v5357_v32 = vmul.f32 %v5081_v53, %v9724_v58  ;;  %v5358_v43 = vmul.f32 %v5085_v22, %v9725_v34  ;;  %v5359_v30 = vmul.f32 %v5085_v22, %v9726_v38  ;;  %v6868_v4 = vpop.eup %6867  ;;  %6887 = vpow2.f32 %v8790_v59  ;;  %v8909_v38 = vld [vmem:[%s9541_s7 + $0x8] sm:$0xff] }
 0x384   : > { %3725 = vst.msk [vmem:[#allocation3 + $0x118] sm:$0xff] %vm842_vm6, %v6864_v13  ;;  %5479 = vst.msk [vmem:[#allocation4 + $0x128] sm:$0xff] %vm842_vm6, %v5351_v29  ;;  %v5360_v49 = vmul.f32 %v5089_v8, %v9727_v25  ;;  %v5361_v19 = vmul.f32 %v5089_v8, %v9728_v17  ;;  %v2837_v2 = vcombine.high %v8801_v9, %v8801_v9  ;;  %v6870_v24 = vpop.eup %6869  ;;  %v9731_v53 = vmax.f32 %v9730_v56, 0.0 }
 0x385   : > { %5480 = vst.msk [vmem:[#allocation4 + $0x130] sm:$0xff] %vm842_vm6, %v5352_v36  ;;  %5481 = vst.msk [vmem:[#allocation4 + $0x138] sm:$0xff] %vm842_vm6, %v5353_v28  ;;  %v2844_v59 = vrot.slane %v8801_v9, %v8299_v47  ;;  %v4591_v46 = vmul.f32 %v8801_v9, %v9729_v57  ;;  %v6872_v55 = vpop.eup %6871  ;;  %v8868_v60 = vadd.f32 1.0, %v9732_v35 }
 0x386   : > { %3726 = vst.msk [vmem:[#allocation3 + $0x120] sm:$0xff] %vm842_vm6, %v6866_v51  ;;  %5482 = vst.msk [vmem:[#allocation4 + $0x140] sm:$0xff] %vm842_vm6, %v5354_v15  ;;  %v8861_v22 = vadd.f32 %v8804_v33, %v9731_v53  ;;  %v2851_v8 = vrot.slane %v2837_v2, %v8299_v47  ;;  %v6874_v45 = vpop.eup %6873 }
 0x387   : > { %5483 = vst.msk [vmem:[#allocation4 + $0x148] sm:$0xff] %vm842_vm6, %v5355_v21  ;;  %5484 = vst.msk [vmem:[#allocation4 + $0x150] sm:$0xff] %vm842_vm6, %v5356_v23  ;;  %v2852_v9 = vcombine.high %v2844_v59, %v2844_v59  ;;  %v2860_v11 = vrot.slane %v2844_v59, %v8299_v47  ;;  %v4847_v33 = vcombine.high %v4591_v46, %v4591_v46  ;;  %v6876_v5 = vpop.eup %6875  ;;  %v8900_v23 = vld [vmem:[%s9541_s7] sm:$0xff] }
 0x388   : > { %3727 = vst.msk [vmem:[#allocation3 + $0x128] sm:$0xff] %vm842_vm6, %v6868_v4  ;;  %5485 = vst.msk [vmem:[#allocation4 + $0x158] sm:$0xff] %vm842_vm6, %v5357_v32  ;;  %v8873_v37 = vrot.slane %v4591_v46, %v8299_v47  ;;  %v2853_v0 = vcombine.high %v2851_v8, %v2851_v8  ;;  %v2867_v39 = vrot.slane %v2851_v8, %v8299_v47  ;;  %v6878_v61 = vpop.eup %6877 }
 0x389   : > { %5486 = vst.msk [vmem:[#allocation4 + $0x160] sm:$0xff] %vm842_vm6, %v5358_v43  ;;  %5487 = vst.msk [vmem:[#allocation4 + $0x168] sm:$0xff] %vm842_vm6, %v5359_v30  ;;  %v2788_v62 = vcombine.high %v8861_v22, %v8861_v22  ;;  %v8881_v27 = vrot.slane %v8861_v22, %v8299_v47  ;;  %v2874_v12 = vrot.slane %v2852_v9, %v8299_v47  ;;  %v6880_v36 = vpop.eup %6879 }
 0x38a   : > { %3728 = vst.msk [vmem:[#allocation3 + $0x130] sm:$0xff] %vm842_vm6, %v6870_v24  ;;  %5488 = vst.msk [vmem:[#allocation4 + $0x170] sm:$0xff] %vm842_vm6, %v5360_v49  ;;  %v2882_v54 = vcombine.high %v2860_v11, %v2860_v11  ;;  %v3149_v29 = vrot.slane %v2860_v11, %v7746_v20  ;;  %v8887_v44 = vrot.slane %v4847_v33, %v8299_v47  ;;  %v6882_v15 = vpop.eup %6881 }
 0x38b   : > { %5489 = vst.msk [vmem:[#allocation4 + $0x178] sm:$0xff] %vm842_vm6, %v5361_v19  ;;  %3729 = vst.msk [vmem:[#allocation3 + $0x138] sm:$0xff] %vm842_vm6, %v6872_v55  ;;  %v2881_v40 = vrot.slane %v2853_v0, %v8299_v47  ;;  %v2883_v28 = vcombine.high %v2867_v39, %v2867_v39  ;;  %v3165_v13 = vrot.slane %v2867_v39, %v7746_v20  ;;  %v6884_v58 = vpop.eup %6883 }
 0x38c   : > { %3730 = vst.msk [vmem:[#allocation3 + $0x140] sm:$0xff] %vm842_vm6, %v6874_v45  ;;  %3731 = vst.msk [vmem:[#allocation3 + $0x148] sm:$0xff] %vm842_vm6, %v6876_v5  ;;  %v4862_v63 = vcombine.high %v8873_v37, %v8873_v37  ;;  %v2884_v3 = vcombine.high %v2874_v12, %v2874_v12  ;;  %v3153_v21 = vrot.slane %v2874_v12, %v7746_v20  ;;  %v6886_v4 = vpop.eup %6885 }
 0x38d   : > { %3732 = vst.msk [vmem:[#allocation3 + $0x150] sm:$0xff] %vm842_vm6, %v6878_v61  ;;  %3733 = vst.msk [vmem:[#allocation3 + $0x158] sm:$0xff] %vm842_vm6, %v6880_v36  ;;  %v3157_v14 = vrot.slane %v2882_v54, %v7746_v20  ;;  %v3386_v51 = vmul.f32 %v8900_v23, %v3149_v29  ;;  %v2885_v32 = vcombine.high %v2881_v40, %v2881_v40  ;;  %v6888_v2 = vpop.eup %6887 }
 0x38e   : > { %3734 = vst.msk [vmem:[#allocation3 + $0x160] sm:$0xff] %vm842_vm6, %v6882_v15  ;;  %v3169_v34 = vrot.slane %v2881_v40, %v7746_v20  ;;  %v3173_v43 = vrot.slane %v2883_v28, %v7746_v20  ;;  %v3387_v30 = vmul.f32 %v8909_v38, %v3149_v29  ;;  %3735 = vst.msk [vmem:[#allocation3 + $0x168] sm:$0xff] %vm842_vm6, %v6884_v58 }
 0x38f   : > { %v3161_v25 = vrot.slane %v2884_v3, %v7746_v20  ;;  %v3388_v49 = vmul.f32 %v8900_v23, %v3153_v21  ;;  %v3389_v17 = vmul.f32 %v8909_v38, %v3153_v21  ;;  %v3390_v19 = vmul.f32 %v8900_v23, %v3157_v14  ;;  %3736 = vst.msk [vmem:[#allocation3 + $0x170] sm:$0xff] %vm842_vm6, %v6886_v4 }
 0x390   : > { %v3177_v24 = vrot.slane %v2885_v32, %v7746_v20  ;;  %v3391_v59 = vmul.f32 %v8909_v38, %v3157_v14  ;;  %v3394_v57 = vmul.f32 %v8900_v23, %v3165_v13  ;;  %v3395_v46 = vmul.f32 %v8909_v38, %v3165_v13  ;;  %3737 = vst.msk [vmem:[#allocation3 + $0x178] sm:$0xff] %vm842_vm6, %v6888_v2 }
 0x391   : > { %v3392_v56 = vmul.f32 %v8900_v23, %v3161_v25  ;;  %v3393_v53 = vmul.f32 %v8909_v38, %v3161_v25  ;;  %v3396_v55 = vmul.f32 %v8900_v23, %v3169_v34  ;;  %v3397_v8 = vmul.f32 %v8909_v38, %v3169_v34 }
 0x392   : > { %v3398_v35 = vmul.f32 %v8900_v23, %v3173_v43  ;;  %v3399_v45 = vmul.f32 %v8909_v38, %v3173_v43  ;;  %v3400_v9 = vmul.f32 %v8900_v23, %v3177_v24  ;;  %v3401_v11 = vmul.f32 %v8909_v38, %v3177_v24 }
 0x393   : > { %v3594_v33 = vmul.f32 1.442695, %v3386_v51  ;;  %v3596_v5 = vmul.f32 1.442695, %v3387_v30  ;;  %v3598_v0 = vmul.f32 1.442695, %v3388_v49  ;;  %v4863_v39 = vcombine.high %v8887_v44, %v8887_v44 }
 0x394   : > { %v3600_v61 = vmul.f32 1.442695, %v3389_v17  ;;  %v3602_v12 = vmul.f32 1.442695, %v3390_v19  ;;  %v3604_v54 = vmul.f32 1.442695, %v3391_v59  ;;  %v4870_v29 = vrot.slane %v8873_v37, %v8299_v47 }
 0x395   : > { %6889 = vpow2.f32 %v3594_v33  ;;  %v3606_v36 = vmul.f32 1.442695, %v3392_v56  ;;  %v3608_v40 = vmul.f32 1.442695, %v3393_v53  ;;  %v3610_v28 = vmul.f32 1.442695, %v3394_v57 }
 0x396   : > { %6891 = vpow2.f32 %v3596_v5  ;;  %v3612_v13 = vmul.f32 1.442695, %v3395_v46  ;;  %v3614_v15 = vmul.f32 1.442695, %v3396_v55  ;;  %v3616_v3 = vmul.f32 1.442695, %v3397_v8 }
 0x397   : > { %6893 = vpow2.f32 %v3598_v0  ;;  %v3618_v21 = vmul.f32 1.442695, %v3398_v35  ;;  %v3620_v14 = vmul.f32 1.442695, %v3399_v45  ;;  %v8935_v51 = vmul.f32 1.442695, %v3400_v9 }
 0x398   : > { %6895 = vpow2.f32 %v3600_v61  ;;  %v8937_v58 = vmul.f32 1.442695, %v3401_v11  ;;  %v4877_v32 = vrot.slane %v8887_v44, %v8299_v47  ;;  %v4884_v37 = vrot.slane %v4862_v63, %v8299_v47  ;;  %v9733_v57 = vld [vmem:[#allocation69_spill] sm:$0xff]  ;;  %v9734_v56 = vld [vmem:[#allocation70_spill] sm:$0xff]  ;;  %v9735_v55 = vld [vmem:[#allocation71_spill] sm:$0xff] }
 0x399   : > { %6897 = vpow2.f32 %v3602_v12  ;;  %v4891_v34 = vrot.slane %v4863_v39, %v8299_v47  ;;  %v4892_v43 = vcombine.high %v4870_v29, %v4870_v29  ;;  %v5157_v30 = vrot.slane %v4870_v29, %v7746_v20  ;;  %v9736_v35 = vld [vmem:[#allocation72_spill] sm:$0xff]  ;;  %v9737_v9 = vld [vmem:[#allocation73_spill] sm:$0xff]  ;;  %v9738_v5 = vld [vmem:[#allocation74_spill] sm:$0xff]  ;;  %v8961_v29 = vpop.permute.xlu0 %4496 }
 0x39a   : > { %6899 = vpow2.f32 %v3604_v54  ;;  %v4893_v4 = vcombine.high %v4877_v32, %v4877_v32  ;;  %v4894_v25 = vcombine.high %v4884_v37, %v4884_v37  ;;  %v5161_v49 = vrot.slane %v4884_v37, %v7746_v20  ;;  %v9739_v39 = vld [vmem:[#allocation77_spill] sm:$0xff]  ;;  %v9740_v12 = vld [vmem:[#allocation78_spill] sm:$0xff] }
 0x39b   : > { %6901 = vpow2.f32 %v3606_v36  ;;  %v4895_v17 = vcombine.high %v4891_v34, %v4891_v34  ;;  %v5165_v19 = vrot.slane %v4892_v43, %v7746_v20  ;;  %v5173_v2 = vrot.slane %v4877_v32, %v7746_v20  ;;  %v9743_v32 = vld [vmem:[#allocation81_spill] sm:$0xff] }
 0x39c   : > { %6903 = vpow2.f32 %v3608_v40  ;;  %v5169_v44 = vrot.slane %v4894_v25, %v7746_v20  ;;  %v5177_v63 = vrot.slane %v4891_v34, %v7746_v20  ;;  %v5181_v24 = vrot.slane %v4893_v4, %v7746_v20  ;;  %v9741_v40 = vld [vmem:[#allocation79_spill] sm:$0xff]  ;;  %v8970_v34 = vpop.permute.xlu1 %4500  ;;  %v9745_v4 = vld [vmem:[#allocation84_spill] sm:$0xff] }
 0x39d   : > { %6905 = vpow2.f32 %v3610_v28  ;;  %v5185_v59 = vrot.slane %v4895_v17, %v7746_v20  ;;  %v5394_v46 = vmul.f32 %v5157_v30, %v9733_v57  ;;  %v5395_v53 = vmul.f32 %v5157_v30, %v9734_v56 }
 0x39e   : > { %6907 = vpow2.f32 %v3612_v13  ;;  %v5396_v8 = vmul.f32 %v5161_v49, %v9735_v55  ;;  %v5397_v45 = vmul.f32 %v5161_v49, %v9736_v35  ;;  %v5398_v11 = vmul.f32 %v5165_v19, %v9737_v9  ;;  %v9742_v13 = vld [vmem:[#allocation80_spill] sm:$0xff]  ;;  %v9746_v49 = vld [vmem:[#allocation85_spill] sm:$0xff]  ;;  %v9018_v9 = vpop.permute.xlu0 %4508 }
 0x39f   : > { %v6890_v33 = vpop.eup %6889  ;;  %6909 = vpow2.f32 %v3614_v15  ;;  %v5399_v0 = vmul.f32 %v5165_v19, %v9738_v5  ;;  %v5400_v61 = vmul.f32 %v5169_v44, %v9739_v39  ;;  %v5401_v54 = vmul.f32 %v5169_v44, %v9740_v12  ;;  %5522 = vst.msk [vmem:[#allocation4 + $0x280] sm:$0xff] %vm842_vm6, %v5394_v46  ;;  %5523 = vst.msk [vmem:[#allocation4 + $0x288] sm:$0xff] %vm842_vm6, %v5395_v53  ;;  %v9748_v44 = vld [vmem:[#allocation87_spill] sm:$0xff] }
 0x3a0   : > { %v6892_v36 = vpop.eup %6891  ;;  %6911 = vpow2.f32 %v3616_v3  ;;  %3770 = vst.msk [vmem:[#allocation3 + $0x280] sm:$0xff] %vm842_vm6, %v6890_v33  ;;  %v5402_v28 = vmul.f32 %v5173_v2, %v9741_v40  ;;  %v5403_v15 = vmul.f32 %v5173_v2, %v9742_v13  ;;  %v5404_v37 = vmul.f32 %v5177_v63, %v9743_v32  ;;  %5524 = vst.msk [vmem:[#allocation4 + $0x290] sm:$0xff] %vm842_vm6, %v5396_v8  ;;  %v9744_v3 = vld [vmem:[#allocation82_spill] sm:$0xff]  ;;  %v9749_v46 = vld [vmem:[#allocation11_spill] sm:$0xff]  ;;  %v9027_v39 = vpop.permute.xlu1 %4512 }
 0x3a1   : > { %5525 = vst.msk [vmem:[#allocation4 + $0x298] sm:$0xff] %vm842_vm6, %v5397_v45  ;;  %5526 = vst.msk [vmem:[#allocation4 + $0x2a0] sm:$0xff] %vm842_vm6, %v5398_v11  ;;  %v6894_v43 = vpop.eup %6893  ;;  %6913 = vpow2.f32 %v3618_v21  ;;  %v5405_v30 = vmul.f32 %v5177_v63, %v9744_v3  ;;  %v5406_v25 = vmul.f32 %v5181_v24, %v9745_v4  ;;  %v5407_v17 = vmul.f32 %v5181_v24, %v9746_v49  ;;  %v9747_v2 = vld [vmem:[#allocation86_spill] sm:$0xff] }
 0x3a2   : > { %3771 = vst.msk [vmem:[#allocation3 + $0x288] sm:$0xff] %vm842_vm6, %v6892_v36  ;;  %5527 = vst.msk [vmem:[#allocation4 + $0x2a8] sm:$0xff] %vm842_vm6, %v5399_v0  ;;  %v6896_v19 = vpop.eup %6895  ;;  %6915 = vpow2.f32 %v3620_v14  ;;  %v5408_v21 = vmul.f32 %v5185_v59, %v9747_v2  ;;  %v5409_v57 = vmul.f32 %v5185_v59, %v9748_v44  ;;  %v2802_v63 = vrot.slane %v2788_v62, %v8299_v47 }
 0x3a3   : > { %5528 = vst.msk [vmem:[#allocation4 + $0x2b0] sm:$0xff] %vm842_vm6, %v5400_v61  ;;  %5529 = vst.msk [vmem:[#allocation4 + $0x2b8] sm:$0xff] %vm842_vm6, %v5401_v54  ;;  %v6898_v24 = vpop.eup %6897  ;;  %6917 = vpow2.f32 %v8935_v51  ;;  %v2803_v14 = vcombine.high %v8881_v27, %v8881_v27  ;;  %v2811_v59 = vrot.slane %v8881_v27, %v8299_v47  ;;  %v9000_v62 = vmul.f32 %v8861_v22, %v9749_v46  ;;  %v7025_v27 = vld [vmem:[%s9540_s6] ss:$0 sm:$0xff] }
 0x3a4   : > { %3772 = vst.msk [vmem:[#allocation3 + $0x290] sm:$0xff] %vm842_vm6, %v6894_v43  ;;  %5530 = vst.msk [vmem:[#allocation4 + $0x2c0] sm:$0xff] %vm842_vm6, %v5402_v28  ;;  %v6900_v56 = vpop.eup %6899  ;;  %6919 = vpow2.f32 %v8937_v58  ;;  %v2804_v51 = vcombine.high %v2802_v63, %v2802_v63  ;;  %v2818_v53 = vrot.slane %v2802_v63, %v8299_v47  ;;  %v9011_v55 = vadd.f32 %v7025_v27, %v8475_v10 }
 0x3a5   : > { %5531 = vst.msk [vmem:[#allocation4 + $0x2c8] sm:$0xff] %vm842_vm6, %v5403_v15  ;;  %5532 = vst.msk [vmem:[#allocation4 + $0x2d0] sm:$0xff] %vm842_vm6, %v5404_v37  ;;  %v6902_v22 = vpop.eup %6901  ;;  %v2825_v58 = vrot.slane %v2803_v14, %v8299_v47  ;;  %v2833_v8 = vcombine.high %v2811_v59, %v2811_v59  ;;  %v3117_v35 = vrot.slane %v2811_v59, %v7746_v20  ;;  %v9052_v59 = vpop.permute.xlu0 %4520 }
 0x3a6   : > { %3773 = vst.msk [vmem:[#allocation3 + $0x298] sm:$0xff] %vm842_vm6, %v6896_v19  ;;  %5533 = vst.msk [vmem:[#allocation4 + $0x2d8] sm:$0xff] %vm842_vm6, %v5405_v30  ;;  %v4798_v45 = vcombine.high %v9000_v62, %v9000_v62  ;;  %v6904_v11 = vpop.eup %6903  ;;  %v2832_v33 = vrot.slane %v2804_v51, %v8299_v47  ;;  %v2834_v10 = vcombine.high %v2818_v53, %v2818_v53 }
 0x3a7   : > { %5534 = vst.msk [vmem:[#allocation4 + $0x2e0] sm:$0xff] %vm842_vm6, %v5406_v25  ;;  %5535 = vst.msk [vmem:[#allocation4 + $0x2e8] sm:$0xff] %vm842_vm6, %v5407_v17  ;;  %v3133_v5 = vrot.slane %v2818_v53, %v7746_v20  ;;  %v9025_v0 = vrot.slane %v9000_v62, %v8299_v47  ;;  %v6906_v61 = vpop.eup %6905  ;;  %v2835_v12 = vcombine.high %v2825_v58, %v2825_v58 }
 0x3a8   : > { %3774 = vst.msk [vmem:[#allocation3 + $0x2a0] sm:$0xff] %vm842_vm6, %v6898_v24  ;;  %5536 = vst.msk [vmem:[#allocation4 + $0x2f0] sm:$0xff] %vm842_vm6, %v5408_v21  ;;  %v3121_v54 = vrot.slane %v2825_v58, %v7746_v20  ;;  %v3125_v36 = vrot.slane %v2833_v8, %v7746_v20  ;;  %v3370_v40 = vmul.f32 %v8900_v23, %v3117_v35  ;;  %v6908_v28 = vpop.eup %6907 }
 0x3a9   : > { %5537 = vst.msk [vmem:[#allocation4 + $0x2f8] sm:$0xff] %vm842_vm6, %v5409_v57  ;;  %3775 = vst.msk [vmem:[#allocation3 + $0x2a8] sm:$0xff] %vm842_vm6, %v6900_v56  ;;  %v2836_v13 = vcombine.high %v2832_v33, %v2832_v33  ;;  %v3137_v15 = vrot.slane %v2832_v33, %v7746_v20  ;;  %v3141_v32 = vrot.slane %v2834_v10, %v7746_v20  ;;  %v6910_v43 = vpop.eup %6909 }
 0x3aa   : > { %3776 = vst.msk [vmem:[#allocation3 + $0x2b0] sm:$0xff] %vm842_vm6, %v6902_v22  ;;  %3777 = vst.msk [vmem:[#allocation3 + $0x2b8] sm:$0xff] %vm842_vm6, %v6904_v11  ;;  %v3371_v37 = vmul.f32 %v8909_v38, %v3117_v35  ;;  %v3129_v3 = vrot.slane %v2835_v12, %v7746_v20  ;;  %v3372_v30 = vmul.f32 %v8900_v23, %v3121_v54  ;;  %v6912_v49 = vpop.eup %6911  ;;  %v9059_v22 = vpop.permute.xlu1 %4524  ;;  %v3562_v8 = vmul.f32 1.442695, %v3370_v40 }
 0x3ab   : > { %3778 = vst.msk [vmem:[#allocation3 + $0x2c0] sm:$0xff] %vm842_vm6, %v6906_v61  ;;  %3779 = vst.msk [vmem:[#allocation3 + $0x2c8] sm:$0xff] %vm842_vm6, %v6908_v28  ;;  %v3373_v4 = vmul.f32 %v8909_v38, %v3121_v54  ;;  %v3374_v25 = vmul.f32 %v8900_v23, %v3125_v36  ;;  %v3145_v17 = vrot.slane %v2836_v13, %v7746_v20  ;;  %v6914_v44 = vpop.eup %6913 }
 0x3ac   : > { %3780 = vst.msk [vmem:[#allocation3 + $0x2d0] sm:$0xff] %vm842_vm6, %v6910_v43  ;;  %v3375_v19 = vmul.f32 %v8909_v38, %v3125_v36  ;;  %v3378_v2 = vmul.f32 %v8900_v23, %v3133_v5  ;;  %v3379_v21 = vmul.f32 %v8909_v38, %v3133_v5  ;;  %3781 = vst.msk [vmem:[#allocation3 + $0x2d8] sm:$0xff] %vm842_vm6, %v6912_v49  ;;  %v6916_v46 = vpop.eup %6915  ;;  %v3564_v35 = vmul.f32 1.442695, %v3371_v37 }
 0x3ad   : > { %v3376_v57 = vmul.f32 %v8900_v23, %v3129_v3  ;;  %v3377_v63 = vmul.f32 %v8909_v38, %v3129_v3  ;;  %v3380_v24 = vmul.f32 %v8900_v23, %v3137_v15  ;;  %v3381_v14 = vmul.f32 %v8909_v38, %v3137_v15  ;;  %3782 = vst.msk [vmem:[#allocation3 + $0x2e0] sm:$0xff] %vm842_vm6, %v6914_v44  ;;  %v6918_v58 = vpop.eup %6917 }
 0x3ae   : > { %v3382_v56 = vmul.f32 %v8900_v23, %v3141_v32  ;;  %v3383_v51 = vmul.f32 %v8909_v38, %v3141_v32  ;;  %v3384_v53 = vmul.f32 %v8900_v23, %v3145_v17  ;;  %v3385_v27 = vmul.f32 %v8909_v38, %v3145_v17  ;;  %3783 = vst.msk [vmem:[#allocation3 + $0x2e8] sm:$0xff] %vm842_vm6, %v6916_v46  ;;  %v6920_v10 = vpop.eup %6919  ;;  %v9075_v49 = vpop.permute.xlu1 %4536 }
 0x3af   : > { %v3566_v11 = vmul.f32 1.442695, %v3372_v30  ;;  %v4813_v33 = vcombine.high %v9025_v0, %v9025_v0  ;;  %3784 = vst.msk [vmem:[#allocation3 + $0x2f0] sm:$0xff] %vm842_vm6, %v6918_v58  ;;  %v3568_v5 = vmul.f32 1.442695, %v3373_v4  ;;  %v4821_v54 = vrot.slane %v9025_v0, %v8299_v47  ;;  %3785 = vst.msk [vmem:[#allocation3 + $0x2f8] sm:$0xff] %vm842_vm6, %v6920_v10  ;;  %v9070_v30 = vpop.permute.xlu0 %4532 }
 0x3b0   : > { %v3570_v61 = vmul.f32 1.442695, %v3374_v25  ;;  %v3572_v12 = vmul.f32 1.442695, %v3375_v19  ;;  %6921 = vpow2.f32 %v3562_v8  ;;  %v3574_v36 = vmul.f32 1.442695, %v3376_v57 }
 0x3b1   : > { %v3576_v28 = vmul.f32 1.442695, %v3377_v63  ;;  %v3578_v40 = vmul.f32 1.442695, %v3378_v2  ;;  %6923 = vpow2.f32 %v3564_v35  ;;  %v3580_v13 = vmul.f32 1.442695, %v3379_v21 }
 0x3b2   : > { %v3582_v15 = vmul.f32 1.442695, %v3380_v24  ;;  %v3584_v32 = vmul.f32 1.442695, %v3381_v14  ;;  %6925 = vpow2.f32 %v3566_v11  ;;  %v3586_v37 = vmul.f32 1.442695, %v3382_v56 }
 0x3b3   : > { %v3588_v43 = vmul.f32 1.442695, %v3383_v51  ;;  %v9068_v3 = vmul.f32 1.442695, %v3384_v53  ;;  %6927 = vpow2.f32 %v3568_v5  ;;  %v9072_v4 = vmul.f32 1.442695, %v3385_v27  ;;  %v9095_v11 = vpop.permute.xlu0 %4544 }
 0x3b4   : > { %v4835_v0 = vrot.slane %v4813_v33, %v8299_v47  ;;  %v4843_v25 = vcombine.high %v4821_v54, %v4821_v54  ;;  %6929 = vpow2.f32 %v3570_v61  ;;  %v5125_v17 = vrot.slane %v4821_v54, %v7746_v20  ;;  %v9750_v63 = vld [vmem:[#allocation88_spill] sm:$0xff]  ;;  %v9751_v14 = vld [vmem:[#allocation89_spill] sm:$0xff] }
 0x3b5   : > { %v4812_v19 = vrot.slane %v4798_v45, %v8299_v47  ;;  %v2526_v2 = vand.u32 2147483647, %v9011_v55  ;;  %6931 = vpow2.f32 %v3572_v12  ;;  %v9752_v53 = vld [vmem:[#allocation93_spill] sm:$0xff]  ;;  %v9753_v45 = vld [vmem:[#allocation94_spill] sm:$0xff] }
 0x3b6   : > { %v4845_v21 = vcombine.high %v4835_v0, %v4835_v0  ;;  %v5129_v44 = vrot.slane %v4835_v0, %v7746_v20  ;;  %v5133_v57 = vrot.slane %v4843_v25, %v7746_v20  ;;  %6933 = vpow2.f32 %v3574_v36 }
 0x3b7   : > { %v5378_v24 = vmul.f32 %v5125_v17, %v9750_v63  ;;  %v5379_v46 = vmul.f32 %v5125_v17, %v9751_v14  ;;  %v4814_v56 = vcombine.high %v4812_v19, %v4812_v19  ;;  %6935 = vpow2.f32 %v3576_v28 }
 0x3b8   : > { %v5137_v51 = vrot.slane %v4845_v21, %v7746_v20  ;;  %v5380_v62 = vmul.f32 %v5129_v44, %v9752_v53  ;;  %v5381_v27 = vmul.f32 %v5129_v44, %v9753_v45  ;;  %6937 = vpow2.f32 %v3578_v40  ;;  %v9754_v45 = vld [vmem:[#allocation83_spill] sm:$0xff] }
 0x3b9   : > { %v5382_v58 = vmul.f32 %v5133_v57, %v8398_v50  ;;  %v5383_v8 = vmul.f32 %v5133_v57, %v8402_v18  ;;  %5506 = vst.msk [vmem:[#allocation4 + $0x200] sm:$0xff] %vm842_vm6, %v5378_v24  ;;  %5507 = vst.msk [vmem:[#allocation4 + $0x208] sm:$0xff] %vm842_vm6, %v5379_v46  ;;  %v4828_v35 = vrot.slane %v4812_v19, %v8299_v47  ;;  %6939 = vpow2.f32 %v3580_v13  ;;  %v9102_v18 = vpop.permute.xlu1 %4548 }
 0x3ba   : > { %v5384_v33 = vmul.f32 %v5137_v51, %v8417_v52  ;;  %v5385_v10 = vmul.f32 %v5137_v51, %v8425_v26  ;;  %5508 = vst.msk [vmem:[#allocation4 + $0x210] sm:$0xff] %vm842_vm6, %v5380_v62  ;;  %5509 = vst.msk [vmem:[#allocation4 + $0x218] sm:$0xff] %vm842_vm6, %v5381_v27  ;;  %v4842_v50 = vrot.slane %v4814_v56, %v8299_v47  ;;  %v6922_v5 = vpop.eup %6921  ;;  %6941 = vpow2.f32 %v3582_v15 }
 0x3bb   : > { %5510 = vst.msk [vmem:[#allocation4 + $0x220] sm:$0xff] %vm842_vm6, %v5382_v58  ;;  %5511 = vst.msk [vmem:[#allocation4 + $0x228] sm:$0xff] %vm842_vm6, %v5383_v8  ;;  %v4844_v61 = vcombine.high %v4828_v35, %v4828_v35  ;;  %v5141_v12 = vrot.slane %v4828_v35, %v7746_v20  ;;  %v2534_v52 = vsub.f32 0.0, %v2526_v2  ;;  %v6924_v54 = vpop.eup %6923  ;;  %6943 = vpow2.f32 %v3584_v32 }
 0x3bc   : > { %3754 = vst.msk [vmem:[#allocation3 + $0x200] sm:$0xff] %vm842_vm6, %v6922_v5  ;;  %5512 = vst.msk [vmem:[#allocation4 + $0x230] sm:$0xff] %vm842_vm6, %v5384_v33  ;;  %v4846_v26 = vcombine.high %v4842_v50, %v4842_v50  ;;  %v5145_v36 = vrot.slane %v4842_v50, %v7746_v20  ;;  %v6926_v28 = vpop.eup %6925  ;;  %6945 = vpow2.f32 %v3586_v37  ;;  %v7077_v32 = vmov 0.0   ;;  %v9755_v5 = vld [vmem:[#allocation14_spill] sm:$0xff] }
 0x3bd   : > { %5513 = vst.msk [vmem:[#allocation4 + $0x238] sm:$0xff] %vm842_vm6, %v5385_v10  ;;  %3755 = vst.msk [vmem:[#allocation3 + $0x208] sm:$0xff] %vm842_vm6, %v6924_v54  ;;  %v5149_v40 = vrot.slane %v4844_v61, %v7746_v20  ;;  %v5386_v13 = vmul.f32 %v5141_v12, %v8450_v16  ;;  %v5387_v15 = vmul.f32 %v5141_v12, %v8477_v31  ;;  %v6928_v0 = vpop.eup %6927  ;;  %6947 = vpow2.f32 %v3588_v43  ;;  %v9127_v43 = vpop.permute.xlu0 %4556 }
 0x3be   : > { %5574 = vst.msk [vmem:[#allocation2] sm:$0xff] %vm842_vm6, %v7077_v32  ;;  %5575 = vst.msk [vmem:[#allocation2 + $0x8] sm:$0xff] %vm842_vm6, %v7077_v32  ;;  %v5153_v25 = vrot.slane %v4846_v26, %v7746_v20  ;;  %v5388_v37 = vmul.f32 %v5145_v36, %v8505_v41  ;;  %v5389_v17 = vmul.f32 %v5145_v36, %v8517_v42  ;;  %v6930_v19 = vpop.eup %6929  ;;  %6949 = vpow2.f32 %v9068_v3 }
 0x3bf   : > { %3756 = vst.msk [vmem:[#allocation3 + $0x210] sm:$0xff] %vm842_vm6, %v6926_v28  ;;  %3757 = vst.msk [vmem:[#allocation3 + $0x218] sm:$0xff] %vm842_vm6, %v6928_v0  ;;  %v5390_v16 = vmul.f32 %v5149_v40, %v8526_v48  ;;  %v5391_v31 = vmul.f32 %v5149_v40, %v8530_v7  ;;  %v6932_v2 = vpop.eup %6931  ;;  %6951 = vpow2.f32 %v9072_v4  ;;  %v2548_v48 = vmul.f32 1.442695, %v2534_v52  ;;  %v9135_v7 = vpop.permute.xlu1 %4560 }
 0x3c0   : > { %5514 = vst.msk [vmem:[#allocation4 + $0x240] sm:$0xff] %vm842_vm6, %v5386_v13  ;;  %5515 = vst.msk [vmem:[#allocation4 + $0x248] sm:$0xff] %vm842_vm6, %v5387_v15  ;;  %v5392_v41 = vmul.f32 %v5153_v25, %v8548_v6  ;;  %v5393_v42 = vmul.f32 %v5153_v25, %v8556_v1  ;;  %v6934_v3 = vpop.eup %6933  ;;  %6953 = vlog2.f32 %v8868_v60  ;;  %v2519_v27 = vmax.f32 %v9754_v45, 0.0 }
 0x3c1   : > { %3758 = vst.msk [vmem:[#allocation3 + $0x220] sm:$0xff] %vm842_vm6, %v6930_v19  ;;  %5516 = vst.msk [vmem:[#allocation4 + $0x250] sm:$0xff] %vm842_vm6, %v5388_v37  ;;  %v6936_v4 = vpop.eup %6935  ;;  %6955 = vpow2.f32 %v2548_v48  ;;  %v9151_v60 = vpop.permute.xlu0 %4568  ;;  %v2518_v13 = vmax.f32 %v9011_v55, 0.0 }
 0x3c2   : > { %5517 = vst.msk [vmem:[#allocation4 + $0x258] sm:$0xff] %vm842_vm6, %v5389_v17  ;;  %3759 = vst.msk [vmem:[#allocation3 + $0x228] sm:$0xff] %vm842_vm6, %v6932_v2  ;;  %v6938_v6 = vpop.eup %6937 }
 0x3c3   : > { %5518 = vst.msk [vmem:[#allocation4 + $0x260] sm:$0xff] %vm842_vm6, %v5390_v16  ;;  %5519 = vst.msk [vmem:[#allocation4 + $0x268] sm:$0xff] %vm842_vm6, %v5391_v31  ;;  %v6940_v1 = vpop.eup %6939  ;;  %v9154_v24 = vpop.permute.xlu1 %4572 }
 0x3c4   : > { %3760 = vst.msk [vmem:[#allocation3 + $0x230] sm:$0xff] %vm842_vm6, %v6934_v3  ;;  %5520 = vst.msk [vmem:[#allocation4 + $0x270] sm:$0xff] %vm842_vm6, %v5392_v41  ;;  %v6942_v57 = vpop.eup %6941 }
 0x3c5   : > { %5521 = vst.msk [vmem:[#allocation4 + $0x278] sm:$0xff] %vm842_vm6, %v5393_v42  ;;  %3761 = vst.msk [vmem:[#allocation3 + $0x238] sm:$0xff] %vm842_vm6, %v6936_v4  ;;  %v9146_v21 = vld [vmem:[#allocation2] sm:$0xff]   ;;  %v9148_v44 = vld [vmem:[#allocation2 + $0x8] sm:$0xff]   ;;  %v6944_v63 = vpop.eup %6943  ;;  %v9161_v62 = vpop.permute.xlu0 %4400 }
 0x3c6   : > { %3762 = vst.msk [vmem:[#allocation3 + $0x240] sm:$0xff] %vm842_vm6, %v6938_v6  ;;  %3763 = vst.msk [vmem:[#allocation3 + $0x248] sm:$0xff] %vm842_vm6, %v6940_v1  ;;  %v6946_v14 = vpop.eup %6945 }
 0x3c7   : > { %3764 = vst.msk [vmem:[#allocation3 + $0x250] sm:$0xff] %vm842_vm6, %v6942_v57  ;;  %3765 = vst.msk [vmem:[#allocation3 + $0x258] sm:$0xff] %vm842_vm6, %v6944_v63  ;;  %v6948_v46 = vpop.eup %6947  ;;  %v9164_v8 = vpop.permute.xlu1 %4404 }
 0x3c8   : > { %3766 = vst.msk [vmem:[#allocation3 + $0x260] sm:$0xff] %vm842_vm6, %v6946_v14  ;;  %v6950_v56 = vpop.eup %6949  ;;  %3767 = vst.msk [vmem:[#allocation3 + $0x268] sm:$0xff] %vm842_vm6, %v6948_v46 }
 0x3c9   : > { %v6952_v51 = vpop.eup %6951  ;;  %3768 = vst.msk [vmem:[#allocation3 + $0x270] sm:$0xff] %vm842_vm6, %v6950_v56  ;;  %v9168_v52 = vpop.permute.xlu0 %4412 }
 0x3ca   : > { %v6954_v53 = vpop.eup %6953  ;;  %3769 = vst.msk [vmem:[#allocation3 + $0x278] sm:$0xff] %vm842_vm6, %v6952_v51 }
 0x3cb   : > { %v2575_v58 = vmul.f32 0.6931472, %v6954_v53  ;;  %v6956_v35 = vpop.eup %6955  ;;  %v9175_v40 = vpop.permute.xlu1 %4416 }
 0x3cc   : > { %v2558_v12 = vadd.f32 1.0, %v6956_v35 }
 0x3cd   : > { %v2583_v33 = vadd.f32 %v2575_v58, %v2519_v27  ;;  %v9192_v6 = vpop.permute.xlu0 %4424 }
 0x3ce   : > { %6957 = vlog2.f32 %v2558_v12 }
 0x3cf   : > { %v2935_v10 = vcombine.high %v2583_v33, %v2583_v33  ;;  %v2942_v50 = vrot.slane %v2583_v33, %v8299_v47  ;;  %v4593_v61 = vmul.f32 %v2583_v33, %v9755_v5  ;;  %v9197_v46 = vpop.permute.xlu1 %4428 }
 0x3d1   : > { %v2949_v54 = vrot.slane %v2935_v10, %v8299_v47  ;;  %v2950_v26 = vcombine.high %v2942_v50, %v2942_v50  ;;  %v2958_v36 = vrot.slane %v2942_v50, %v8299_v47  ;;  %v9173_v28 = vrot.slane %v4593_v61, %v8299_v47 }
 0x3d2   : > { %v4945_v19 = vcombine.high %v4593_v61, %v4593_v61 }
 0x3d3   : > { %v2951_v15 = vcombine.high %v2949_v54, %v2949_v54  ;;  %v2965_v32 = vrot.slane %v2949_v54, %v8299_v47  ;;  %v2972_v0 = vrot.slane %v2950_v26, %v8299_v47  ;;  %v2980_v25 = vcombine.high %v2958_v36, %v2958_v36 }
 0x3d4   : > { %v3213_v37 = vrot.slane %v2958_v36, %v7746_v20  ;;  %v9183_v17 = vrot.slane %v9173_v28, %v8299_v47  ;;  %v4960_v4 = vcombine.high %v9173_v28, %v9173_v28  ;;  %v9203_v45 = vrot.slane %v4945_v19, %v8299_v47 }
 0x3d5   : > { %v2979_v16 = vrot.slane %v2951_v15, %v8299_v47  ;;  %v2981_v31 = vcombine.high %v2965_v32, %v2965_v32  ;;  %v2982_v2 = vcombine.high %v2972_v0, %v2972_v0  ;;  %v3217_v41 = vrot.slane %v2972_v0, %v7746_v20 }
 0x3d6   : > { %v3221_v42 = vrot.slane %v2980_v25, %v7746_v20  ;;  %v3229_v48 = vrot.slane %v2965_v32, %v7746_v20  ;;  %v3418_v3 = vmul.f32 %v8900_v23, %v3213_v37  ;;  %v3419_v56 = vmul.f32 %v8909_v38, %v3213_v37  ;;  %v9217_v25 = vpop.permute.xlu0 %4436 }
 0x3d7   : > { %v2983_v1 = vcombine.high %v2979_v16, %v2979_v16  ;;  %v3225_v57 = vrot.slane %v2982_v2, %v7746_v20  ;;  %v3233_v63 = vrot.slane %v2979_v16, %v7746_v20  ;;  %v3237_v14 = vrot.slane %v2981_v31, %v7746_v20  ;;  %v9222_v31 = vpop.permute.xlu1 %4440 }
 0x3d8   : > { %v3420_v51 = vmul.f32 %v8900_v23, %v3217_v41  ;;  %v3421_v53 = vmul.f32 %v8909_v38, %v3217_v41  ;;  %v3422_v58 = vmul.f32 %v8900_v23, %v3221_v42  ;;  %v3423_v35 = vmul.f32 %v8909_v38, %v3221_v42  ;;  %v6958_v2 = vpop.eup %6957 }
 0x3d9   : > { %v3241_v27 = vrot.slane %v2983_v1, %v7746_v20  ;;  %v3424_v33 = vmul.f32 %v8900_v23, %v3225_v57  ;;  %v3425_v10 = vmul.f32 %v8909_v38, %v3225_v57  ;;  %v3426_v50 = vmul.f32 %v8900_v23, %v3229_v48 }
 0x3da   : > { %v3427_v5 = vmul.f32 %v8909_v38, %v3229_v48  ;;  %v3428_v61 = vmul.f32 %v8900_v23, %v3233_v63  ;;  %v3429_v12 = vmul.f32 %v8909_v38, %v3233_v63  ;;  %v3430_v54 = vmul.f32 %v8900_v23, %v3237_v14 }
 0x3db   : > { %v3431_v26 = vmul.f32 %v8909_v38, %v3237_v14  ;;  %v3658_v36 = vmul.f32 1.442695, %v3418_v3  ;;  %v3432_v28 = vmul.f32 %v8900_v23, %v3241_v27  ;;  %v3660_v15 = vmul.f32 1.442695, %v3419_v56 }
 0x3dc   : > { %v3662_v32 = vmul.f32 1.442695, %v3420_v51  ;;  %v3664_v0 = vmul.f32 1.442695, %v3421_v53  ;;  %v3433_v37 = vmul.f32 %v8909_v38, %v3241_v27  ;;  %v3666_v19 = vmul.f32 1.442695, %v3422_v58 }
 0x3dd   : > { %6959 = vpow2.f32 %v3658_v36  ;;  %v5221_v16 = vrot.slane %v9183_v17, %v7746_v20  ;;  %v3668_v41 = vmul.f32 1.442695, %v3423_v35  ;;  %v3670_v42 = vmul.f32 1.442695, %v3424_v33 }
 0x3de   : > { %6961 = vpow2.f32 %v3660_v15  ;;  %v3672_v48 = vmul.f32 1.442695, %v3425_v10  ;;  %v3674_v3 = vmul.f32 1.442695, %v3426_v50  ;;  %v3676_v1 = vmul.f32 1.442695, %v3427_v5  ;;  %v9233_v10 = vpop.permute.xlu0 %4448 }
 0x3df   : > { %6963 = vpow2.f32 %v3662_v32  ;;  %v3678_v57 = vmul.f32 1.442695, %v3428_v61  ;;  %v3680_v63 = vmul.f32 1.442695, %v3429_v12  ;;  %v3682_v14 = vmul.f32 1.442695, %v3430_v54 }
 0x3e0   : > { %6965 = vpow2.f32 %v3664_v0  ;;  %v3684_v56 = vmul.f32 1.442695, %v3431_v26  ;;  %v2573_v51 = vmul.f32 0.6931472, %v6958_v2  ;;  %v5426_v53 = vmul.f32 %v5221_v16, %v8961_v29 }
 0x3e1   : > { %6967 = vpow2.f32 %v3666_v19  ;;  %v5427_v27 = vmul.f32 %v5221_v16, %v8970_v34  ;;  %v4982_v58 = vrot.slane %v4960_v4, %v8299_v47  ;;  %v4990_v35 = vcombine.high %v9183_v17, %v9183_v17  ;;  %v9241_v34 = vpop.permute.xlu1 %4452 }
 0x3e2   : > { %6969 = vpow2.f32 %v3668_v41  ;;  %v9231_v33 = vrot.slane %v9203_v45, %v8299_v47  ;;  %v3686_v50 = vmul.f32 1.442695, %v3432_v28  ;;  %v3688_v5 = vmul.f32 1.442695, %v3433_v37  ;;  %5554 = vst.msk [vmem:[#allocation4 + $0x380] sm:$0xff] %vm842_vm6, %v5426_v53  ;;  %v9268_v19 = vpop.permute.xlu0 %4460 }
 0x3e3   : > { %6971 = vpow2.f32 %v3670_v42  ;;  %v9237_v29 = vadd.f32 %v2573_v51, %v2518_v13  ;;  %5555 = vst.msk [vmem:[#allocation4 + $0x388] sm:$0xff] %vm842_vm6, %v5427_v27  ;;  %v5225_v17 = vrot.slane %v4982_v58, %v7746_v20  ;;  %v5229_v4 = vrot.slane %v4990_v35, %v7746_v20 }
 0x3e4   : > { %6973 = vpow2.f32 %v3672_v48  ;;  %v4992_v61 = vcombine.high %v4982_v58, %v4982_v58  ;;  %v9251_v13 = vrot.slane %v9231_v33, %v7746_v20 }
 0x3e5   : > { %6975 = vpow2.f32 %v3674_v3  ;;  %v2886_v12 = vcombine.high %v9237_v29, %v9237_v29  ;;  %v2893_v55 = vrot.slane %v9237_v29, %v8299_v47  ;;  %v5428_v54 = vmul.f32 %v5225_v17, %v9018_v9  ;;  %v9273_v48 = vpop.permute.xlu1 %4464 }
 0x3e6   : > { %6977 = vpow2.f32 %v3676_v1  ;;  %v5429_v26 = vmul.f32 %v5225_v17, %v9027_v39  ;;  %v5430_v36 = vmul.f32 %v5229_v4, %v9052_v59  ;;  %v5431_v9 = vmul.f32 %v5229_v4, %v9059_v22 }
 0x3e7   : > { %v6960_v28 = vpop.eup %6959  ;;  %6979 = vpow2.f32 %v3678_v57  ;;  %v2900_v15 = vrot.slane %v2886_v12, %v8299_v47  ;;  %v2901_v32 = vcombine.high %v2893_v55, %v2893_v55  ;;  %v2909_v0 = vrot.slane %v2893_v55, %v8299_v47  ;;  %5556 = vst.msk [vmem:[#allocation4 + $0x390] sm:$0xff] %vm842_vm6, %v5428_v54  ;;  %v9296_v54 = vpop.permute.xlu0 %4472 }
 0x3e8   : > { %v6962_v37 = vpop.eup %6961  ;;  %6981 = vpow2.f32 %v3680_v63  ;;  %3802 = vst.msk [vmem:[#allocation3 + $0x380] sm:$0xff] %vm842_vm6, %v6960_v28  ;;  %5557 = vst.msk [vmem:[#allocation4 + $0x398] sm:$0xff] %vm842_vm6, %v5429_v26  ;;  %v9264_v39 = vrot.slane %v4992_v61, %v7746_v20  ;;  %v5434_v59 = vmul.f32 %v9251_v13, %v9095_v11 }
 0x3e9   : > { %5558 = vst.msk [vmem:[#allocation4 + $0x3a0] sm:$0xff] %vm842_vm6, %v5430_v36  ;;  %v6964_v16 = vpop.eup %6963  ;;  %6983 = vpow2.f32 %v3682_v14  ;;  %3803 = vst.msk [vmem:[#allocation3 + $0x388] sm:$0xff] %vm842_vm6, %v6962_v37  ;;  %v2902_v2 = vcombine.high %v2900_v15, %v2900_v15  ;;  %v2916_v41 = vrot.slane %v2900_v15, %v8299_v47  ;;  %v2923_v42 = vrot.slane %v2901_v32, %v8299_v47 }
 0x3ea   : > { %v6966_v22 = vpop.eup %6965  ;;  %6985 = vpow2.f32 %v3684_v56  ;;  %3804 = vst.msk [vmem:[#allocation3 + $0x390] sm:$0xff] %vm842_vm6, %v6964_v16  ;;  %v2931_v3 = vcombine.high %v2909_v0, %v2909_v0  ;;  %v3181_v11 = vrot.slane %v2909_v0, %v7746_v20  ;;  %5559 = vst.msk [vmem:[#allocation4 + $0x3a8] sm:$0xff] %vm842_vm6, %v5431_v9  ;;  %v5432_v1 = vmul.f32 %v9264_v39, %v9070_v30  ;;  %v9304_v0 = vpop.permute.xlu1 %4476 }
 0x3eb   : > { %5562 = vst.msk [vmem:[#allocation4 + $0x3c0] sm:$0xff] %vm842_vm6, %v5434_v59  ;;  %v6968_v57 = vpop.eup %6967  ;;  %6987 = vpow2.f32 %v3686_v50  ;;  %3805 = vst.msk [vmem:[#allocation3 + $0x398] sm:$0xff] %vm842_vm6, %v6966_v22  ;;  %v2930_v63 = vrot.slane %v2902_v2, %v8299_v47  ;;  %v2932_v14 = vcombine.high %v2916_v41, %v2916_v41  ;;  %v2933_v56 = vcombine.high %v2923_v42, %v2923_v42 }
 0x3ec   : > { %v6970_v51 = vpop.eup %6969  ;;  %6989 = vpow2.f32 %v3688_v5  ;;  %3806 = vst.msk [vmem:[#allocation3 + $0x3a0] sm:$0xff] %vm842_vm6, %v6968_v57  ;;  %v3185_v53 = vrot.slane %v2923_v42, %v7746_v20  ;;  %v3189_v27 = vrot.slane %v2931_v3, %v7746_v20  ;;  %v3197_v30 = vrot.slane %v2916_v41, %v7746_v20  ;;  %5560 = vst.msk [vmem:[#allocation4 + $0x3b0] sm:$0xff] %vm842_vm6, %v5432_v1 }
 0x3ed   : > { %v6972_v58 = vpop.eup %6971  ;;  %3807 = vst.msk [vmem:[#allocation3 + $0x3a8] sm:$0xff] %vm842_vm6, %v6970_v51  ;;  %v2934_v35 = vcombine.high %v2930_v63, %v2930_v63  ;;  %v3193_v50 = vrot.slane %v2933_v56, %v7746_v20  ;;  %v3201_v17 = vrot.slane %v2930_v63, %v7746_v20  ;;  %v3205_v5 = vrot.slane %v2932_v14, %v7746_v20 }
 0x3ee   : > { %v6974_v4 = vpop.eup %6973  ;;  %3808 = vst.msk [vmem:[#allocation3 + $0x3b0] sm:$0xff] %vm842_vm6, %v6972_v58  ;;  %v3402_v61 = vmul.f32 %v8900_v23, %v3181_v11  ;;  %v3403_v12 = vmul.f32 %v8909_v38, %v3181_v11  ;;  %v3404_v55 = vmul.f32 %v8900_v23, %v3185_v53  ;;  %v3405_v28 = vmul.f32 %v8909_v38, %v3185_v53 }
 0x3ef   : > { %v6976_v26 = vpop.eup %6975  ;;  %3809 = vst.msk [vmem:[#allocation3 + $0x3b8] sm:$0xff] %vm842_vm6, %v6974_v4  ;;  %v3209_v36 = vrot.slane %v2934_v35, %v7746_v20  ;;  %v3406_v15 = vmul.f32 %v8900_v23, %v3189_v27  ;;  %v4961_v32 = vcombine.high %v9203_v45, %v9203_v45  ;;  %v3407_v9 = vmul.f32 %v8909_v38, %v3189_v27 }
 0x3f0   : > { %v6978_v37 = vpop.eup %6977  ;;  %3810 = vst.msk [vmem:[#allocation3 + $0x3c0] sm:$0xff] %vm842_vm6, %v6976_v26  ;;  %v3408_v59 = vmul.f32 %v8900_v23, %v3193_v50  ;;  %v3409_v16 = vmul.f32 %v8909_v38, %v3193_v50  ;;  %v3410_v2 = vmul.f32 %v8900_v23, %v3197_v30  ;;  %v3411_v42 = vmul.f32 %v8909_v38, %v3197_v30 }
 0x3f1   : > { %v6980_v41 = vpop.eup %6979  ;;  %3811 = vst.msk [vmem:[#allocation3 + $0x3c8] sm:$0xff] %vm842_vm6, %v6978_v37  ;;  %v3412_v45 = vmul.f32 %v8900_v23, %v3201_v17  ;;  %v3413_v22 = vmul.f32 %v8909_v38, %v3201_v17  ;;  %v3414_v3 = vmul.f32 %v8900_v23, %v3205_v5  ;;  %v3415_v1 = vmul.f32 %v8909_v38, %v3205_v5  ;;  %v9324_v5 = vpop.permute.xlu0 %4484 }
 0x3f2   : > { %v6982_v11 = vpop.eup %6981  ;;  %3812 = vst.msk [vmem:[#allocation3 + $0x3d0] sm:$0xff] %vm842_vm6, %v6980_v41  ;;  %v3626_v57 = vmul.f32 1.442695, %v3402_v61  ;;  %v3628_v63 = vmul.f32 1.442695, %v3403_v12  ;;  %v3416_v51 = vmul.f32 %v8900_v23, %v3209_v36  ;;  %v3417_v53 = vmul.f32 %v8909_v38, %v3209_v36  ;;  %v9328_v12 = vpop.permute.xlu1 %4488 }
 0x3f3   : > { %v3630_v14 = vmul.f32 1.442695, %v3404_v55  ;;  %v6984_v56 = vpop.eup %6983  ;;  %3813 = vst.msk [vmem:[#allocation3 + $0x3d8] sm:$0xff] %vm842_vm6, %v6982_v11  ;;  %v3632_v27 = vmul.f32 1.442695, %v3405_v28  ;;  %v5433_v30 = vmul.f32 %v9264_v39, %v9075_v49  ;;  %v5435_v28 = vmul.f32 %v9251_v13, %v9102_v18 }
 0x3f4   : > { %v6986_v58 = vpop.eup %6985  ;;  %3814 = vst.msk [vmem:[#allocation3 + $0x3e0] sm:$0xff] %vm842_vm6, %v6984_v56  ;;  %6991 = vpow2.f32 %v3626_v57  ;;  %v3634_v35 = vmul.f32 1.442695, %v3406_v15  ;;  %v3636_v50 = vmul.f32 1.442695, %v3407_v9  ;;  %v4989_v15 = vrot.slane %v4961_v32, %v8299_v47 }
 0x3f5   : > { %v3638_v17 = vmul.f32 1.442695, %v3408_v59  ;;  %v6988_v4 = vpop.eup %6987  ;;  %3815 = vst.msk [vmem:[#allocation3 + $0x3e8] sm:$0xff] %vm842_vm6, %v6986_v58  ;;  %6993 = vpow2.f32 %v3628_v63  ;;  %v3640_v23 = vmul.f32 1.442695, %v3409_v16  ;;  %5561 = vst.msk [vmem:[#allocation4 + $0x3b8] sm:$0xff] %vm842_vm6, %v5433_v30  ;;  %v4991_v9 = vcombine.high %v9231_v33, %v9231_v33 }
 0x3f6   : > { %v3642_v61 = vmul.f32 1.442695, %v3410_v2  ;;  %v3644_v38 = vmul.f32 1.442695, %v3411_v42  ;;  %v6990_v49 = vpop.eup %6989  ;;  %3816 = vst.msk [vmem:[#allocation3 + $0x3f0] sm:$0xff] %vm842_vm6, %v6988_v4  ;;  %6995 = vpow2.f32 %v3630_v14  ;;  %v9756_v59 = vld [vmem:[#allocation13_spill] sm:$0xff]  ;;  %v5241_v41 = vrot.slane %v4989_v15, %v7746_v20 }
 0x3f7   : > { %v3646_v39 = vmul.f32 1.442695, %v3412_v45  ;;  %v3648_v55 = vmul.f32 1.442695, %v3413_v22  ;;  %v3650_v26 = vmul.f32 1.442695, %v3414_v3  ;;  %6997 = vpow2.f32 %v3632_v27  ;;  %v4581_v45 = vpop.permute.xlu0 %4580  ;;  %v4585_v3 = vpop.permute.xlu1 %4584 }
 0x3f8   : > { %3817 = vst.msk [vmem:[#allocation3 + $0x3f8] sm:$0xff] %vm842_vm6, %v6990_v49  ;;  %v3652_v36 = vmul.f32 1.442695, %v3415_v1  ;;  %6999 = vpow2.f32 %v3634_v35  ;;  %v3654_v37 = vmul.f32 1.442695, %v3416_v51  ;;  %v4592_v16 = vmul.f32 %v9237_v29, %v9756_v59  ;;  %5563 = vst.msk [vmem:[#allocation4 + $0x3c8] sm:$0xff] %vm842_vm6, %v5435_v28 }
 0x3f9   : > { %7001 = vpow2.f32 %v3636_v50  ;;  %v3656_v2 = vmul.f32 1.442695, %v3417_v53  ;;  %v4993_v42 = vcombine.high %v4989_v15, %v4989_v15  ;;  %v5245_v18 = vrot.slane %v4991_v9, %v7746_v20 }
 0x3fa   : > { %7003 = vpow2.f32 %v3638_v17  ;;  %v4903_v13 = vrot.slane %v4592_v16, %v8299_v47  ;;  %v4896_v32 = vcombine.high %v4592_v16, %v4592_v16  ;;  %v5436_v33 = vmul.f32 %v5241_v41, %v9127_v43 }
 0x3fb   : > { %7005 = vpow2.f32 %v3640_v23  ;;  %v5437_v22 = vmul.f32 %v5241_v41, %v9135_v7  ;;  %v5249_v29 = vrot.slane %v4993_v42, %v7746_v20  ;;  %v5438_v11 = vmul.f32 %v5245_v18, %v9151_v60 }
 0x3fc   : > { %7007 = vpow2.f32 %v3642_v61  ;;  %v5439_v1 = vmul.f32 %v5245_v18, %v9154_v24  ;;  %v4919_v57 = vrot.slane %v4903_v13, %v8299_v47  ;;  %5564 = vst.msk [vmem:[#allocation4 + $0x3d0] sm:$0xff] %vm842_vm6, %v5436_v33  ;;  %v4911_v63 = vcombine.high %v4903_v13, %v4903_v13 }
 0x3fd   : > { %7009 = vpow2.f32 %v3644_v38  ;;  %5565 = vst.msk [vmem:[#allocation4 + $0x3d8] sm:$0xff] %vm842_vm6, %v5437_v22  ;;  %v4910_v43 = vrot.slane %v4896_v32, %v8299_v47  ;;  %v5440_v14 = vmul.f32 %v5249_v29, %v4581_v45  ;;  %5566 = vst.msk [vmem:[#allocation4 + $0x3e0] sm:$0xff] %vm842_vm6, %v5438_v11  ;;  %v5441_v56 = vmul.f32 %v5249_v29, %v4585_v3 }
 0x3fe   : > { %v6992_v7 = vpop.eup %6991  ;;  %7011 = vpow2.f32 %v3646_v39  ;;  %5567 = vst.msk [vmem:[#allocation4 + $0x3e8] sm:$0xff] %vm842_vm6, %v5439_v1  ;;  %v5189_v60 = vrot.slane %v4919_v57, %v7746_v20  ;;  %v4941_v24 = vcombine.high %v4919_v57, %v4919_v57  ;;  %v4933_v53 = vrot.slane %v4911_v63, %v8299_v47 }
 0x3ff   : > { %v6994_v51 = vpop.eup %6993  ;;  %7013 = vpow2.f32 %v3648_v55  ;;  %3786 = vst.msk [vmem:[#allocation3 + $0x300] sm:$0xff] %vm842_vm6, %v6992_v7  ;;  %v4926_v27 = vrot.slane %v4910_v43, %v8299_v47  ;;  %v4912_v30 = vcombine.high %v4910_v43, %v4910_v43  ;;  %5568 = vst.msk [vmem:[#allocation4 + $0x3f0] sm:$0xff] %vm842_vm6, %v5440_v14 }
 0x400   : > { %v6996_v58 = vpop.eup %6995  ;;  %7015 = vpow2.f32 %v3650_v26  ;;  %3787 = vst.msk [vmem:[#allocation3 + $0x308] sm:$0xff] %vm842_vm6, %v6994_v51  ;;  %v5410_v35 = vmul.f32 %v5189_v60, %v9161_v62  ;;  %v5411_v50 = vmul.f32 %v5189_v60, %v9164_v8  ;;  %v5197_v17 = vrot.slane %v4941_v24, %v7746_v20  ;;  %5569 = vst.msk [vmem:[#allocation4 + $0x3f8] sm:$0xff] %vm842_vm6, %v5441_v56 }
 0x401   : > { %v6998_v4 = vpop.eup %6997  ;;  %7017 = vpow2.f32 %v3652_v36  ;;  %3788 = vst.msk [vmem:[#allocation3 + $0x310] sm:$0xff] %vm842_vm6, %v6996_v58  ;;  %v5193_v23 = vrot.slane %v4933_v53, %v7746_v20  ;;  %v4943_v61 = vcombine.high %v4933_v53, %v4933_v53  ;;  %v5205_v38 = vrot.slane %v4926_v27, %v7746_v20 }
 0x402   : > { %v7000_v49 = vpop.eup %6999  ;;  %7019 = vpow2.f32 %v3654_v37  ;;  %3789 = vst.msk [vmem:[#allocation3 + $0x318] sm:$0xff] %vm842_vm6, %v6998_v4  ;;  %5538 = vst.msk [vmem:[#allocation4 + $0x300] sm:$0xff] %vm842_vm6, %v5410_v35  ;;  %v5414_v62 = vmul.f32 %v5197_v17, %v9192_v6  ;;  %v5415_v8 = vmul.f32 %v5197_v17, %v9197_v46  ;;  %v4940_v39 = vrot.slane %v4912_v30, %v8299_v47 }
 0x403   : > { %5539 = vst.msk [vmem:[#allocation4 + $0x308] sm:$0xff] %vm842_vm6, %v5411_v50  ;;  %v7002_v55 = vpop.eup %7001  ;;  %7021 = vpow2.f32 %v3656_v2  ;;  %3790 = vst.msk [vmem:[#allocation3 + $0x320] sm:$0xff] %vm842_vm6, %v7000_v49  ;;  %v5412_v26 = vmul.f32 %v5193_v23, %v9168_v52  ;;  %v5413_v36 = vmul.f32 %v5193_v23, %v9175_v40  ;;  %v5201_v28 = vrot.slane %v4943_v61, %v7746_v20 }
 0x404   : > { %v7004_v15 = vpop.eup %7003  ;;  %3791 = vst.msk [vmem:[#allocation3 + $0x328] sm:$0xff] %vm842_vm6, %v7002_v55  ;;  %5542 = vst.msk [vmem:[#allocation4 + $0x320] sm:$0xff] %vm842_vm6, %v5414_v62  ;;  %v5418_v6 = vmul.f32 %v5205_v38, %v9233_v10  ;;  %v5419_v47 = vmul.f32 %v5205_v38, %v9241_v34  ;;  %v5209_v46 = vrot.slane %v4940_v39, %v7746_v20 }
 0x405   : > { %5543 = vst.msk [vmem:[#allocation4 + $0x328] sm:$0xff] %vm842_vm6, %v5415_v8  ;;  %v4942_v37 = vcombine.high %v4926_v27, %v4926_v27  ;;  %v7006_v9 = vpop.eup %7005  ;;  %3792 = vst.msk [vmem:[#allocation3 + $0x330] sm:$0xff] %vm842_vm6, %v7004_v15  ;;  %v5416_v52 = vmul.f32 %v5201_v28, %v9217_v25  ;;  %v5417_v40 = vmul.f32 %v5201_v28, %v9222_v31 }
 0x406   : > { %5540 = vst.msk [vmem:[#allocation4 + $0x310] sm:$0xff] %vm842_vm6, %v5412_v26  ;;  %5541 = vst.msk [vmem:[#allocation4 + $0x318] sm:$0xff] %vm842_vm6, %v5413_v36  ;;  %v4944_v59 = vcombine.high %v4940_v39, %v4940_v39  ;;  %v7008_v16 = vpop.eup %7007  ;;  %v5420_v10 = vmul.f32 %v5209_v46, %v9268_v19  ;;  %v5421_v34 = vmul.f32 %v5209_v46, %v9273_v48 }
 0x407   : > { %3793 = vst.msk [vmem:[#allocation3 + $0x338] sm:$0xff] %vm842_vm6, %v7006_v9  ;;  %5546 = vst.msk [vmem:[#allocation4 + $0x340] sm:$0xff] %vm842_vm6, %v5418_v6  ;;  %v5213_v2 = vrot.slane %v4942_v37, %v7746_v20  ;;  %v7010_v41 = vpop.eup %7009 }
 0x408   : > { %5547 = vst.msk [vmem:[#allocation4 + $0x348] sm:$0xff] %vm842_vm6, %v5419_v47  ;;  %3794 = vst.msk [vmem:[#allocation3 + $0x340] sm:$0xff] %vm842_vm6, %v7008_v16  ;;  %v5217_v25 = vrot.slane %v4944_v59, %v7746_v20  ;;  %v7012_v31 = vpop.eup %7011 }
 0x409   : > { %5544 = vst.msk [vmem:[#allocation4 + $0x330] sm:$0xff] %vm842_vm6, %v5416_v52  ;;  %5545 = vst.msk [vmem:[#allocation4 + $0x338] sm:$0xff] %vm842_vm6, %v5417_v40  ;;  %v5422_v19 = vmul.f32 %v5213_v2, %v9296_v54  ;;  %v5423_v48 = vmul.f32 %v5213_v2, %v9304_v0  ;;  %v7014_v42 = vpop.eup %7013 }
 0x40a   : > { %3795 = vst.msk [vmem:[#allocation3 + $0x348] sm:$0xff] %vm842_vm6, %v7010_v41  ;;  %5548 = vst.msk [vmem:[#allocation4 + $0x350] sm:$0xff] %vm842_vm6, %v5420_v10  ;;  %v5424_v18 = vmul.f32 %v5217_v25, %v9324_v5  ;;  %v5425_v13 = vmul.f32 %v5217_v25, %v9328_v12  ;;  %v7016_v32 = vpop.eup %7015 }
 0x40b   : > { %5549 = vst.msk [vmem:[#allocation4 + $0x358] sm:$0xff] %vm842_vm6, %v5421_v34  ;;  %3796 = vst.msk [vmem:[#allocation3 + $0x350] sm:$0xff] %vm842_vm6, %v7012_v31  ;;  %v7018_v45 = vpop.eup %7017 }
 0x40c   : > { %3797 = vst.msk [vmem:[#allocation3 + $0x358] sm:$0xff] %vm842_vm6, %v7014_v42  ;;  %5550 = vst.msk [vmem:[#allocation4 + $0x360] sm:$0xff] %vm842_vm6, %v5422_v19  ;;  %v7020_v54 = vpop.eup %7019 }
 0x40d   : > { %5551 = vst.msk [vmem:[#allocation4 + $0x368] sm:$0xff] %vm842_vm6, %v5423_v48  ;;  %3798 = vst.msk [vmem:[#allocation3 + $0x360] sm:$0xff] %vm842_vm6, %v7016_v32  ;;  %v7022_v0 = vpop.eup %7021 }
 0x40e   : > { %5552 = vst.msk [vmem:[#allocation4 + $0x370] sm:$0xff] %vm842_vm6, %v5424_v18  ;;  %5553 = vst.msk [vmem:[#allocation4 + $0x378] sm:$0xff] %vm842_vm6, %v5425_v13 }
 0x40f   : > { %3799 = vst.msk [vmem:[#allocation3 + $0x368] sm:$0xff] %vm842_vm6, %v7018_v45  ;;  %3800 = vst.msk [vmem:[#allocation3 + $0x370] sm:$0xff] %vm842_vm6, %v7020_v54 }
 0x410   : > { %3801 = vst.msk [vmem:[#allocation3 + $0x378] sm:$0xff] %vm842_vm6, %v7022_v0 }
 0x411 LB: >> { %s9429_s17 = sshll.u32 %s7072_s16, 3  ;;  %v9757_v12 = vld [vmem:[#allocation16_spill] sm:$0xff]  ;;  %v9758_v29 = vld [vmem:[#allocation17_spill] sm:$0xff]  ;;  %v9759_v11 = vld [vmem:[#allocation18_spill] sm:$0xff]  ;;  %s6130_s19 = sshll.u32 %s7072_s16, 7  ;;  %s7072_s16 = sphi %s9421_s16, %s5585_s16   ;;  %v7068_v21 = vphi %v9146_v21, %v9768_v21   ;;  %v7064_v44 = vphi %v9148_v44, %v9767_v44  }
 0x412   : >> { %s5589_s18 = scalar_lea.vmem [#allocation5], %s9429_s17  ;;  %v9760_v57 = vld [vmem:[#allocation19_spill] sm:$0xff]  ;;  %v9761_v43 = vld [vmem:[#allocation20_spill] sm:$0xff]  ;;  %v9762_v7 = vld [vmem:[#allocation21_spill] sm:$0xff]  ;;  %s9441_s20 = scalar_lea.vmem [#allocation3], %s6130_s19 }
 0x413   : >> { %v5590_v5 = vld [vmem:[%s5589_s18] sm:$0xff]  ;;  %v9763_v24 = vld [vmem:[#allocation22_spill] sm:$0xff]  ;;  %s9445_s21 = scalar_lea.vmem [#allocation4], %s6130_s19  ;;  %s5878_s22 = scalar_lea.vmem [#allocation6], %s9429_s17 }
 0x414   : >> { %v5605_v33 = vrot.slane %v5590_v5, %v9757_v12  ;;  %v5594_v22 = vrot.slane %v5590_v5, %v7746_v20  ;;  %v5616_v3 = vrot.slane %v5590_v5, %v9758_v29  ;;  %v5627_v1 = vrot.slane %v5590_v5, %v9759_v11  ;;  %s5881_s23 = scalar_lea.vmem [#allocation7], %s9429_s17  ;;  %s5884_s24 = scalar_lea.vmem %s7180_s29, %s9429_s17 }
 0x415   : >> { %v5638_v63 = vrot.slane %v5590_v5, %v9760_v57  ;;  %v5649_v14 = vrot.slane %v5590_v5, %v9761_v43  ;;  %v5660_v60 = vrot.slane %v5590_v5, %v9762_v7  ;;  %v5671_v56 = vrot.slane %v5590_v5, %v9763_v24  ;;  %v5687_v30 = vld [vmem:[%s9445_s21 + $0x8] sm:$0xff]  ;;  %v5686_v35 = vld [vmem:[%s9445_s21] sm:$0xff]  ;;  %v6077_v38 = vld [vmem:[%s9445_s21 + $0x18] sm:$0xff]  ;;  %s5585_s16 = sadd.s32 1, %s7072_s16  }
 0x416   : >> { %5607 = vbcast.lane.b32.xlu1 %v5605_v33, 256  ;;  %5596 = vbcast.lane.b32.xlu0 %v5594_v22, 256  ;;  %v6076_v49 = vld [vmem:[%s9445_s21 + $0x10] sm:$0xff]  ;;  %v6085_v26 = vld [vmem:[%s9445_s21 + $0x28] sm:$0xff]  ;;  %v6084_v28 = vld [vmem:[%s9445_s21 + $0x20] sm:$0xff]  ;;  %p5582_p5 = scmp.ge.s32.totalorder %s5585_s16, 8  }
 0x417   : >> { %v5682_v51 = vld [vmem:[%s9441_s20 + $0x8] sm:$0xff]  ;;  %v5681_v53 = vld [vmem:[%s9441_s20] sm:$0xff]  ;;  %v6073_v17 = vld [vmem:[%s9441_s20 + $0x18] sm:$0xff] }
 0x418   : >> { %v5684_v27 = vmul.f32 %v7064_v44, %v5682_v51  ;;  %v5683_v58 = vmul.f32 %v7068_v21, %v5681_v53  ;;  %v6072_v23 = vld [vmem:[%s9441_s20 + $0x10] sm:$0xff]  ;;  %v6081_v8 = vld [vmem:[%s9441_s20 + $0x28] sm:$0xff]  ;;  %v6080_v39 = vld [vmem:[%s9441_s20 + $0x20] sm:$0xff] }
 0x419   : >> { %v6089_v47 = vld [vmem:[%s9441_s20 + $0x38] sm:$0xff]  ;;  %v6088_v46 = vld [vmem:[%s9441_s20 + $0x30] sm:$0xff]  ;;  %v6097_v10 = vld [vmem:[%s9441_s20 + $0x48] sm:$0xff] }
 0x41a   : >> { %5611 = vbcast.lane.b32.xlu1 %v5605_v33, 264  ;;  %5600 = vbcast.lane.b32.xlu0 %v5594_v22, 264  ;;  %v5689_v50 = vadd.f32 %v5687_v30, %v5684_v27  ;;  %v5688_v4 = vadd.f32 %v5686_v35, %v5683_v58  ;;  %v6093_v9 = vld [vmem:[%s9445_s21 + $0x38] sm:$0xff]  ;;  %v6092_v40 = vld [vmem:[%s9445_s21 + $0x30] sm:$0xff]  ;;  %v6096_v34 = vld [vmem:[%s9441_s20 + $0x40] sm:$0xff] }
 0x41b   : >> { %v6101_v41 = vld [vmem:[%s9445_s21 + $0x48] sm:$0xff]  ;;  %v6100_v31 = vld [vmem:[%s9445_s21 + $0x40] sm:$0xff]  ;;  %v6105_v13 = vld [vmem:[%s9441_s20 + $0x58] sm:$0xff] }
 0x41c   : >> { %v5709_v61 = vmul.f32 %v6073_v17, %v5689_v50  ;;  %v5708_v44 = vmul.f32 %v6072_v23, %v5688_v4  ;;  %v6104_v32 = vld [vmem:[%s9441_s20 + $0x50] sm:$0xff]  ;;  %v6109_v12 = vld [vmem:[%s9445_s21 + $0x58] sm:$0xff]  ;;  %v6113_v24 = vld [vmem:[%s9441_s20 + $0x68] sm:$0xff] }
 0x41d   : >> { %v6112_v27 = vld [vmem:[%s9441_s20 + $0x60] sm:$0xff] }
 0x41e   : >> { %5622 = vbcast.lane.b32.xlu1 %v5616_v3, 264  ;;  %5618 = vbcast.lane.b32.xlu0 %v5616_v3, 256  ;;  %v5714_v62 = vadd.f32 %v6077_v38, %v5709_v61  ;;  %v5713_v55 = vadd.f32 %v6076_v49, %v5708_v44  ;;  %v6108_v3 = vld [vmem:[%s9445_s21 + $0x50] sm:$0xff]  ;;  %v6117_v38 = vld [vmem:[%s9445_s21 + $0x68] sm:$0xff] }
 0x420   : >> { %v5734_v21 = vmul.f32 %v6081_v8, %v5714_v62  ;;  %v5733_v36 = vmul.f32 %v6080_v39, %v5713_v55  ;;  %v6116_v39 = vld [vmem:[%s9445_s21 + $0x60] sm:$0xff] }
 0x422   : >> { %5633 = vbcast.lane.b32.xlu1 %v5627_v1, 264  ;;  %5629 = vbcast.lane.b32.xlu0 %v5627_v1, 256  ;;  %v5739_v15 = vadd.f32 %v6085_v26, %v5734_v21  ;;  %v5738_v6 = vadd.f32 %v6084_v28, %v5733_v36 }
 0x424   : >> { %v5759_v37 = vmul.f32 %v6089_v47, %v5739_v15  ;;  %v5758_v52 = vmul.f32 %v6088_v46, %v5738_v6 }
 0x426   : >> { %5644 = vbcast.lane.b32.xlu1 %v5638_v63, 264  ;;  %5640 = vbcast.lane.b32.xlu0 %v5638_v63, 256  ;;  %v5764_v59 = vadd.f32 %v6093_v9, %v5759_v37  ;;  %v5763_v16 = vadd.f32 %v6092_v40, %v5758_v52  ;;  %v6121_v37 = vld [vmem:[%s9441_s20 + $0x78] sm:$0xff] }
 0x428   : >> { %v5784_v2 = vmul.f32 %v6097_v10, %v5764_v59  ;;  %v5783_v25 = vmul.f32 %v6096_v34, %v5763_v16 }
 0x42a   : >> { %5655 = vbcast.lane.b32.xlu1 %v5649_v14, 264  ;;  %5651 = vbcast.lane.b32.xlu0 %v5649_v14, 256  ;;  %v5789_v19 = vadd.f32 %v6101_v41, %v5784_v2  ;;  %v5788_v18 = vadd.f32 %v6100_v31, %v5783_v25 }
 0x42c   : >> { %v5809_v54 = vmul.f32 %v6105_v13, %v5789_v19  ;;  %v5808_v33 = vmul.f32 %v6104_v32, %v5788_v18 }
 0x42e   : >> { %5666 = vbcast.lane.b32.xlu1 %v5660_v60, 264  ;;  %5662 = vbcast.lane.b32.xlu0 %v5660_v60, 256  ;;  %v5814_v63 = vadd.f32 %v6109_v12, %v5809_v54  ;;  %v5813_v60 = vadd.f32 %v6108_v3, %v5808_v33 }
 0x430   : >> { %v5833_v44 = vmul.f32 %v6112_v27, %v5813_v60 }
 0x432   : >> { %5677 = vbcast.lane.b32.xlu1 %v5671_v56, 264  ;;  %5673 = vbcast.lane.b32.xlu0 %v5671_v56, 256  ;;  %v5838_v46 = vadd.f32 %v6116_v39, %v5833_v44 }
 0x488   : >> { %v5608_v48 = vpop.permute.xlu1 %5607  ;;  %v5597_v42 = vpop.permute.xlu0 %5596 }
 0x489   : >> { %v5690_v45 = vmul.f32 %v5688_v4, %v5597_v42  ;;  %v5715_v11 = vmul.f32 %v5713_v55, %v5608_v48  ;;  %v6125_v42 = vld [vmem:[%s9445_s21 + $0x78] sm:$0xff] }
 0x48b   : >> { %v5692_v1 = vsel %vm842_vm6, %v5690_v45, 0.0  ;;  %v5717_v30 = vsel %vm842_vm6, %v5715_v11, 0.0 }
 0x48c   : >> { %v5612_v0 = vpop.permute.xlu1 %5611  ;;  %v5601_v5 = vpop.permute.xlu0 %5600 }
 0x48d   : >> { %v5716_v22 = vmul.f32 %v5714_v62, %v5612_v0  ;;  %v5691_v29 = vmul.f32 %v5689_v50, %v5601_v5  ;;  %v5834_v50 = vmul.f32 %v6113_v24, %v5814_v63 }
 0x48f   : >> { %v5693_v57 = vsel %vm842_vm6, %v5691_v29, 0.0  ;;  %v5718_v56 = vsel %vm842_vm6, %v5716_v22, 0.0  ;;  %v5839_v26 = vadd.f32 %v6117_v38, %v5834_v50 }
 0x490   : >> { %v5694_v43 = vadd.f32 %v5693_v57, %v5692_v1  ;;  %v5623_v14 = vpop.permute.xlu1 %5622  ;;  %v5619_v7 = vpop.permute.xlu0 %5618  ;;  %v5719_v17 = vadd.f32 %v5718_v56, %v5717_v30 }
 0x491   : >> { %v5741_v51 = vmul.f32 %v5739_v15, %v5623_v14  ;;  %v5740_v53 = vmul.f32 %v5738_v6, %v5619_v7  ;;  %v5859_v2 = vmul.f32 %v6121_v37, %v5839_v26 }
 0x492   : >> { %v5695_v4 = vrot.slane %v5694_v43, 4  ;;  %v5720_v36 = vrot.slane %v5719_v17, 4 }
 0x493   : >> { %v5743_v58 = vsel %vm842_vm6, %v5741_v51, 0.0  ;;  %v5742_v35 = vsel %vm842_vm6, %v5740_v53, 0.0  ;;  %v9489_v44 = vadd.f32 %v6125_v42, %v5859_v2  }
 0x494   : >> { %v5634_v23 = vpop.permute.xlu1 %5633  ;;  %v5630_v61 = vpop.permute.xlu0 %5629  ;;  %v5744_v49 = vadd.f32 %v5743_v58, %v5742_v35  ;;  %v5696_v28 = vadd.f32 %v5695_v4, %v5694_v43  ;;  %v5721_v41 = vadd.f32 %v5720_v36, %v5719_v17 }
 0x495   : >> { %v5766_v62 = vmul.f32 %v5764_v59, %v5634_v23  ;;  %v5765_v8 = vmul.f32 %v5763_v16, %v5630_v61  ;;  %v6120_v59 = vld [vmem:[%s9441_s20 + $0x70] sm:$0xff]  ;;  %v9764_v22 = vmov %v9489_v44 }
 0x496   : >> { %v5745_v9 = vrot.slane %v5744_v49, 4  ;;  %v5697_v25 = vrot.slane %v5696_v28, 2  ;;  %v5858_v13 = vmul.f32 %v6120_v59, %v5838_v46  ;;  %v5722_v29 = vrot.slane %v5721_v41, 2  ;;  %5887 = vst.msk [vmem:[#allocation2 + $0x8] sm:$0xff] (%p5582_p5), %vm842_vm6, %v9764_v22 }
 0x497   : >> { %v5768_v55 = vsel %vm842_vm6, %v5766_v62, 0.0  ;;  %v5767_v21 = vsel %vm842_vm6, %v5765_v8, 0.0 }
 0x498   : >> { %v5769_v15 = vadd.f32 %v5768_v55, %v5767_v21  ;;  %v5645_v6 = vpop.permute.xlu1 %5644  ;;  %v5641_v47 = vpop.permute.xlu0 %5640  ;;  %v5746_v32 = vadd.f32 %v5745_v9, %v5744_v49  ;;  %v5698_v3 = vadd.f32 %v5697_v25, %v5696_v28  ;;  %v5723_v30 = vadd.f32 %v5722_v29, %v5721_v41 }
 0x499   : >> { %v5791_v52 = vmul.f32 %v5789_v19, %v5645_v6  ;;  %v5790_v40 = vmul.f32 %v5788_v18, %v5641_v47  ;;  %v6124_v19 = vld [vmem:[%s9445_s21 + $0x70] sm:$0xff]  ;;  %v9766_v47 = vld [vmem:[#allocation15_spill] sm:$0xff] }
 0x49a   : >> { %v5770_v16 = vrot.slane %v5769_v15, 4  ;;  %v9491_v21 = vadd.f32 %v6124_v19, %v5858_v13   ;;  %v5747_v14 = vrot.slane %v5746_v32, 2  ;;  %v5699_v4 = vrot.slane %v5698_v3, 1 }
 0x49b   : >> { %v5793_v10 = vsel %vm842_vm6, %v5791_v52, 0.0  ;;  %v5792_v34 = vsel %vm842_vm6, %v5790_v40, 0.0  ;;  %vm5701_vm4 = vcmp.eq.s32.totalorder %v9766_v47, 0  ;;  %vm5726_vm5 = vcmp.eq.s32.totalorder %v9766_v47, 1 }
 0x49c   : >> { %v5656_v31 = vpop.permute.xlu1 %5655  ;;  %v5652_v48 = vpop.permute.xlu0 %5651  ;;  %v5794_v45 = vadd.f32 %v5793_v10, %v5792_v34  ;;  %v5771_v18 = vadd.f32 %v5770_v16, %v5769_v15  ;;  %v9765_v43 = vmov %v9491_v21  ;;  %v5748_v23 = vadd.f32 %v5747_v14, %v5746_v32 }
 0x49d   : >> { %v5816_v54 = vmul.f32 %v5814_v63, %v5656_v31  ;;  %v5815_v0 = vmul.f32 %v5813_v60, %v5652_v48  ;;  %v5724_v21 = vrot.slane %v5723_v30, 1  ;;  %v5700_v15 = vadd.f32 %v5699_v4, %v5698_v3  ;;  %v5882_v3 = vld [vmem:[%s5881_s23] sm:$0xff]  ;;  %5886 = vst.msk [vmem:[#allocation2] sm:$0xff] (%p5582_p5), %vm842_vm6, %v9765_v43 }
 0x49e   : >> { %v5795_v5 = vrot.slane %v5794_v45, 4  ;;  %v5772_v24 = vrot.slane %v5771_v18, 2  ;;  %v5749_v6 = vrot.slane %v5748_v23, 1  ;;  %vm5751_vm7 = vcmp.eq.s32.totalorder %v9766_v47, 2 }
 0x49f   : >> { %v5818_v12 = vsel %vm842_vm6, %v5816_v54, 0.0  ;;  %v5817_v33 = vsel %vm842_vm6, %v5815_v0, 0.0  ;;  %v5725_v40 = vadd.f32 %v5724_v21, %v5723_v30  ;;  %v5702_v34 = vsel %vm5701_vm4, %v5700_v15, 0.0 }
 0x4a0   : >> { %v5819_v11 = vadd.f32 %v5818_v12, %v5817_v33  ;;  %v5667_v1 = vpop.permute.xlu1 %5666  ;;  %v5663_v57 = vpop.permute.xlu0 %5662  ;;  %v5796_v7 = vadd.f32 %v5795_v5, %v5794_v45  ;;  %v5773_v44 = vadd.f32 %v5772_v24, %v5771_v18  ;;  %v5750_v2 = vadd.f32 %v5749_v6, %v5748_v23  ;;  %v5879_v12 = vld [vmem:[%s5878_s22] sm:$0xff] }
 0x4a1   : >> { %v5841_v63 = vmul.f32 %v5839_v26, %v5667_v1  ;;  %v5840_v60 = vmul.f32 %v5838_v46, %v5663_v57  ;;  %vm5776_vm8 = vcmp.eq.s32.totalorder %v9766_v47, 3  ;;  %v5727_v42 = vsel %vm5726_vm5, %v5725_v40, %v5702_v34 }
 0x4a2   : >> { %v5820_v56 = vrot.slane %v5819_v11, 4  ;;  %v5797_v51 = vrot.slane %v5796_v7, 2  ;;  %v5774_v46 = vrot.slane %v5773_v44, 1  ;;  %vm5801_vm9 = vcmp.eq.s32.totalorder %v9766_v47, 4 }
 0x4a3   : >> { %v5843_v53 = vsel %vm842_vm6, %v5841_v63, 0.0  ;;  %v5842_v27 = vsel %vm842_vm6, %v5840_v60, 0.0  ;;  %v5752_v45 = vsel %vm5751_vm7, %v5750_v2, %v5727_v42  ;;  %vm5826_vm10 = vcmp.eq.s32.totalorder %v9766_v47, 5 }
 0x4a4   : >> { %v5821_v58 = vadd.f32 %v5820_v56, %v5819_v11  ;;  %v5844_v35 = vadd.f32 %v5843_v53, %v5842_v27  ;;  %v5678_v50 = vpop.permute.xlu1 %5677  ;;  %v5674_v17 = vpop.permute.xlu0 %5673  ;;  %v5798_v8 = vadd.f32 %v5797_v51, %v5796_v7  ;;  %v5775_v41 = vadd.f32 %v5774_v46, %v5773_v44 }
 0x4a5   : >> { %v5866_v61 = vmul.f32 %v9764_v22, %v5678_v50  ;;  %v5865_v38 = vmul.f32 %v9765_v43, %v5674_v17  ;;  %vm5851_vm11 = vcmp.eq.s32.totalorder %v9766_v47, 6  ;;  %vm5876_vm12 = vcmp.eq.s32.totalorder %v9766_v47, 7 }
 0x4a6   : >> { %v5822_v49 = vrot.slane %v5821_v58, 2  ;;  %v5845_v62 = vrot.slane %v5844_v35, 4  ;;  %v5799_v52 = vrot.slane %v5798_v8, 1  ;;  %v5777_v0 = vsel %vm5776_vm8, %v5775_v41, %v5752_v45 }
 0x4a7   : >> { %v5868_v39 = vsel %vm842_vm6, %v5866_v61, 0.0  ;;  %v5867_v55 = vsel %vm842_vm6, %v5865_v38, 0.0  ;;  %v9767_v44 = vmov %v9764_v22  ;;  %v9768_v21 = vmov %v9765_v43 }
 0x4a8   : >> { %v5823_v26 = vadd.f32 %v5822_v49, %v5821_v58  ;;  %v5846_v36 = vadd.f32 %v5845_v62, %v5844_v35  ;;  %v5869_v28 = vadd.f32 %v5868_v39, %v5867_v55  ;;  %v5800_v48 = vadd.f32 %v5799_v52, %v5798_v8 }
 0x4aa   : >> { %v5847_v37 = vrot.slane %v5846_v36, 2  ;;  %v5870_v9 = vrot.slane %v5869_v28, 4  ;;  %v5824_v59 = vrot.slane %v5823_v26, 1  ;;  %v5802_v18 = vsel %vm5801_vm9, %v5800_v48, %v5777_v0 }
 0x4ac   : >> { %v5848_v16 = vadd.f32 %v5847_v37, %v5846_v36  ;;  %v5871_v10 = vadd.f32 %v5870_v9, %v5869_v28  ;;  %v5825_v13 = vadd.f32 %v5824_v59, %v5823_v26 }
 0x4ae   : >> { %v5849_v25 = vrot.slane %v5848_v16, 1  ;;  %v5872_v31 = vrot.slane %v5871_v10, 2  ;;  %v5827_v5 = vsel %vm5826_vm10, %v5825_v13, %v5802_v18 }
 0x4b0   : >> { %v5873_v32 = vadd.f32 %v5872_v31, %v5871_v10  ;;  %v5850_v54 = vadd.f32 %v5849_v25, %v5848_v16 }
 0x4b2   : >> { %v5874_v19 = vrot.slane %v5873_v32, 1  ;;  %v5852_v29 = vsel %vm5851_vm11, %v5850_v54, %v5827_v5 }
 0x4b4   : >> { %v5875_v33 = vadd.f32 %v5874_v19, %v5873_v32 }
 0x4b5   : > { %5584 = sbr.rel (!%p5582_p5) target bundleno = 1041 (0x411), region = 117 }
 0x4b6   : >> { %v5877_v11 = vsel %vm5876_vm12, %v5875_v33, %v5852_v29 }
 0x4b7   : >> { %v5880_v1 = vadd.f32 %v5879_v12, %v5877_v11 }
 0x4b9   : >> { %v5883_v57 = vmul.f32 %v5882_v3, %v5880_v1 }
 0x4bb   : >> { %5885 = vst.msk [vmem:[%s5884_s24] sm:$0xff] %vm842_vm6, %v5883_v57 }
 0x4bc PF: > { %s19_s11 = sadd.s32 1, %s7060_s11   ;;  %s9769_s30 = smov %s7056_s10 }
 0x4bd   : > { %p16_p6 = scmp.ge.s32.totalorder %s19_s11, 4   ;;  %s9770_s10 = smov %s9772_s12 }
 0x4bf   :  { %18 = sbr.rel (!%p16_p6) target bundleno = 2 (0x2), region = 128 }

</bundles_post_ra>
